<compile_context>
chip_gen: v7x
topology: tpu7x:2x2x1
jax: 0.10.0
libtpu: 0.0.40
codegen_flags: <defaults>
</compile_context>

<pallas_src>
import functools

import jax
import jax.numpy as jnp
import numpy as np
from jax.experimental import pallas as pl
from jax.experimental.pallas import tpu as pltpu


def _pick_tile(total, cap):
    """Largest divisor of `total` that is <= cap and a multiple of 8 (else `total`)."""
    if total <= cap:
        return total
    for t in range(cap, 7, -1):
        if total % t == 0 and t % 8 == 0:
            return t
    return total


# ----------------------------------------------------------------------------
# Kernel 1: ChannelGate pooling (avg + max over H*W per channel), HW-blocked.
#   x: (N, HW, C) f32  ->  avg: (N, C), max: (N, C)
# ----------------------------------------------------------------------------
def _pool_kernel(x_ref, avg_ref, max_ref, *, inv_hw):
    t = pl.program_id(0)
    nb = x_ref.shape[0]
    for n in range(nb):                              # static loop, N is tiny
        xn = x_ref[n]                                # (THW, C)
        psum = jnp.sum(xn, axis=0, keepdims=True)    # (1, C)
        pmax = jnp.max(xn, axis=0, keepdims=True)    # (1, C)
        row = pl.ds(n, 1)

        @pl.when(t == 0)
        def _(psum=psum, pmax=pmax, row=row):
            avg_ref[row, :] = psum
            max_ref[row, :] = pmax

        @pl.when(t != 0)
        def _(psum=psum, pmax=pmax, row=row):
            avg_ref[row, :] = avg_ref[row, :] + psum
            max_ref[row, :] = jnp.maximum(max_ref[row, :], pmax)

    @pl.when(t == pl.num_programs(0) - 1)
    def _():
        avg_ref[...] = avg_ref[...] * inv_hw


def pool_avg_max(x):
    N, HW, C = x.shape
    thw = _pick_tile(HW, 1024)
    ce = pl.CostEstimate(flops=int(2 * N * HW * C), transcendentals=0,
                         bytes_accessed=int(4 * (N * HW * C + 2 * N * C)))
    return pl.pallas_call(
        functools.partial(_pool_kernel, inv_hw=1.0 / HW),
        out_shape=(jax.ShapeDtypeStruct((N, C), jnp.float32),
                   jax.ShapeDtypeStruct((N, C), jnp.float32)),
        grid=(HW // thw,),
        in_specs=[pl.BlockSpec((N, thw, C), lambda t: (0, t, 0))],
        out_specs=(pl.BlockSpec((N, C), lambda t: (0, 0)),
                   pl.BlockSpec((N, C), lambda t: (0, 0))),
        compiler_params=pltpu.CompilerParams(
            dimension_semantics=("arbitrary",),
            vmem_limit_bytes=32 * 1024 * 1024),
        cost_estimate=ce,
    )(x)


# ----------------------------------------------------------------------------
# Kernel 2: dual deconv (ConvTranspose2d k=2 s=2) as ONE channel matmul.
#   x: (N, HW, Ch) bf16, att: (N, Ch, 1) f32, w: (Ch, Cl*4) f32, b: (1, 2*Cl*4) f32
#   -> (N, HW, 2*Cl*4) f32  [cols 0:Cl*4 plain, Cl*4: channel-gated]
# ----------------------------------------------------------------------------
def _deconv_dual_kernel(x_ref, att_ref, w_ref, b_ref, o_ref):
    w = w_ref[...]                                          # (Ch, Cl*4) f32
    att = att_ref[0]                                        # (Ch, 1)   f32
    wcat = jnp.concatenate([w, att * w], axis=1).astype(jnp.bfloat16)  # (Ch, 128)
    y = jnp.dot(x_ref[0], wcat, preferred_element_type=jnp.float32)    # (TM, 128)
    o_ref[0] = y + b_ref[...]


def deconv_dual(x_bf16, att_col, w, b_cat):
    N, HW, Ch = x_bf16.shape
    ncols = b_cat.shape[1]
    tm = _pick_tile(HW, 512)
    ce = pl.CostEstimate(
        flops=int(2 * N * HW * Ch * ncols), transcendentals=0,
        bytes_accessed=int(2 * N * HW * Ch + 4 * Ch * (ncols // 2)
                           + 4 * N * HW * ncols))
    return pl.pallas_call(
        _deconv_dual_kernel,
        out_shape=jax.ShapeDtypeStruct((N, HW, ncols), jnp.float32),
        grid=(N, HW // tm),
        in_specs=[pl.BlockSpec((1, tm, Ch), lambda n, m: (n, m, 0)),
                  pl.BlockSpec((1, Ch, 1), lambda n, m: (n, 0, 0)),
                  pl.BlockSpec((Ch, ncols // 2), lambda n, m: (0, 0)),
                  pl.BlockSpec((1, ncols), lambda n, m: (0, 0))],
        out_specs=pl.BlockSpec((1, tm, ncols), lambda n, m: (n, m, 0)),
        compiler_params=pltpu.CompilerParams(
            dimension_semantics=("parallel", "parallel"),
            vmem_limit_bytes=32 * 1024 * 1024),
        cost_estimate=ce,
    )(x_bf16, att_col, w, b_cat)


# ----------------------------------------------------------------------------
# Kernel 3: SpatialGate fused: channel compress + pad + 7x7 conv + BN + sigmoid.
#   x: (N, H2, W2, Cl) f32, w_bn: SMEM (100,) = 98 conv taps + (bn_a, bn_b)
#   -> gate: (N, H2, W2) f32
# ----------------------------------------------------------------------------
def _gate_kernel(x_ref, w_ref, o_ref, pad_ref):
    x = x_ref[0]                                            # (H2, W2, Cl)
    h2, w2 = x.shape[0], x.shape[1]
    zc = jnp.zeros((h2, 3), jnp.float32)
    pad_ref[...] = jnp.zeros_like(pad_ref)
    # ChannelPool = [max_c, mean_c]; pad left/right via lane concat, top/bottom via
    # the zero-initialized scratch rows (store at sublane offset 3, full lane width).
    pad_ref[0, 3:3 + h2, :] = jnp.concatenate(
        [zc, jnp.max(x, axis=-1), zc], axis=1)
    pad_ref[1, 3:3 + h2, :] = jnp.concatenate(
        [zc, jnp.mean(x, axis=-1), zc], axis=1)

    acc = jnp.zeros((h2, w2), jnp.float32)
    for ci in range(2):
        for kw in range(7):
            cols = pad_ref[ci, :, kw:kw + w2]               # one lane-offset load / (ci,kw)
            for kh in range(7):
                acc = acc + cols[kh:kh + h2, :] * w_ref[ci * 49 + kh * 7 + kw]
    # folded inference BatchNorm + sigmoid (EUP)
    o_ref[0] = jax.nn.sigmoid(acc * w_ref[98] + w_ref[99])


def spatial_gate(x2d, w_bn):
    N, H2, W2, Cl = x2d.shape
    ce = pl.CostEstimate(flops=int(N * H2 * W2 * (2 * 98 + 2 * Cl + 2)),
                         transcendentals=int(N * H2 * W2),
                         bytes_accessed=int(4 * (N * H2 * W2 * Cl + N * H2 * W2)))
    return pl.pallas_call(
        _gate_kernel,
        out_shape=jax.ShapeDtypeStruct((N, H2, W2), jnp.float32),
        grid=(N,),
        in_specs=[pl.BlockSpec((1, H2, W2, Cl), lambda n: (n, 0, 0, 0)),
                  pl.BlockSpec(memory_space=pltpu.MemorySpace.SMEM)],
        out_specs=pl.BlockSpec((1, H2, W2), lambda n: (n, 0, 0)),
        scratch_shapes=[pltpu.VMEM((2, H2 + 6, W2 + 6), jnp.float32)],
        compiler_params=pltpu.CompilerParams(
            dimension_semantics=("parallel",),
            vmem_limit_bytes=32 * 1024 * 1024),
        cost_estimate=ce,
    )(x2d, w_bn)


# ----------------------------------------------------------------------------
# Kernel 4: conv3x3 (im2col, K = 9*Cl) + fused epilogue relu(x1 + x2*gate*x3).
#   patches: (N, T, 9*Cl) bf16, w3: (9*Cl, Cl) bf16, x1/x2: (N, T, Cl) f32,
#   gate: (N, T, 1) f32  ->  (N, T, Cl) f32
# ----------------------------------------------------------------------------
def _conv3_fuse_kernel(p_ref, w_ref, x1_ref, x2_ref, g_ref, o_ref):
    x3 = jnp.dot(p_ref[0], w_ref[...], preferred_element_type=jnp.float32)  # (TT, Cl)
    o_ref[0] = jnp.maximum(x1_ref[0] + x2_ref[0] * g_ref[0] * x3, 0.0)


def conv3_fuse(patches, w3, x1, x2, gate):
    N, T, K = patches.shape
    Cl = w3.shape[1]
    tt = _pick_tile(T, 512)
    ce = pl.CostEstimate(
        flops=int(2 * N * T * K * Cl + 4 * N * T * Cl), transcendentals=0,
        bytes_accessed=int(2 * (N * T * K + K * Cl)
                           + 4 * (3 * N * T * Cl + N * T)))
    return pl.pallas_call(
        _conv3_fuse_kernel,
        out_shape=jax.ShapeDtypeStruct((N, T, Cl), jnp.float32),
        grid=(N, T // tt),
        in_specs=[pl.BlockSpec((1, tt, K), lambda n, t: (n, t, 0)),
                  pl.BlockSpec((K, Cl), lambda n, t: (0, 0)),
                  pl.BlockSpec((1, tt, Cl), lambda n, t: (n, t, 0)),
                  pl.BlockSpec((1, tt, Cl), lambda n, t: (n, t, 0)),
                  pl.BlockSpec((1, tt, 1), lambda n, t: (n, t, 0))],
        out_specs=pl.BlockSpec((1, tt, Cl), lambda n, t: (n, t, 0)),
        compiler_params=pltpu.CompilerParams(
            dimension_semantics=("parallel", "parallel"),
            vmem_limit_bytes=32 * 1024 * 1024),
        cost_estimate=ce,
    )(patches, w3, x1, x2, gate)


# ----------------------------------------------------------------------------
# MAF forward (wrapper glue: layout transposes, pixel-unshuffle, tiny MLP, im2col)
# ----------------------------------------------------------------------------
def maf_forward(fms_high, fms_low, p):
    N, Ch, H, W = fms_high.shape
    Cl = p['w_dc'].shape[1]
    H2, W2 = 2 * H, 2 * W
    HW, T = H * W, H2 * W2
    f32, bf16 = jnp.float32, jnp.bfloat16

    xh = jnp.transpose(fms_high, (0, 2, 3, 1)).astype(f32).reshape(N, HW, Ch)
    xl = jnp.transpose(fms_low, (0, 2, 3, 1)).astype(f32)        # (N,H2,W2,Cl)

    # --- ChannelGate: Pallas pooling + tiny MLP (Ch -> Ch//16 -> Ch) in XLA glue.
    avg, mx = pool_avg_max(xh)

    def mlp(v):
        return jnp.maximum(v @ p['w1'].T + p['b1'], 0.0) @ p['w2'].T + p['b2']

    att = jax.nn.sigmoid(mlp(avg) + mlp(mx))                     # (N, Ch)

    # --- Both deConv branches in ONE MXU matmul (att folded into weights in-kernel).
    wdc = p['w_dc'].reshape(Ch, Cl * 4).astype(f32)              # cols: (co, kh, kw)
    bdc4 = jnp.repeat(p['b_dc'], 4)
    b_cat = jnp.concatenate([bdc4, bdc4]).reshape(1, 2 * Cl * 4).astype(f32)
    y = deconv_dual(xh.astype(bf16), att.reshape(N, Ch, 1).astype(f32), wdc, b_cat)

    # pixel-unshuffle both branches with a single transpose.
    # TODO(synk): fold the unshuffle into the deconv output index_map (strided
    # sub-block stores) to remove this XLA round trip.
    y = y.reshape(N, H, W, 2, Cl, 2, 2)
    y = jnp.transpose(y, (3, 0, 1, 5, 2, 6, 4)).reshape(2, N, H2, W2, Cl)
    x1u, x2d = y[0], y[1]

    # --- SpatialGate fully fused (compress + pad + 7x7 conv + folded BN + sigmoid).
    a_bn = p['bn_gamma'][0] / jnp.sqrt(p['bn_var'][0] + 1e-5)
    b_bn = p['bn_beta'][0] - p['bn_mean'][0] * a_bn
    w_bn = jnp.concatenate([p['w_sp'].reshape(-1),
                            jnp.stack([a_bn, b_bn])]).astype(f32)   # (100,)
    gate = spatial_gate(x2d, w_bn)                                  # (N, H2, W2)

    # --- conv3x3(fms_low) via im2col (K = 9*Cl) + fused elementwise epilogue.
    xl_pad = jnp.pad(xl, ((0, 0), (1, 1), (1, 1), (0, 0)))
    patches = jnp.concatenate(
        [xl_pad[:, kh:kh + H2, kw:kw + W2, :] for kh in range(3) for kw in range(3)],
        axis=-1).reshape(N, T, 9 * Cl).astype(bf16)
    w3 = jnp.transpose(p['w_c2'], (2, 3, 1, 0)).reshape(9 * Cl, Cl).astype(bf16)

    out = conv3_fuse(patches, w3,
                     x1u.reshape(N, T, Cl), x2d.reshape(N, T, Cl),
                     gate.reshape(N, T, 1))                          # (N, T, Cl)
    # TODO(synk): emit NCHW directly from the fuse kernel (lane-dense store) and drop
    # this final XLA transpose.
    return jnp.transpose(out.reshape(N, H2, W2, Cl), (0, 3, 1, 2))


# ----------------------------------------------------------------------------
# Deterministic parameter init (shapes from the PyTorch __init__)
# ----------------------------------------------------------------------------
def init_params(key, ch_high, ch_low):
    ks = jax.random.split(key, 12)
    hidden = max(ch_high // 16, 1)
    return {
        'w_dc': 0.1 * jax.random.normal(ks[0], (ch_high, ch_low, 2, 2), jnp.float32),
        'b_dc': 0.1 * jax.random.normal(ks[1], (ch_low,), jnp.float32),
        'w1':   0.2 * jax.random.normal(ks[2], (hidden, ch_high), jnp.float32),
        'b1':   0.1 * jax.random.normal(ks[3], (hidden,), jnp.float32),
        'w2':   0.2 * jax.random.normal(ks[4], (ch_high, hidden), jnp.float32),
        'b2':   0.1 * jax.random.normal(ks[5], (ch_high,), jnp.float32),
        'w_sp': 0.1 * jax.random.normal(ks[6], (1, 2, 7, 7), jnp.float32),
        'bn_gamma': 1.0 + 0.1 * jax.random.normal(ks[7], (1,), jnp.float32),
        'bn_beta':  0.1 * jax.random.normal(ks[8], (1,), jnp.float32),
        'bn_mean':  0.1 * jax.random.normal(ks[9], (1,), jnp.float32),
        'bn_var':   1.0 + 0.1 * jnp.abs(jax.random.normal(ks[10], (1,), jnp.float32)),
        'w_c2': 0.1 * jax.random.normal(ks[11], (ch_low, ch_low, 3, 3), jnp.float32),
        # conv1 (1x1) from the PyTorch module is unused in forward -> omitted.
    }


# ----------------------------------------------------------------------------
# Pure-JAX NCHW reference (mirrors the PyTorch math) for validation
# ----------------------------------------------------------------------------
def ref_forward(fh, fl, p):
    hi = jax.lax.Precision.HIGHEST
    N, Ch, H, W = fh.shape
    Cl = p['w_dc'].shape[1]
    H2, W2 = 2 * H, 2 * W

    def deconv(x):
        t = jnp.einsum('ncij,cokl->noijkl', x, p['w_dc'], precision=hi)
        y = jnp.zeros((N, Cl, H2, W2), jnp.float32)
        y = y.at[:, :, 0::2, 0::2].set(t[..., 0, 0])
        y = y.at[:, :, 0::2, 1::2].set(t[..., 0, 1])
        y = y.at[:, :, 1::2, 0::2].set(t[..., 1, 0])
        y = y.at[:, :, 1::2, 1::2].set(t[..., 1, 1])
        return y + p['b_dc'][None, :, None, None]

    x1 = deconv(fh)

    avg = jnp.mean(fh, axis=(2, 3))
    mx = jnp.max(fh, axis=(2, 3))

    def mlp(v):
        return jnp.maximum(v @ p['w1'].T + p['b1'], 0.0) @ p['w2'].T + p['b2']

    att = jax.nn.sigmoid(mlp(avg) + mlp(mx))
    x2 = deconv(fh * att[:, :, None, None])

    comp = jnp.stack([jnp.max(x2, axis=1), jnp.mean(x2, axis=1)], axis=1)
    cp = jnp.pad(comp, ((0, 0), (0, 0), (3, 3), (3, 3)))
    s = jnp.zeros((N, H2, W2), jnp.float32)
    for kh in range(7):
        for kw in range(7):
            for ci in range(2):
                s = s + cp[:, ci, kh:kh + H2, kw:kw + W2] * p['w_sp'][0, ci, kh, kw]
    s = (s - p['bn_mean'][0]) / jnp.sqrt(p['bn_var'][0] + 1e-5) * p['bn_gamma'][0] + p['bn_beta'][0]
    x2 = x2 * jax.nn.sigmoid(s)[:, None, :, :]

    flp = jnp.pad(fl, ((0, 0), (0, 0), (1, 1), (1, 1)))
    x3 = jnp.zeros_like(fl)
    for kh in range(3):
        for kw in range(3):
            x3 = x3 + jnp.einsum('ncij,oc->noij',
                                 flp[:, :, kh:kh + H2, kw:kw + W2],
                                 p['w_c2'][:, :, kh, kw], precision=hi)

    return jnp.maximum(x1 + x2 * x3, 0.0)


if __name__ == "__main__":
    key = jax.random.PRNGKey(0)
    k1, k2, k3 = jax.random.split(key, 3)
    Ch, Cl, H, W = 32, 16, 8, 8                     # channels_high=32, channels_low=16
    fms_high = jax.random.normal(k1, (2, Ch, H, W), jnp.float32)
    fms_low = jax.random.normal(k2, (2, Cl, 2 * H, 2 * W), jnp.float32)
    params = init_params(k3, Ch, Cl)

    out = jax.jit(maf_forward)(fms_high, fms_low, params)
    out = jax.block_until_ready(out)

    ref = ref_forward(fms_high, fms_low, params)
    np.testing.assert_allclose(np.asarray(out), np.asarray(ref), rtol=3e-2, atol=3e-2)
    assert out.shape == (2, Cl, 2 * H, 2 * W)
    print("KERNEL_OK")
</pallas_src>

<mosaic_0001>
module attributes {stable_mosaic.version = 11 : i64} {
  func.func @_pool_kernel(%arg0: i32, %arg1: memref<2x64x32xf32, #tpu.memory_space<vmem>>, %arg2: memref<2x32xf32, #tpu.memory_space<vmem>>, %arg3: memref<2x32xf32, #tpu.memory_space<vmem>>) attributes {dimension_semantics = [#tpu.dimension_semantics<arbitrary>], iteration_bounds = array<i64: 1>, scalar_prefetch = 0 : i64, scratch_operands = 0 : i64, tpu.core_type = #tpu.core_type<tc>, window_params = [{transform_indices = @transform_0, window_bounds = array<i64: 2, 64, 32>}, {pipeline_mode = #tpu.pipeline_mode<synchronous>, transform_indices = @transform_1, window_bounds = array<i64: 2, 32>}, {pipeline_mode = #tpu.pipeline_mode<synchronous>, transform_indices = @transform_2, window_bounds = array<i64: 2, 32>}]} {
    %c0 = arith.constant 0 : index
    %c0_0 = arith.constant 0 : index
    %c0_1 = arith.constant 0 : index
    %0 = vector.load %arg1[%c0, %c0_0, %c0_1] : memref<2x64x32xf32, #tpu.memory_space<vmem>>, vector<1x64x32xf32>
    %1 = vector.shape_cast %0 : vector<1x64x32xf32> to vector<64x32xf32>
    %cst = arith.constant dense<0.000000e+00> : vector<32xf32>
    %2 = vector.multi_reduction <add>, %1, %cst [0] : vector<64x32xf32> to vector<32xf32>
    %3 = vector.shape_cast %2 : vector<32xf32> to vector<1x32xf32>
    %cst_2 = arith.constant dense<0xFF800000> : vector<32xf32>
    %4 = vector.multi_reduction <maximumf>, %1, %cst_2 [0] : vector<64x32xf32> to vector<32xf32>
    %5 = vector.shape_cast %4 : vector<32xf32> to vector<1x32xf32>
    %c0_i32 = arith.constant 0 : i32
    %6 = arith.cmpi eq, %arg0, %c0_i32 : i32
    %7 = arith.extui %6 : i1 to i32
    %c0_i32_3 = arith.constant 0 : i32
    %8 = arith.cmpi ne, %7, %c0_i32_3 : i32
    scf.if %8 {
      %c0_16 = arith.constant 0 : index
      %c0_17 = arith.constant 0 : index
      %27 = vector.load %arg2[%c0_16, %c0_17] : memref<2x32xf32, #tpu.memory_space<vmem>>, vector<1x32xf32>
      tpu.vector_store %arg2[%c0_16, %c0_17], %3 {strides = array<i32>} : memref<2x32xf32, #tpu.memory_space<vmem>>, vector<1x32xf32>,
      %c0_18 = arith.constant 0 : index
      %c0_19 = arith.constant 0 : index
      %28 = vector.load %arg3[%c0_18, %c0_19] : memref<2x32xf32, #tpu.memory_space<vmem>>, vector<1x32xf32>
      tpu.vector_store %arg3[%c0_18, %c0_19], %5 {strides = array<i32>} : memref<2x32xf32, #tpu.memory_space<vmem>>, vector<1x32xf32>,
    } else {
    }
    %c0_i32_4 = arith.constant 0 : i32
    %9 = arith.cmpi ne, %arg0, %c0_i32_4 : i32
    %10 = arith.extui %9 : i1 to i32
    %c0_i32_5 = arith.constant 0 : i32
    %11 = arith.cmpi ne, %10, %c0_i32_5 : i32
    scf.if %11 {
      %c0_16 = arith.constant 0 : index
      %c0_17 = arith.constant 0 : index
      %27 = vector.load %arg2[%c0_16, %c0_17] : memref<2x32xf32, #tpu.memory_space<vmem>>, vector<1x32xf32>
      %28 = arith.addf %27, %3 : vector<1x32xf32>
      %c0_18 = arith.constant 0 : index
      %c0_19 = arith.constant 0 : index
      %29 = vector.load %arg2[%c0_18, %c0_19] : memref<2x32xf32, #tpu.memory_space<vmem>>, vector<1x32xf32>
      tpu.vector_store %arg2[%c0_18, %c0_19], %28 {strides = array<i32>} : memref<2x32xf32, #tpu.memory_space<vmem>>, vector<1x32xf32>,
      %c0_20 = arith.constant 0 : index
      %c0_21 = arith.constant 0 : index
      %30 = vector.load %arg3[%c0_20, %c0_21] : memref<2x32xf32, #tpu.memory_space<vmem>>, vector<1x32xf32>
      %31 = arith.maximumf %30, %5 : vector<1x32xf32>
      %c0_22 = arith.constant 0 : index
      %c0_23 = arith.constant 0 : index
      %32 = vector.load %arg3[%c0_22, %c0_23] : memref<2x32xf32, #tpu.memory_space<vmem>>, vector<1x32xf32>
      tpu.vector_store %arg3[%c0_22, %c0_23], %31 {strides = array<i32>} : memref<2x32xf32, #tpu.memory_space<vmem>>, vector<1x32xf32>,
    } else {
    }
    %c1 = arith.constant 1 : index
    %c0_6 = arith.constant 0 : index
    %c0_7 = arith.constant 0 : index
    %12 = vector.load %arg1[%c1, %c0_6, %c0_7] : memref<2x64x32xf32, #tpu.memory_space<vmem>>, vector<1x64x32xf32>
    %13 = vector.shape_cast %12 : vector<1x64x32xf32> to vector<64x32xf32>
    %cst_8 = arith.constant dense<0.000000e+00> : vector<32xf32>
    %14 = vector.multi_reduction <add>, %13, %cst_8 [0] : vector<64x32xf32> to vector<32xf32>
    %15 = vector.shape_cast %14 : vector<32xf32> to vector<1x32xf32>
    %cst_9 = arith.constant dense<0xFF800000> : vector<32xf32>
    %16 = vector.multi_reduction <maximumf>, %13, %cst_9 [0] : vector<64x32xf32> to vector<32xf32>
    %17 = vector.shape_cast %16 : vector<32xf32> to vector<1x32xf32>
    %c0_i32_10 = arith.constant 0 : i32
    %18 = arith.cmpi eq, %arg0, %c0_i32_10 : i32
    %19 = arith.extui %18 : i1 to i32
    %c0_i32_11 = arith.constant 0 : i32
    %20 = arith.cmpi ne, %19, %c0_i32_11 : i32
    scf.if %20 {
      %c1_16 = arith.constant 1 : index
      %c0_17 = arith.constant 0 : index
      %27 = vector.load %arg2[%c1_16, %c0_17] : memref<2x32xf32, #tpu.memory_space<vmem>>, vector<1x32xf32>
      tpu.vector_store %arg2[%c1_16, %c0_17], %15 {strides = array<i32>} : memref<2x32xf32, #tpu.memory_space<vmem>>, vector<1x32xf32>,
      %c1_18 = arith.constant 1 : index
      %c0_19 = arith.constant 0 : index
      %28 = vector.load %arg3[%c1_18, %c0_19] : memref<2x32xf32, #tpu.memory_space<vmem>>, vector<1x32xf32>
      tpu.vector_store %arg3[%c1_18, %c0_19], %17 {strides = array<i32>} : memref<2x32xf32, #tpu.memory_space<vmem>>, vector<1x32xf32>,
    } else {
    }
    %c0_i32_12 = arith.constant 0 : i32
    %21 = arith.cmpi ne, %arg0, %c0_i32_12 : i32
    %22 = arith.extui %21 : i1 to i32
    %c0_i32_13 = arith.constant 0 : i32
    %23 = arith.cmpi ne, %22, %c0_i32_13 : i32
    scf.if %23 {
      %c1_16 = arith.constant 1 : index
      %c0_17 = arith.constant 0 : index
      %27 = vector.load %arg2[%c1_16, %c0_17] : memref<2x32xf32, #tpu.memory_space<vmem>>, vector<1x32xf32>
      %28 = arith.addf %27, %15 : vector<1x32xf32>
      %c1_18 = arith.constant 1 : index
      %c0_19 = arith.constant 0 : index
      %29 = vector.load %arg2[%c1_18, %c0_19] : memref<2x32xf32, #tpu.memory_space<vmem>>, vector<1x32xf32>
      tpu.vector_store %arg2[%c1_18, %c0_19], %28 {strides = array<i32>} : memref<2x32xf32, #tpu.memory_space<vmem>>, vector<1x32xf32>,
      %c1_20 = arith.constant 1 : index
      %c0_21 = arith.constant 0 : index
      %30 = vector.load %arg3[%c1_20, %c0_21] : memref<2x32xf32, #tpu.memory_space<vmem>>, vector<1x32xf32>
      %31 = arith.maximumf %30, %17 : vector<1x32xf32>
      %c1_22 = arith.constant 1 : index
      %c0_23 = arith.constant 0 : index
      %32 = vector.load %arg3[%c1_22, %c0_23] : memref<2x32xf32, #tpu.memory_space<vmem>>, vector<1x32xf32>
      tpu.vector_store %arg3[%c1_22, %c0_23], %31 {strides = array<i32>} : memref<2x32xf32, #tpu.memory_space<vmem>>, vector<1x32xf32>,
    } else {
    }
    %c0_i32_14 = arith.constant 0 : i32
    %24 = arith.cmpi eq, %arg0, %c0_i32_14 : i32
    %25 = arith.extui %24 : i1 to i32
    %c0_i32_15 = arith.constant 0 : i32
    %26 = arith.cmpi ne, %25, %c0_i32_15 : i32
    scf.if %26 {
      %c0_16 = arith.constant 0 : index
      %c0_17 = arith.constant 0 : index
      %27 = vector.load %arg2[%c0_16, %c0_17] : memref<2x32xf32, #tpu.memory_space<vmem>>, vector<2x32xf32>
      %cst_18 = arith.constant 1.562500e-02 : f32
      %28 = vector.broadcast %cst_18 : f32 to vector<2x32xf32>
      %29 = arith.mulf %27, %28 : vector<2x32xf32>
      %c0_19 = arith.constant 0 : index
      %c0_20 = arith.constant 0 : index
      %30 = vector.load %arg2[%c0_19, %c0_20] : memref<2x32xf32, #tpu.memory_space<vmem>>, vector<2x32xf32>
      tpu.vector_store %arg2[%c0_19, %c0_20], %29 {strides = array<i32>} : memref<2x32xf32, #tpu.memory_space<vmem>>, vector<2x32xf32>,
    } else {
    }
    return
  }
  func.func @transform_0(%arg0: i32) -> (i32, i32, i32) {
    %c0_i32 = arith.constant 0 : i32
    %c0_i32_0 = arith.constant 0 : i32
    %c0_i32_1 = arith.constant 0 : i32
    return %c0_i32, %arg0, %c0_i32_0 : i32, i32, i32
  }
  func.func @transform_1(%arg0: i32) -> (i32, i32) {
    %c0_i32 = arith.constant 0 : i32
    %c0_i32_0 = arith.constant 0 : i32
    %c0_i32_1 = arith.constant 0 : i32
    return %c0_i32, %c0_i32_0 : i32, i32
  }
  func.func @transform_2(%arg0: i32) -> (i32, i32) {
    %c0_i32 = arith.constant 0 : i32
    %c0_i32_0 = arith.constant 0 : i32
    %c0_i32_1 = arith.constant 0 : i32
    return %c0_i32, %c0_i32_0 : i32, i32
  }
}

module attributes {stable_mosaic.version = 11 : i64} {
  func.func @_deconv_dual_kernel(%arg0: i32, %arg1: i32, %arg2: memref<1x64x32xbf16, #tpu.memory_space<vmem>>, %arg3: memref<1x32x1xf32, #tpu.memory_space<vmem>>, %arg4: memref<32x64xf32, #tpu.memory_space<vmem>>, %arg5: memref<1x128xf32, #tpu.memory_space<vmem>>, %arg6: memref<1x64x128xf32, #tpu.memory_space<vmem>>) attributes {dimension_semantics = [#tpu.dimension_semantics<parallel>, #tpu.dimension_semantics<parallel>], iteration_bounds = array<i64: 2, 1>, scalar_prefetch = 0 : i64, scratch_operands = 0 : i64, tpu.core_type = #tpu.core_type<tc>, window_params = [{transform_indices = @transform_0, window_bounds = array<i64: 1, 64, 32>}, {transform_indices = @transform_1, window_bounds = array<i64: 1, 32, 1>}, {pipeline_mode = #tpu.pipeline_mode<synchronous>, transform_indices = @transform_2, window_bounds = array<i64: 32, 64>}, {pipeline_mode = #tpu.pipeline_mode<synchronous>, transform_indices = @transform_3, window_bounds = array<i64: 1, 128>}, {transform_indices = @transform_4, window_bounds = array<i64: 1, 64, 128>}]} {
    %c0 = arith.constant 0 : index
    %c0_0 = arith.constant 0 : index
    %0 = vector.load %arg4[%c0, %c0_0] : memref<32x64xf32, #tpu.memory_space<vmem>>, vector<32x64xf32>
    %c0_1 = arith.constant 0 : index
    %c0_2 = arith.constant 0 : index
    %c0_3 = arith.constant 0 : index
    %1 = vector.load %arg3[%c0_1, %c0_2, %c0_3] : memref<1x32x1xf32, #tpu.memory_space<vmem>>, vector<1x32x1xf32>
    %2 = vector.shape_cast %1 : vector<1x32x1xf32> to vector<32x1xf32>
    %3 = vector.broadcast %2 : vector<32x1xf32> to vector<32x64xf32>
    %4 = arith.mulf %3, %0 : vector<32x64xf32>
    %5 = tpu.concatenate %0, %4 in 1 : vector<32x64xf32>, vector<32x64xf32> -> vector<32x128xf32>
    %6 = arith.truncf %5 : vector<32x128xf32> to vector<32x128xbf16>
    %c0_4 = arith.constant 0 : index
    %c0_5 = arith.constant 0 : index
    %c0_6 = arith.constant 0 : index
    %7 = vector.load %arg2[%c0_4, %c0_5, %c0_6] : memref<1x64x32xbf16, #tpu.memory_space<vmem>>, vector<1x64x32xbf16>
    %8 = vector.shape_cast %7 : vector<1x64x32xbf16> to vector<64x32xbf16>
    %cst = arith.constant dense<0.000000e+00> : vector<64x128xf32>
    %9 = tpu.matmul %8, %6, %cst {dimension_numbers = #tpu.dot_dimension_numbers<[1], [0], [0], [1], [0, 0, 1, 1], [], []>} : vector<64x32xbf16>, vector<32x128xbf16>, vector<64x128xf32> -> vector<64x128xf32>
    %c0_7 = arith.constant 0 : index
    %c0_8 = arith.constant 0 : index
    %10 = vector.load %arg5[%c0_7, %c0_8] : memref<1x128xf32, #tpu.memory_space<vmem>>, vector<1x128xf32>
    %11 = vector.broadcast %10 : vector<1x128xf32> to vector<64x128xf32>
    %12 = arith.addf %9, %11 : vector<64x128xf32>
    %c0_9 = arith.constant 0 : index
    %c0_10 = arith.constant 0 : index
    %c0_11 = arith.constant 0 : index
    %13 = vector.load %arg6[%c0_9, %c0_10, %c0_11] : memref<1x64x128xf32, #tpu.memory_space<vmem>>, vector<1x64x128xf32>
    %14 = vector.shape_cast %13 : vector<1x64x128xf32> to vector<64x128xf32>
    %15 = vector.shape_cast %12 : vector<64x128xf32> to vector<1x64x128xf32>
    tpu.vector_store %arg6[%c0_9, %c0_10, %c0_11], %15 {strides = array<i32>} : memref<1x64x128xf32, #tpu.memory_space<vmem>>, vector<1x64x128xf32>,
    return
  }
  func.func @transform_0(%arg0: i32, %arg1: i32) -> (i32, i32, i32) {
    %c0_i32 = arith.constant 0 : i32
    %c0_i32_0 = arith.constant 0 : i32
    return %arg0, %arg1, %c0_i32 : i32, i32, i32
  }
  func.func @transform_1(%arg0: i32, %arg1: i32) -> (i32, i32, i32) {
    %c0_i32 = arith.constant 0 : i32
    %c0_i32_0 = arith.constant 0 : i32
    %c0_i32_1 = arith.constant 0 : i32
    return %arg0, %c0_i32, %c0_i32_0 : i32, i32, i32
  }
  func.func @transform_2(%arg0: i32, %arg1: i32) -> (i32, i32) {
    %c0_i32 = arith.constant 0 : i32
    %c0_i32_0 = arith.constant 0 : i32
    %c0_i32_1 = arith.constant 0 : i32
    return %c0_i32, %c0_i32_0 : i32, i32
  }
  func.func @transform_3(%arg0: i32, %arg1: i32) -> (i32, i32) {
    %c0_i32 = arith.constant 0 : i32
    %c0_i32_0 = arith.constant 0 : i32
    %c0_i32_1 = arith.constant 0 : i32
    return %c0_i32, %c0_i32_0 : i32, i32
  }
  func.func @transform_4(%arg0: i32, %arg1: i32) -> (i32, i32, i32) {
    %c0_i32 = arith.constant 0 : i32
    %c0_i32_0 = arith.constant 0 : i32
    return %arg0, %arg1, %c0_i32 : i32, i32, i32
  }
}

module attributes {stable_mosaic.version = 11 : i64} {
  func.func @_gate_kernel(%arg0: i32, %arg1: memref<1x16x16x16xf32, #tpu.memory_space<vmem>>, %arg2: memref<100xf32, #tpu.memory_space<smem>>, %arg3: memref<1x16x16xf32, #tpu.memory_space<vmem>>, %arg4: memref<2x22x22xf32, #tpu.memory_space<vmem>>) attributes {dimension_semantics = [#tpu.dimension_semantics<parallel>], iteration_bounds = array<i64: 2>, scalar_prefetch = 0 : i64, scratch_operands = 1 : i64, tpu.core_type = #tpu.core_type<tc>, window_params = [{transform_indices = @transform_0, window_bounds = array<i64: 1, 16, 16, 16>}, {transform_indices = @transform_1, window_bounds = array<i64: 100>}, {transform_indices = @transform_2, window_bounds = array<i64: 1, 16, 16>}]} {
    %c0 = arith.constant 0 : index
    %c0_0 = arith.constant 0 : index
    %c0_1 = arith.constant 0 : index
    %c0_2 = arith.constant 0 : index
    %0 = vector.load %arg1[%c0, %c0_0, %c0_1, %c0_2] : memref<1x16x16x16xf32, #tpu.memory_space<vmem>>, vector<1x16x16x16xf32>
    %1 = vector.shape_cast %0 : vector<1x16x16x16xf32> to vector<16x16x16xf32>
    %cst = arith.constant 0.000000e+00 : f32
    %2 = vector.broadcast %cst : f32 to vector<16x3xf32>
    %cst_3 = arith.constant 0.000000e+00 : f32
    %3 = vector.broadcast %cst_3 : f32 to vector<2x22x22xf32>
    %c0_4 = arith.constant 0 : index
    %c0_5 = arith.constant 0 : index
    %c0_6 = arith.constant 0 : index
    %4 = vector.load %arg4[%c0_4, %c0_5, %c0_6] : memref<2x22x22xf32, #tpu.memory_space<vmem>>, vector<2x22x22xf32>
    tpu.vector_store %arg4[%c0_4, %c0_5, %c0_6], %3 {strides = array<i32>} : memref<2x22x22xf32, #tpu.memory_space<vmem>>, vector<2x22x22xf32>,
    %cst_7 = arith.constant dense<0xFF800000> : vector<16x16xf32>
    %5 = vector.multi_reduction <maximumf>, %1, %cst_7 [2] : vector<16x16x16xf32> to vector<16x16xf32>
    %6 = tpu.concatenate %2, %5, %2 in 1 : vector<16x3xf32>, vector<16x16xf32>, vector<16x3xf32> -> vector<16x22xf32>
    %c0_8 = arith.constant 0 : index
    %c3 = arith.constant 3 : index
    %c0_9 = arith.constant 0 : index
    %7 = vector.load %arg4[%c0_8, %c3, %c0_9] : memref<2x22x22xf32, #tpu.memory_space<vmem>>, vector<1x16x22xf32>
    %8 = vector.shape_cast %7 : vector<1x16x22xf32> to vector<16x22xf32>
    %9 = vector.shape_cast %6 : vector<16x22xf32> to vector<1x16x22xf32>
    tpu.vector_store %arg4[%c0_8, %c3, %c0_9], %9 {strides = array<i32>} : memref<2x22x22xf32, #tpu.memory_space<vmem>>, vector<1x16x22xf32>,
    %cst_10 = arith.constant dense<0.000000e+00> : vector<16x16xf32>
    %10 = vector.multi_reduction <add>, %1, %cst_10 [2] : vector<16x16x16xf32> to vector<16x16xf32>
    %cst_11 = arith.constant 1.600000e+01 : f32
    %11 = vector.broadcast %cst_11 : f32 to vector<16x16xf32>
    %12 = arith.divf %10, %11 : vector<16x16xf32>
    %13 = tpu.concatenate %2, %12, %2 in 1 : vector<16x3xf32>, vector<16x16xf32>, vector<16x3xf32> -> vector<16x22xf32>
    %c1 = arith.constant 1 : index
    %c3_12 = arith.constant 3 : index
    %c0_13 = arith.constant 0 : index
    %14 = vector.load %arg4[%c1, %c3_12, %c0_13] : memref<2x22x22xf32, #tpu.memory_space<vmem>>, vector<1x16x22xf32>
    %15 = vector.shape_cast %14 : vector<1x16x22xf32> to vector<16x22xf32>
    %16 = vector.shape_cast %13 : vector<16x22xf32> to vector<1x16x22xf32>
    tpu.vector_store %arg4[%c1, %c3_12, %c0_13], %16 {strides = array<i32>} : memref<2x22x22xf32, #tpu.memory_space<vmem>>, vector<1x16x22xf32>,
    %cst_14 = arith.constant 0.000000e+00 : f32
    %17 = vector.broadcast %cst_14 : f32 to vector<16x16xf32>
    %c0_15 = arith.constant 0 : index
    %c0_16 = arith.constant 0 : index
    %c0_17 = arith.constant 0 : index
    %18 = vector.load %arg4[%c0_15, %c0_16, %c0_17] : memref<2x22x22xf32, #tpu.memory_space<vmem>>, vector<1x22x16xf32>
    %19 = vector.shape_cast %18 : vector<1x22x16xf32> to vector<22x16xf32>
    %20 = vector.extract_strided_slice %19 {offsets = [0, 0], sizes = [16, 16], strides = [1, 1]} : vector<22x16xf32> to vector<16x16xf32>
    %c0_18 = arith.constant 0 : index
    %21 = memref.load %arg2[%c0_18] : memref<100xf32, #tpu.memory_space<smem>>
    %22 = vector.broadcast %21 : f32 to vector<16x16xf32>
    %23 = arith.mulf %20, %22 : vector<16x16xf32>
    %24 = arith.addf %17, %23 : vector<16x16xf32>
    %25 = vector.extract_strided_slice %19 {offsets = [1, 0], sizes = [16, 16], strides = [1, 1]} : vector<22x16xf32> to vector<16x16xf32>
    %c7 = arith.constant 7 : index
    %26 = memref.load %arg2[%c7] : memref<100xf32, #tpu.memory_space<smem>>
    %27 = vector.broadcast %26 : f32 to vector<16x16xf32>
    %28 = arith.mulf %25, %27 : vector<16x16xf32>
    %29 = arith.addf %24, %28 : vector<16x16xf32>
    %30 = vector.extract_strided_slice %19 {offsets = [2, 0], sizes = [16, 16], strides = [1, 1]} : vector<22x16xf32> to vector<16x16xf32>
    %c14 = arith.constant 14 : index
    %31 = memref.load %arg2[%c14] : memref<100xf32, #tpu.memory_space<smem>>
    %32 = vector.broadcast %31 : f32 to vector<16x16xf32>
    %33 = arith.mulf %30, %32 : vector<16x16xf32>
    %34 = arith.addf %29, %33 : vector<16x16xf32>
    %35 = vector.extract_strided_slice %19 {offsets = [3, 0], sizes = [16, 16], strides = [1, 1]} : vector<22x16xf32> to vector<16x16xf32>
    %c21 = arith.constant 21 : index
    %36 = memref.load %arg2[%c21] : memref<100xf32, #tpu.memory_space<smem>>
    %37 = vector.broadcast %36 : f32 to vector<16x16xf32>
    %38 = arith.mulf %35, %37 : vector<16x16xf32>
    %39 = arith.addf %34, %38 : vector<16x16xf32>
    %40 = vector.extract_strided_slice %19 {offsets = [4, 0], sizes = [16, 16], strides = [1, 1]} : vector<22x16xf32> to vector<16x16xf32>
    %c28 = arith.constant 28 : index
    %41 = memref.load %arg2[%c28] : memref<100xf32, #tpu.memory_space<smem>>
    %42 = vector.broadcast %41 : f32 to vector<16x16xf32>
    %43 = arith.mulf %40, %42 : vector<16x16xf32>
    %44 = arith.addf %39, %43 : vector<16x16xf32>
    %45 = vector.extract_strided_slice %19 {offsets = [5, 0], sizes = [16, 16], strides = [1, 1]} : vector<22x16xf32> to vector<16x16xf32>
    %c35 = arith.constant 35 : index
    %46 = memref.load %arg2[%c35] : memref<100xf32, #tpu.memory_space<smem>>
    %47 = vector.broadcast %46 : f32 to vector<16x16xf32>
    %48 = arith.mulf %45, %47 : vector<16x16xf32>
    %49 = arith.addf %44, %48 : vector<16x16xf32>
    %50 = vector.extract_strided_slice %19 {offsets = [6, 0], sizes = [16, 16], strides = [1, 1]} : vector<22x16xf32> to vector<16x16xf32>
    %c42 = arith.constant 42 : index
    %51 = memref.load %arg2[%c42] : memref<100xf32, #tpu.memory_space<smem>>
    %52 = vector.broadcast %51 : f32 to vector<16x16xf32>
    %53 = arith.mulf %50, %52 : vector<16x16xf32>
    %54 = arith.addf %49, %53 : vector<16x16xf32>
    %c0_19 = arith.constant 0 : index
    %c0_20 = arith.constant 0 : index
    %c1_21 = arith.constant 1 : index
    %55 = vector.load %arg4[%c0_19, %c0_20, %c1_21] : memref<2x22x22xf32, #tpu.memory_space<vmem>>, vector<1x22x16xf32>
    %56 = vector.shape_cast %55 : vector<1x22x16xf32> to vector<22x16xf32>
    %57 = vector.extract_strided_slice %56 {offsets = [0, 0], sizes = [16, 16], strides = [1, 1]} : vector<22x16xf32> to vector<16x16xf32>
    %c1_22 = arith.constant 1 : index
    %58 = memref.load %arg2[%c1_22] : memref<100xf32, #tpu.memory_space<smem>>
    %59 = vector.broadcast %58 : f32 to vector<16x16xf32>
    %60 = arith.mulf %57, %59 : vector<16x16xf32>
    %61 = arith.addf %54, %60 : vector<16x16xf32>
    %62 = vector.extract_strided_slice %56 {offsets = [1, 0], sizes = [16, 16], strides = [1, 1]} : vector<22x16xf32> to vector<16x16xf32>
    %c8 = arith.constant 8 : index
    %63 = memref.load %arg2[%c8] : memref<100xf32, #tpu.memory_space<smem>>
    %64 = vector.broadcast %63 : f32 to vector<16x16xf32>
    %65 = arith.mulf %62, %64 : vector<16x16xf32>
    %66 = arith.addf %61, %65 : vector<16x16xf32>
    %67 = vector.extract_strided_slice %56 {offsets = [2, 0], sizes = [16, 16], strides = [1, 1]} : vector<22x16xf32> to vector<16x16xf32>
    %c15 = arith.constant 15 : index
    %68 = memref.load %arg2[%c15] : memref<100xf32, #tpu.memory_space<smem>>
    %69 = vector.broadcast %68 : f32 to vector<16x16xf32>
    %70 = arith.mulf %67, %69 : vector<16x16xf32>
    %71 = arith.addf %66, %70 : vector<16x16xf32>
    %72 = vector.extract_strided_slice %56 {offsets = [3, 0], sizes = [16, 16], strides = [1, 1]} : vector<22x16xf32> to vector<16x16xf32>
    %c22 = arith.constant 22 : index
    %73 = memref.load %arg2[%c22] : memref<100xf32, #tpu.memory_space<smem>>
    %74 = vector.broadcast %73 : f32 to vector<16x16xf32>
    %75 = arith.mulf %72, %74 : vector<16x16xf32>
    %76 = arith.addf %71, %75 : vector<16x16xf32>
    %77 = vector.extract_strided_slice %56 {offsets = [4, 0], sizes = [16, 16], strides = [1, 1]} : vector<22x16xf32> to vector<16x16xf32>
    %c29 = arith.constant 29 : index
    %78 = memref.load %arg2[%c29] : memref<100xf32, #tpu.memory_space<smem>>
    %79 = vector.broadcast %78 : f32 to vector<16x16xf32>
    %80 = arith.mulf %77, %79 : vector<16x16xf32>
    %81 = arith.addf %76, %80 : vector<16x16xf32>
    %82 = vector.extract_strided_slice %56 {offsets = [5, 0], sizes = [16, 16], strides = [1, 1]} : vector<22x16xf32> to vector<16x16xf32>
    %c36 = arith.constant 36 : index
    %83 = memref.load %arg2[%c36] : memref<100xf32, #tpu.memory_space<smem>>
    %84 = vector.broadcast %83 : f32 to vector<16x16xf32>
    %85 = arith.mulf %82, %84 : vector<16x16xf32>
    %86 = arith.addf %81, %85 : vector<16x16xf32>
    %87 = vector.extract_strided_slice %56 {offsets = [6, 0], sizes = [16, 16], strides = [1, 1]} : vector<22x16xf32> to vector<16x16xf32>
    %c43 = arith.constant 43 : index
    %88 = memref.load %arg2[%c43] : memref<100xf32, #tpu.memory_space<smem>>
    %89 = vector.broadcast %88 : f32 to vector<16x16xf32>
    %90 = arith.mulf %87, %89 : vector<16x16xf32>
    %91 = arith.addf %86, %90 : vector<16x16xf32>
    %c0_23 = arith.constant 0 : index
    %c0_24 = arith.constant 0 : index
    %c2 = arith.constant 2 : index
    %92 = vector.load %arg4[%c0_23, %c0_24, %c2] : memref<2x22x22xf32, #tpu.memory_space<vmem>>, vector<1x22x16xf32>
    %93 = vector.shape_cast %92 : vector<1x22x16xf32> to vector<22x16xf32>
    %94 = vector.extract_strided_slice %93 {offsets = [0, 0], sizes = [16, 16], strides = [1, 1]} : vector<22x16xf32> to vector<16x16xf32>
    %c2_25 = arith.constant 2 : index
    %95 = memref.load %arg2[%c2_25] : memref<100xf32, #tpu.memory_space<smem>>
    %96 = vector.broadcast %95 : f32 to vector<16x16xf32>
    %97 = arith.mulf %94, %96 : vector<16x16xf32>
    %98 = arith.addf %91, %97 : vector<16x16xf32>
    %99 = vector.extract_strided_slice %93 {offsets = [1, 0], sizes = [16, 16], strides = [1, 1]} : vector<22x16xf32> to vector<16x16xf32>
    %c9 = arith.constant 9 : index
    %100 = memref.load %arg2[%c9] : memref<100xf32, #tpu.memory_space<smem>>
    %101 = vector.broadcast %100 : f32 to vector<16x16xf32>
    %102 = arith.mulf %99, %101 : vector<16x16xf32>
    %103 = arith.addf %98, %102 : vector<16x16xf32>
    %104 = vector.extract_strided_slice %93 {offsets = [2, 0], sizes = [16, 16], strides = [1, 1]} : vector<22x16xf32> to vector<16x16xf32>
    %c16 = arith.constant 16 : index
    %105 = memref.load %arg2[%c16] : memref<100xf32, #tpu.memory_space<smem>>
    %106 = vector.broadcast %105 : f32 to vector<16x16xf32>
    %107 = arith.mulf %104, %106 : vector<16x16xf32>
    %108 = arith.addf %103, %107 : vector<16x16xf32>
    %109 = vector.extract_strided_slice %93 {offsets = [3, 0], sizes = [16, 16], strides = [1, 1]} : vector<22x16xf32> to vector<16x16xf32>
    %c23 = arith.constant 23 : index
    %110 = memref.load %arg2[%c23] : memref<100xf32, #tpu.memory_space<smem>>
    %111 = vector.broadcast %110 : f32 to vector<16x16xf32>
    %112 = arith.mulf %109, %111 : vector<16x16xf32>
    %113 = arith.addf %108, %112 : vector<16x16xf32>
    %114 = vector.extract_strided_slice %93 {offsets = [4, 0], sizes = [16, 16], strides = [1, 1]} : vector<22x16xf32> to vector<16x16xf32>
    %c30 = arith.constant 30 : index
    %115 = memref.load %arg2[%c30] : memref<100xf32, #tpu.memory_space<smem>>
    %116 = vector.broadcast %115 : f32 to vector<16x16xf32>
    %117 = arith.mulf %114, %116 : vector<16x16xf32>
    %118 = arith.addf %113, %117 : vector<16x16xf32>
    %119 = vector.extract_strided_slice %93 {offsets = [5, 0], sizes = [16, 16], strides = [1, 1]} : vector<22x16xf32> to vector<16x16xf32>
    %c37 = arith.constant 37 : index
    %120 = memref.load %arg2[%c37] : memref<100xf32, #tpu.memory_space<smem>>
    %121 = vector.broadcast %120 : f32 to vector<16x16xf32>
    %122 = arith.mulf %119, %121 : vector<16x16xf32>
    %123 = arith.addf %118, %122 : vector<16x16xf32>
    %124 = vector.extract_strided_slice %93 {offsets = [6, 0], sizes = [16, 16], strides = [1, 1]} : vector<22x16xf32> to vector<16x16xf32>
    %c44 = arith.constant 44 : index
    %125 = memref.load %arg2[%c44] : memref<100xf32, #tpu.memory_space<smem>>
    %126 = vector.broadcast %125 : f32 to vector<16x16xf32>
    %127 = arith.mulf %124, %126 : vector<16x16xf32>
    %128 = arith.addf %123, %127 : vector<16x16xf32>
    %c0_26 = arith.constant 0 : index
    %c0_27 = arith.constant 0 : index
    %c3_28 = arith.constant 3 : index
    %129 = vector.load %arg4[%c0_26, %c0_27, %c3_28] : memref<2x22x22xf32, #tpu.memory_space<vmem>>, vector<1x22x16xf32>
    %130 = vector.shape_cast %129 : vector<1x22x16xf32> to vector<22x16xf32>
    %131 = vector.extract_strided_slice %130 {offsets = [0, 0], sizes = [16, 16], strides = [1, 1]} : vector<22x16xf32> to vector<16x16xf32>
    %c3_29 = arith.constant 3 : index
    %132 = memref.load %arg2[%c3_29] : memref<100xf32, #tpu.memory_space<smem>>
    %133 = vector.broadcast %132 : f32 to vector<16x16xf32>
    %134 = arith.mulf %131, %133 : vector<16x16xf32>
    %135 = arith.addf %128, %134 : vector<16x16xf32>
    %136 = vector.extract_strided_slice %130 {offsets = [1, 0], sizes = [16, 16], strides = [1, 1]} : vector<22x16xf32> to vector<16x16xf32>
    %c10 = arith.constant 10 : index
    %137 = memref.load %arg2[%c10] : memref<100xf32, #tpu.memory_space<smem>>
    %138 = vector.broadcast %137 : f32 to vector<16x16xf32>
    %139 = arith.mulf %136, %138 : vector<16x16xf32>
    %140 = arith.addf %135, %139 : vector<16x16xf32>
    %141 = vector.extract_strided_slice %130 {offsets = [2, 0], sizes = [16, 16], strides = [1, 1]} : vector<22x16xf32> to vector<16x16xf32>
    %c17 = arith.constant 17 : index
    %142 = memref.load %arg2[%c17] : memref<100xf32, #tpu.memory_space<smem>>
    %143 = vector.broadcast %142 : f32 to vector<16x16xf32>
    %144 = arith.mulf %141, %143 : vector<16x16xf32>
    %145 = arith.addf %140, %144 : vector<16x16xf32>
    %146 = vector.extract_strided_slice %130 {offsets = [3, 0], sizes = [16, 16], strides = [1, 1]} : vector<22x16xf32> to vector<16x16xf32>
    %c24 = arith.constant 24 : index
    %147 = memref.load %arg2[%c24] : memref<100xf32, #tpu.memory_space<smem>>
    %148 = vector.broadcast %147 : f32 to vector<16x16xf32>
    %149 = arith.mulf %146, %148 : vector<16x16xf32>
    %150 = arith.addf %145, %149 : vector<16x16xf32>
    %151 = vector.extract_strided_slice %130 {offsets = [4, 0], sizes = [16, 16], strides = [1, 1]} : vector<22x16xf32> to vector<16x16xf32>
    %c31 = arith.constant 31 : index
    %152 = memref.load %arg2[%c31] : memref<100xf32, #tpu.memory_space<smem>>
    %153 = vector.broadcast %152 : f32 to vector<16x16xf32>
    %154 = arith.mulf %151, %153 : vector<16x16xf32>
    %155 = arith.addf %150, %154 : vector<16x16xf32>
    %156 = vector.extract_strided_slice %130 {offsets = [5, 0], sizes = [16, 16], strides = [1, 1]} : vector<22x16xf32> to vector<16x16xf32>
    %c38 = arith.constant 38 : index
    %157 = memref.load %arg2[%c38] : memref<100xf32, #tpu.memory_space<smem>>
    %158 = vector.broadcast %157 : f32 to vector<16x16xf32>
    %159 = arith.mulf %156, %158 : vector<16x16xf32>
    %160 = arith.addf %155, %159 : vector<16x16xf32>
    %161 = vector.extract_strided_slice %130 {offsets = [6, 0], sizes = [16, 16], strides = [1, 1]} : vector<22x16xf32> to vector<16x16xf32>
    %c45 = arith.constant 45 : index
    %162 = memref.load %arg2[%c45] : memref<100xf32, #tpu.memory_space<smem>>
    %163 = vector.broadcast %162 : f32 to vector<16x16xf32>
    %164 = arith.mulf %161, %163 : vector<16x16xf32>
    %165 = arith.addf %160, %164 : vector<16x16xf32>
    %c0_30 = arith.constant 0 : index
    %c0_31 = arith.constant 0 : index
    %c4 = arith.constant 4 : index
    %166 = vector.load %arg4[%c0_30, %c0_31, %c4] : memref<2x22x22xf32, #tpu.memory_space<vmem>>, vector<1x22x16xf32>
    %167 = vector.shape_cast %166 : vector<1x22x16xf32> to vector<22x16xf32>
    %168 = vector.extract_strided_slice %167 {offsets = [0, 0], sizes = [16, 16], strides = [1, 1]} : vector<22x16xf32> to vector<16x16xf32>
    %c4_32 = arith.constant 4 : index
    %169 = memref.load %arg2[%c4_32] : memref<100xf32, #tpu.memory_space<smem>>
    %170 = vector.broadcast %169 : f32 to vector<16x16xf32>
    %171 = arith.mulf %168, %170 : vector<16x16xf32>
    %172 = arith.addf %165, %171 : vector<16x16xf32>
    %173 = vector.extract_strided_slice %167 {offsets = [1, 0], sizes = [16, 16], strides = [1, 1]} : vector<22x16xf32> to vector<16x16xf32>
    %c11 = arith.constant 11 : index
    %174 = memref.load %arg2[%c11] : memref<100xf32, #tpu.memory_space<smem>>
    %175 = vector.broadcast %174 : f32 to vector<16x16xf32>
    %176 = arith.mulf %173, %175 : vector<16x16xf32>
    %177 = arith.addf %172, %176 : vector<16x16xf32>
    %178 = vector.extract_strided_slice %167 {offsets = [2, 0], sizes = [16, 16], strides = [1, 1]} : vector<22x16xf32> to vector<16x16xf32>
    %c18 = arith.constant 18 : index
    %179 = memref.load %arg2[%c18] : memref<100xf32, #tpu.memory_space<smem>>
    %180 = vector.broadcast %179 : f32 to vector<16x16xf32>
    %181 = arith.mulf %178, %180 : vector<16x16xf32>
    %182 = arith.addf %177, %181 : vector<16x16xf32>
    %183 = vector.extract_strided_slice %167 {offsets = [3, 0], sizes = [16, 16], strides = [1, 1]} : vector<22x16xf32> to vector<16x16xf32>
    %c25 = arith.constant 25 : index
    %184 = memref.load %arg2[%c25] : memref<100xf32, #tpu.memory_space<smem>>
    %185 = vector.broadcast %184 : f32 to vector<16x16xf32>
    %186 = arith.mulf %183, %185 : vector<16x16xf32>
    %187 = arith.addf %182, %186 : vector<16x16xf32>
    %188 = vector.extract_strided_slice %167 {offsets = [4, 0], sizes = [16, 16], strides = [1, 1]} : vector<22x16xf32> to vector<16x16xf32>
    %c32 = arith.constant 32 : index
    %189 = memref.load %arg2[%c32] : memref<100xf32, #tpu.memory_space<smem>>
    %190 = vector.broadcast %189 : f32 to vector<16x16xf32>
    %191 = arith.mulf %188, %190 : vector<16x16xf32>
    %192 = arith.addf %187, %191 : vector<16x16xf32>
    %193 = vector.extract_strided_slice %167 {offsets = [5, 0], sizes = [16, 16], strides = [1, 1]} : vector<22x16xf32> to vector<16x16xf32>
    %c39 = arith.constant 39 : index
    %194 = memref.load %arg2[%c39] : memref<100xf32, #tpu.memory_space<smem>>
    %195 = vector.broadcast %194 : f32 to vector<16x16xf32>
    %196 = arith.mulf %193, %195 : vector<16x16xf32>
    %197 = arith.addf %192, %196 : vector<16x16xf32>
    %198 = vector.extract_strided_slice %167 {offsets = [6, 0], sizes = [16, 16], strides = [1, 1]} : vector<22x16xf32> to vector<16x16xf32>
    %c46 = arith.constant 46 : index
    %199 = memref.load %arg2[%c46] : memref<100xf32, #tpu.memory_space<smem>>
    %200 = vector.broadcast %199 : f32 to vector<16x16xf32>
    %201 = arith.mulf %198, %200 : vector<16x16xf32>
    %202 = arith.addf %197, %201 : vector<16x16xf32>
    %c0_33 = arith.constant 0 : index
    %c0_34 = arith.constant 0 : index
    %c5 = arith.constant 5 : index
    %203 = vector.load %arg4[%c0_33, %c0_34, %c5] : memref<2x22x22xf32, #tpu.memory_space<vmem>>, vector<1x22x16xf32>
    %204 = vector.shape_cast %203 : vector<1x22x16xf32> to vector<22x16xf32>
    %205 = vector.extract_strided_slice %204 {offsets = [0, 0], sizes = [16, 16], strides = [1, 1]} : vector<22x16xf32> to vector<16x16xf32>
    %c5_35 = arith.constant 5 : index
    %206 = memref.load %arg2[%c5_35] : memref<100xf32, #tpu.memory_space<smem>>
    %207 = vector.broadcast %206 : f32 to vector<16x16xf32>
    %208 = arith.mulf %205, %207 : vector<16x16xf32>
    %209 = arith.addf %202, %208 : vector<16x16xf32>
    %210 = vector.extract_strided_slice %204 {offsets = [1, 0], sizes = [16, 16], strides = [1, 1]} : vector<22x16xf32> to vector<16x16xf32>
    %c12 = arith.constant 12 : index
    %211 = memref.load %arg2[%c12] : memref<100xf32, #tpu.memory_space<smem>>
    %212 = vector.broadcast %211 : f32 to vector<16x16xf32>
    %213 = arith.mulf %210, %212 : vector<16x16xf32>
    %214 = arith.addf %209, %213 : vector<16x16xf32>
    %215 = vector.extract_strided_slice %204 {offsets = [2, 0], sizes = [16, 16], strides = [1, 1]} : vector<22x16xf32> to vector<16x16xf32>
    %c19 = arith.constant 19 : index
    %216 = memref.load %arg2[%c19] : memref<100xf32, #tpu.memory_space<smem>>
    %217 = vector.broadcast %216 : f32 to vector<16x16xf32>
    %218 = arith.mulf %215, %217 : vector<16x16xf32>
    %219 = arith.addf %214, %218 : vector<16x16xf32>
    %220 = vector.extract_strided_slice %204 {offsets = [3, 0], sizes = [16, 16], strides = [1, 1]} : vector<22x16xf32> to vector<16x16xf32>
    %c26 = arith.constant 26 : index
    %221 = memref.load %arg2[%c26] : memref<100xf32, #tpu.memory_space<smem>>
    %222 = vector.broadcast %221 : f32 to vector<16x16xf32>
    %223 = arith.mulf %220, %222 : vector<16x16xf32>
    %224 = arith.addf %219, %223 : vector<16x16xf32>
    %225 = vector.extract_strided_slice %204 {offsets = [4, 0], sizes = [16, 16], strides = [1, 1]} : vector<22x16xf32> to vector<16x16xf32>
    %c33 = arith.constant 33 : index
    %226 = memref.load %arg2[%c33] : memref<100xf32, #tpu.memory_space<smem>>
    %227 = vector.broadcast %226 : f32 to vector<16x16xf32>
    %228 = arith.mulf %225, %227 : vector<16x16xf32>
    %229 = arith.addf %224, %228 : vector<16x16xf32>
    %230 = vector.extract_strided_slice %204 {offsets = [5, 0], sizes = [16, 16], strides = [1, 1]} : vector<22x16xf32> to vector<16x16xf32>
    %c40 = arith.constant 40 : index
    %231 = memref.load %arg2[%c40] : memref<100xf32, #tpu.memory_space<smem>>
    %232 = vector.broadcast %231 : f32 to vector<16x16xf32>
    %233 = arith.mulf %230, %232 : vector<16x16xf32>
    %234 = arith.addf %229, %233 : vector<16x16xf32>
    %235 = vector.extract_strided_slice %204 {offsets = [6, 0], sizes = [16, 16], strides = [1, 1]} : vector<22x16xf32> to vector<16x16xf32>
    %c47 = arith.constant 47 : index
    %236 = memref.load %arg2[%c47] : memref<100xf32, #tpu.memory_space<smem>>
    %237 = vector.broadcast %236 : f32 to vector<16x16xf32>
    %238 = arith.mulf %235, %237 : vector<16x16xf32>
    %239 = arith.addf %234, %238 : vector<16x16xf32>
    %c0_36 = arith.constant 0 : index
    %c0_37 = arith.constant 0 : index
    %c6 = arith.constant 6 : index
    %240 = vector.load %arg4[%c0_36, %c0_37, %c6] : memref<2x22x22xf32, #tpu.memory_space<vmem>>, vector<1x22x16xf32>
    %241 = vector.shape_cast %240 : vector<1x22x16xf32> to vector<22x16xf32>
    %242 = vector.extract_strided_slice %241 {offsets = [0, 0], sizes = [16, 16], strides = [1, 1]} : vector<22x16xf32> to vector<16x16xf32>
    %c6_38 = arith.constant 6 : index
    %243 = memref.load %arg2[%c6_38] : memref<100xf32, #tpu.memory_space<smem>>
    %244 = vector.broadcast %243 : f32 to vector<16x16xf32>
    %245 = arith.mulf %242, %244 : vector<16x16xf32>
    %246 = arith.addf %239, %245 : vector<16x16xf32>
    %247 = vector.extract_strided_slice %241 {offsets = [1, 0], sizes = [16, 16], strides = [1, 1]} : vector<22x16xf32> to vector<16x16xf32>
    %c13 = arith.constant 13 : index
    %248 = memref.load %arg2[%c13] : memref<100xf32, #tpu.memory_space<smem>>
    %249 = vector.broadcast %248 : f32 to vector<16x16xf32>
    %250 = arith.mulf %247, %249 : vector<16x16xf32>
    %251 = arith.addf %246, %250 : vector<16x16xf32>
    %252 = vector.extract_strided_slice %241 {offsets = [2, 0], sizes = [16, 16], strides = [1, 1]} : vector<22x16xf32> to vector<16x16xf32>
    %c20 = arith.constant 20 : index
    %253 = memref.load %arg2[%c20] : memref<100xf32, #tpu.memory_space<smem>>
    %254 = vector.broadcast %253 : f32 to vector<16x16xf32>
    %255 = arith.mulf %252, %254 : vector<16x16xf32>
    %256 = arith.addf %251, %255 : vector<16x16xf32>
    %257 = vector.extract_strided_slice %241 {offsets = [3, 0], sizes = [16, 16], strides = [1, 1]} : vector<22x16xf32> to vector<16x16xf32>
    %c27 = arith.constant 27 : index
    %258 = memref.load %arg2[%c27] : memref<100xf32, #tpu.memory_space<smem>>
    %259 = vector.broadcast %258 : f32 to vector<16x16xf32>
    %260 = arith.mulf %257, %259 : vector<16x16xf32>
    %261 = arith.addf %256, %260 : vector<16x16xf32>
    %262 = vector.extract_strided_slice %241 {offsets = [4, 0], sizes = [16, 16], strides = [1, 1]} : vector<22x16xf32> to vector<16x16xf32>
    %c34 = arith.constant 34 : index
    %263 = memref.load %arg2[%c34] : memref<100xf32, #tpu.memory_space<smem>>
    %264 = vector.broadcast %263 : f32 to vector<16x16xf32>
    %265 = arith.mulf %262, %264 : vector<16x16xf32>
    %266 = arith.addf %261, %265 : vector<16x16xf32>
    %267 = vector.extract_strided_slice %241 {offsets = [5, 0], sizes = [16, 16], strides = [1, 1]} : vector<22x16xf32> to vector<16x16xf32>
    %c41 = arith.constant 41 : index
    %268 = memref.load %arg2[%c41] : memref<100xf32, #tpu.memory_space<smem>>
    %269 = vector.broadcast %268 : f32 to vector<16x16xf32>
    %270 = arith.mulf %267, %269 : vector<16x16xf32>
    %271 = arith.addf %266, %270 : vector<16x16xf32>
    %272 = vector.extract_strided_slice %241 {offsets = [6, 0], sizes = [16, 16], strides = [1, 1]} : vector<22x16xf32> to vector<16x16xf32>
    %c48 = arith.constant 48 : index
    %273 = memref.load %arg2[%c48] : memref<100xf32, #tpu.memory_space<smem>>
    %274 = vector.broadcast %273 : f32 to vector<16x16xf32>
    %275 = arith.mulf %272, %274 : vector<16x16xf32>
    %276 = arith.addf %271, %275 : vector<16x16xf32>
    %c1_39 = arith.constant 1 : index
    %c0_40 = arith.constant 0 : index
    %c0_41 = arith.constant 0 : index
    %277 = vector.load %arg4[%c1_39, %c0_40, %c0_41] : memref<2x22x22xf32, #tpu.memory_space<vmem>>, vector<1x22x16xf32>
    %278 = vector.shape_cast %277 : vector<1x22x16xf32> to vector<22x16xf32>
    %279 = vector.extract_strided_slice %278 {offsets = [0, 0], sizes = [16, 16], strides = [1, 1]} : vector<22x16xf32> to vector<16x16xf32>
    %c49 = arith.constant 49 : index
    %280 = memref.load %arg2[%c49] : memref<100xf32, #tpu.memory_space<smem>>
    %281 = vector.broadcast %280 : f32 to vector<16x16xf32>
    %282 = arith.mulf %279, %281 : vector<16x16xf32>
    %283 = arith.addf %276, %282 : vector<16x16xf32>
    %284 = vector.extract_strided_slice %278 {offsets = [1, 0], sizes = [16, 16], strides = [1, 1]} : vector<22x16xf32> to vector<16x16xf32>
    %c56 = arith.constant 56 : index
    %285 = memref.load %arg2[%c56] : memref<100xf32, #tpu.memory_space<smem>>
    %286 = vector.broadcast %285 : f32 to vector<16x16xf32>
    %287 = arith.mulf %284, %286 : vector<16x16xf32>
    %288 = arith.addf %283, %287 : vector<16x16xf32>
    %289 = vector.extract_strided_slice %278 {offsets = [2, 0], sizes = [16, 16], strides = [1, 1]} : vector<22x16xf32> to vector<16x16xf32>
    %c63 = arith.constant 63 : index
    %290 = memref.load %arg2[%c63] : memref<100xf32, #tpu.memory_space<smem>>
    %291 = vector.broadcast %290 : f32 to vector<16x16xf32>
    %292 = arith.mulf %289, %291 : vector<16x16xf32>
    %293 = arith.addf %288, %292 : vector<16x16xf32>
    %294 = vector.extract_strided_slice %278 {offsets = [3, 0], sizes = [16, 16], strides = [1, 1]} : vector<22x16xf32> to vector<16x16xf32>
    %c70 = arith.constant 70 : index
    %295 = memref.load %arg2[%c70] : memref<100xf32, #tpu.memory_space<smem>>
    %296 = vector.broadcast %295 : f32 to vector<16x16xf32>
    %297 = arith.mulf %294, %296 : vector<16x16xf32>
    %298 = arith.addf %293, %297 : vector<16x16xf32>
    %299 = vector.extract_strided_slice %278 {offsets = [4, 0], sizes = [16, 16], strides = [1, 1]} : vector<22x16xf32> to vector<16x16xf32>
    %c77 = arith.constant 77 : index
    %300 = memref.load %arg2[%c77] : memref<100xf32, #tpu.memory_space<smem>>
    %301 = vector.broadcast %300 : f32 to vector<16x16xf32>
    %302 = arith.mulf %299, %301 : vector<16x16xf32>
    %303 = arith.addf %298, %302 : vector<16x16xf32>
    %304 = vector.extract_strided_slice %278 {offsets = [5, 0], sizes = [16, 16], strides = [1, 1]} : vector<22x16xf32> to vector<16x16xf32>
    %c84 = arith.constant 84 : index
    %305 = memref.load %arg2[%c84] : memref<100xf32, #tpu.memory_space<smem>>
    %306 = vector.broadcast %305 : f32 to vector<16x16xf32>
    %307 = arith.mulf %304, %306 : vector<16x16xf32>
    %308 = arith.addf %303, %307 : vector<16x16xf32>
    %309 = vector.extract_strided_slice %278 {offsets = [6, 0], sizes = [16, 16], strides = [1, 1]} : vector<22x16xf32> to vector<16x16xf32>
    %c91 = arith.constant 91 : index
    %310 = memref.load %arg2[%c91] : memref<100xf32, #tpu.memory_space<smem>>
    %311 = vector.broadcast %310 : f32 to vector<16x16xf32>
    %312 = arith.mulf %309, %311 : vector<16x16xf32>
    %313 = arith.addf %308, %312 : vector<16x16xf32>
    %c1_42 = arith.constant 1 : index
    %c0_43 = arith.constant 0 : index
    %c1_44 = arith.constant 1 : index
    %314 = vector.load %arg4[%c1_42, %c0_43, %c1_44] : memref<2x22x22xf32, #tpu.memory_space<vmem>>, vector<1x22x16xf32>
    %315 = vector.shape_cast %314 : vector<1x22x16xf32> to vector<22x16xf32>
    %316 = vector.extract_strided_slice %315 {offsets = [0, 0], sizes = [16, 16], strides = [1, 1]} : vector<22x16xf32> to vector<16x16xf32>
    %c50 = arith.constant 50 : index
    %317 = memref.load %arg2[%c50] : memref<100xf32, #tpu.memory_space<smem>>
    %318 = vector.broadcast %317 : f32 to vector<16x16xf32>
    %319 = arith.mulf %316, %318 : vector<16x16xf32>
    %320 = arith.addf %313, %319 : vector<16x16xf32>
    %321 = vector.extract_strided_slice %315 {offsets = [1, 0], sizes = [16, 16], strides = [1, 1]} : vector<22x16xf32> to vector<16x16xf32>
    %c57 = arith.constant 57 : index
    %322 = memref.load %arg2[%c57] : memref<100xf32, #tpu.memory_space<smem>>
    %323 = vector.broadcast %322 : f32 to vector<16x16xf32>
    %324 = arith.mulf %321, %323 : vector<16x16xf32>
    %325 = arith.addf %320, %324 : vector<16x16xf32>
    %326 = vector.extract_strided_slice %315 {offsets = [2, 0], sizes = [16, 16], strides = [1, 1]} : vector<22x16xf32> to vector<16x16xf32>
    %c64 = arith.constant 64 : index
    %327 = memref.load %arg2[%c64] : memref<100xf32, #tpu.memory_space<smem>>
    %328 = vector.broadcast %327 : f32 to vector<16x16xf32>
    %329 = arith.mulf %326, %328 : vector<16x16xf32>
    %330 = arith.addf %325, %329 : vector<16x16xf32>
    %331 = vector.extract_strided_slice %315 {offsets = [3, 0], sizes = [16, 16], strides = [1, 1]} : vector<22x16xf32> to vector<16x16xf32>
    %c71 = arith.constant 71 : index
    %332 = memref.load %arg2[%c71] : memref<100xf32, #tpu.memory_space<smem>>
    %333 = vector.broadcast %332 : f32 to vector<16x16xf32>
    %334 = arith.mulf %331, %333 : vector<16x16xf32>
    %335 = arith.addf %330, %334 : vector<16x16xf32>
    %336 = vector.extract_strided_slice %315 {offsets = [4, 0], sizes = [16, 16], strides = [1, 1]} : vector<22x16xf32> to vector<16x16xf32>
    %c78 = arith.constant 78 : index
    %337 = memref.load %arg2[%c78] : memref<100xf32, #tpu.memory_space<smem>>
    %338 = vector.broadcast %337 : f32 to vector<16x16xf32>
    %339 = arith.mulf %336, %338 : vector<16x16xf32>
    %340 = arith.addf %335, %339 : vector<16x16xf32>
    %341 = vector.extract_strided_slice %315 {offsets = [5, 0], sizes = [16, 16], strides = [1, 1]} : vector<22x16xf32> to vector<16x16xf32>
    %c85 = arith.constant 85 : index
    %342 = memref.load %arg2[%c85] : memref<100xf32, #tpu.memory_space<smem>>
    %343 = vector.broadcast %342 : f32 to vector<16x16xf32>
    %344 = arith.mulf %341, %343 : vector<16x16xf32>
    %345 = arith.addf %340, %344 : vector<16x16xf32>
    %346 = vector.extract_strided_slice %315 {offsets = [6, 0], sizes = [16, 16], strides = [1, 1]} : vector<22x16xf32> to vector<16x16xf32>
    %c92 = arith.constant 92 : index
    %347 = memref.load %arg2[%c92] : memref<100xf32, #tpu.memory_space<smem>>
    %348 = vector.broadcast %347 : f32 to vector<16x16xf32>
    %349 = arith.mulf %346, %348 : vector<16x16xf32>
    %350 = arith.addf %345, %349 : vector<16x16xf32>
    %c1_45 = arith.constant 1 : index
    %c0_46 = arith.constant 0 : index
    %c2_47 = arith.constant 2 : index
    %351 = vector.load %arg4[%c1_45, %c0_46, %c2_47] : memref<2x22x22xf32, #tpu.memory_space<vmem>>, vector<1x22x16xf32>
    %352 = vector.shape_cast %351 : vector<1x22x16xf32> to vector<22x16xf32>
    %353 = vector.extract_strided_slice %352 {offsets = [0, 0], sizes = [16, 16], strides = [1, 1]} : vector<22x16xf32> to vector<16x16xf32>
    %c51 = arith.constant 51 : index
    %354 = memref.load %arg2[%c51] : memref<100xf32, #tpu.memory_space<smem>>
    %355 = vector.broadcast %354 : f32 to vector<16x16xf32>
    %356 = arith.mulf %353, %355 : vector<16x16xf32>
    %357 = arith.addf %350, %356 : vector<16x16xf32>
    %358 = vector.extract_strided_slice %352 {offsets = [1, 0], sizes = [16, 16], strides = [1, 1]} : vector<22x16xf32> to vector<16x16xf32>
    %c58 = arith.constant 58 : index
    %359 = memref.load %arg2[%c58] : memref<100xf32, #tpu.memory_space<smem>>
    %360 = vector.broadcast %359 : f32 to vector<16x16xf32>
    %361 = arith.mulf %358, %360 : vector<16x16xf32>
    %362 = arith.addf %357, %361 : vector<16x16xf32>
    %363 = vector.extract_strided_slice %352 {offsets = [2, 0], sizes = [16, 16], strides = [1, 1]} : vector<22x16xf32> to vector<16x16xf32>
    %c65 = arith.constant 65 : index
    %364 = memref.load %arg2[%c65] : memref<100xf32, #tpu.memory_space<smem>>
    %365 = vector.broadcast %364 : f32 to vector<16x16xf32>
    %366 = arith.mulf %363, %365 : vector<16x16xf32>
    %367 = arith.addf %362, %366 : vector<16x16xf32>
    %368 = vector.extract_strided_slice %352 {offsets = [3, 0], sizes = [16, 16], strides = [1, 1]} : vector<22x16xf32> to vector<16x16xf32>
    %c72 = arith.constant 72 : index
    %369 = memref.load %arg2[%c72] : memref<100xf32, #tpu.memory_space<smem>>
    %370 = vector.broadcast %369 : f32 to vector<16x16xf32>
    %371 = arith.mulf %368, %370 : vector<16x16xf32>
    %372 = arith.addf %367, %371 : vector<16x16xf32>
    %373 = vector.extract_strided_slice %352 {offsets = [4, 0], sizes = [16, 16], strides = [1, 1]} : vector<22x16xf32> to vector<16x16xf32>
    %c79 = arith.constant 79 : index
    %374 = memref.load %arg2[%c79] : memref<100xf32, #tpu.memory_space<smem>>
    %375 = vector.broadcast %374 : f32 to vector<16x16xf32>
    %376 = arith.mulf %373, %375 : vector<16x16xf32>
    %377 = arith.addf %372, %376 : vector<16x16xf32>
    %378 = vector.extract_strided_slice %352 {offsets = [5, 0], sizes = [16, 16], strides = [1, 1]} : vector<22x16xf32> to vector<16x16xf32>
    %c86 = arith.constant 86 : index
    %379 = memref.load %arg2[%c86] : memref<100xf32, #tpu.memory_space<smem>>
    %380 = vector.broadcast %379 : f32 to vector<16x16xf32>
    %381 = arith.mulf %378, %380 : vector<16x16xf32>
    %382 = arith.addf %377, %381 : vector<16x16xf32>
    %383 = vector.extract_strided_slice %352 {offsets = [6, 0], sizes = [16, 16], strides = [1, 1]} : vector<22x16xf32> to vector<16x16xf32>
    %c93 = arith.constant 93 : index
    %384 = memref.load %arg2[%c93] : memref<100xf32, #tpu.memory_space<smem>>
    %385 = vector.broadcast %384 : f32 to vector<16x16xf32>
    %386 = arith.mulf %383, %385 : vector<16x16xf32>
    %387 = arith.addf %382, %386 : vector<16x16xf32>
    %c1_48 = arith.constant 1 : index
    %c0_49 = arith.constant 0 : index
    %c3_50 = arith.constant 3 : index
    %388 = vector.load %arg4[%c1_48, %c0_49, %c3_50] : memref<2x22x22xf32, #tpu.memory_space<vmem>>, vector<1x22x16xf32>
    %389 = vector.shape_cast %388 : vector<1x22x16xf32> to vector<22x16xf32>
    %390 = vector.extract_strided_slice %389 {offsets = [0, 0], sizes = [16, 16], strides = [1, 1]} : vector<22x16xf32> to vector<16x16xf32>
    %c52 = arith.constant 52 : index
    %391 = memref.load %arg2[%c52] : memref<100xf32, #tpu.memory_space<smem>>
    %392 = vector.broadcast %391 : f32 to vector<16x16xf32>
    %393 = arith.mulf %390, %392 : vector<16x16xf32>
    %394 = arith.addf %387, %393 : vector<16x16xf32>
    %395 = vector.extract_strided_slice %389 {offsets = [1, 0], sizes = [16, 16], strides = [1, 1]} : vector<22x16xf32> to vector<16x16xf32>
    %c59 = arith.constant 59 : index
    %396 = memref.load %arg2[%c59] : memref<100xf32, #tpu.memory_space<smem>>
    %397 = vector.broadcast %396 : f32 to vector<16x16xf32>
    %398 = arith.mulf %395, %397 : vector<16x16xf32>
    %399 = arith.addf %394, %398 : vector<16x16xf32>
    %400 = vector.extract_strided_slice %389 {offsets = [2, 0], sizes = [16, 16], strides = [1, 1]} : vector<22x16xf32> to vector<16x16xf32>
    %c66 = arith.constant 66 : index
    %401 = memref.load %arg2[%c66] : memref<100xf32, #tpu.memory_space<smem>>
    %402 = vector.broadcast %401 : f32 to vector<16x16xf32>
    %403 = arith.mulf %400, %402 : vector<16x16xf32>
    %404 = arith.addf %399, %403 : vector<16x16xf32>
    %405 = vector.extract_strided_slice %389 {offsets = [3, 0], sizes = [16, 16], strides = [1, 1]} : vector<22x16xf32> to vector<16x16xf32>
    %c73 = arith.constant 73 : index
    %406 = memref.load %arg2[%c73] : memref<100xf32, #tpu.memory_space<smem>>
    %407 = vector.broadcast %406 : f32 to vector<16x16xf32>
    %408 = arith.mulf %405, %407 : vector<16x16xf32>
    %409 = arith.addf %404, %408 : vector<16x16xf32>
    %410 = vector.extract_strided_slice %389 {offsets = [4, 0], sizes = [16, 16], strides = [1, 1]} : vector<22x16xf32> to vector<16x16xf32>
    %c80 = arith.constant 80 : index
    %411 = memref.load %arg2[%c80] : memref<100xf32, #tpu.memory_space<smem>>
    %412 = vector.broadcast %411 : f32 to vector<16x16xf32>
    %413 = arith.mulf %410, %412 : vector<16x16xf32>
    %414 = arith.addf %409, %413 : vector<16x16xf32>
    %415 = vector.extract_strided_slice %389 {offsets = [5, 0], sizes = [16, 16], strides = [1, 1]} : vector<22x16xf32> to vector<16x16xf32>
    %c87 = arith.constant 87 : index
    %416 = memref.load %arg2[%c87] : memref<100xf32, #tpu.memory_space<smem>>
    %417 = vector.broadcast %416 : f32 to vector<16x16xf32>
    %418 = arith.mulf %415, %417 : vector<16x16xf32>
    %419 = arith.addf %414, %418 : vector<16x16xf32>
    %420 = vector.extract_strided_slice %389 {offsets = [6, 0], sizes = [16, 16], strides = [1, 1]} : vector<22x16xf32> to vector<16x16xf32>
    %c94 = arith.constant 94 : index
    %421 = memref.load %arg2[%c94] : memref<100xf32, #tpu.memory_space<smem>>
    %422 = vector.broadcast %421 : f32 to vector<16x16xf32>
    %423 = arith.mulf %420, %422 : vector<16x16xf32>
    %424 = arith.addf %419, %423 : vector<16x16xf32>
    %c1_51 = arith.constant 1 : index
    %c0_52 = arith.constant 0 : index
    %c4_53 = arith.constant 4 : index
    %425 = vector.load %arg4[%c1_51, %c0_52, %c4_53] : memref<2x22x22xf32, #tpu.memory_space<vmem>>, vector<1x22x16xf32>
    %426 = vector.shape_cast %425 : vector<1x22x16xf32> to vector<22x16xf32>
    %427 = vector.extract_strided_slice %426 {offsets = [0, 0], sizes = [16, 16], strides = [1, 1]} : vector<22x16xf32> to vector<16x16xf32>
    %c53 = arith.constant 53 : index
    %428 = memref.load %arg2[%c53] : memref<100xf32, #tpu.memory_space<smem>>
    %429 = vector.broadcast %428 : f32 to vector<16x16xf32>
    %430 = arith.mulf %427, %429 : vector<16x16xf32>
    %431 = arith.addf %424, %430 : vector<16x16xf32>
    %432 = vector.extract_strided_slice %426 {offsets = [1, 0], sizes = [16, 16], strides = [1, 1]} : vector<22x16xf32> to vector<16x16xf32>
    %c60 = arith.constant 60 : index
    %433 = memref.load %arg2[%c60] : memref<100xf32, #tpu.memory_space<smem>>
    %434 = vector.broadcast %433 : f32 to vector<16x16xf32>
    %435 = arith.mulf %432, %434 : vector<16x16xf32>
    %436 = arith.addf %431, %435 : vector<16x16xf32>
    %437 = vector.extract_strided_slice %426 {offsets = [2, 0], sizes = [16, 16], strides = [1, 1]} : vector<22x16xf32> to vector<16x16xf32>
    %c67 = arith.constant 67 : index
    %438 = memref.load %arg2[%c67] : memref<100xf32, #tpu.memory_space<smem>>
    %439 = vector.broadcast %438 : f32 to vector<16x16xf32>
    %440 = arith.mulf %437, %439 : vector<16x16xf32>
    %441 = arith.addf %436, %440 : vector<16x16xf32>
    %442 = vector.extract_strided_slice %426 {offsets = [3, 0], sizes = [16, 16], strides = [1, 1]} : vector<22x16xf32> to vector<16x16xf32>
    %c74 = arith.constant 74 : index
    %443 = memref.load %arg2[%c74] : memref<100xf32, #tpu.memory_space<smem>>
    %444 = vector.broadcast %443 : f32 to vector<16x16xf32>
    %445 = arith.mulf %442, %444 : vector<16x16xf32>
    %446 = arith.addf %441, %445 : vector<16x16xf32>
    %447 = vector.extract_strided_slice %426 {offsets = [4, 0], sizes = [16, 16], strides = [1, 1]} : vector<22x16xf32> to vector<16x16xf32>
    %c81 = arith.constant 81 : index
    %448 = memref.load %arg2[%c81] : memref<100xf32, #tpu.memory_space<smem>>
    %449 = vector.broadcast %448 : f32 to vector<16x16xf32>
    %450 = arith.mulf %447, %449 : vector<16x16xf32>
    %451 = arith.addf %446, %450 : vector<16x16xf32>
    %452 = vector.extract_strided_slice %426 {offsets = [5, 0], sizes = [16, 16], strides = [1, 1]} : vector<22x16xf32> to vector<16x16xf32>
    %c88 = arith.constant 88 : index
    %453 = memref.load %arg2[%c88] : memref<100xf32, #tpu.memory_space<smem>>
    %454 = vector.broadcast %453 : f32 to vector<16x16xf32>
    %455 = arith.mulf %452, %454 : vector<16x16xf32>
    %456 = arith.addf %451, %455 : vector<16x16xf32>
    %457 = vector.extract_strided_slice %426 {offsets = [6, 0], sizes = [16, 16], strides = [1, 1]} : vector<22x16xf32> to vector<16x16xf32>
    %c95 = arith.constant 95 : index
    %458 = memref.load %arg2[%c95] : memref<100xf32, #tpu.memory_space<smem>>
    %459 = vector.broadcast %458 : f32 to vector<16x16xf32>
    %460 = arith.mulf %457, %459 : vector<16x16xf32>
    %461 = arith.addf %456, %460 : vector<16x16xf32>
    %c1_54 = arith.constant 1 : index
    %c0_55 = arith.constant 0 : index
    %c5_56 = arith.constant 5 : index
    %462 = vector.load %arg4[%c1_54, %c0_55, %c5_56] : memref<2x22x22xf32, #tpu.memory_space<vmem>>, vector<1x22x16xf32>
    %463 = vector.shape_cast %462 : vector<1x22x16xf32> to vector<22x16xf32>
    %464 = vector.extract_strided_slice %463 {offsets = [0, 0], sizes = [16, 16], strides = [1, 1]} : vector<22x16xf32> to vector<16x16xf32>
    %c54 = arith.constant 54 : index
    %465 = memref.load %arg2[%c54] : memref<100xf32, #tpu.memory_space<smem>>
    %466 = vector.broadcast %465 : f32 to vector<16x16xf32>
    %467 = arith.mulf %464, %466 : vector<16x16xf32>
    %468 = arith.addf %461, %467 : vector<16x16xf32>
    %469 = vector.extract_strided_slice %463 {offsets = [1, 0], sizes = [16, 16], strides = [1, 1]} : vector<22x16xf32> to vector<16x16xf32>
    %c61 = arith.constant 61 : index
    %470 = memref.load %arg2[%c61] : memref<100xf32, #tpu.memory_space<smem>>
    %471 = vector.broadcast %470 : f32 to vector<16x16xf32>
    %472 = arith.mulf %469, %471 : vector<16x16xf32>
    %473 = arith.addf %468, %472 : vector<16x16xf32>
    %474 = vector.extract_strided_slice %463 {offsets = [2, 0], sizes = [16, 16], strides = [1, 1]} : vector<22x16xf32> to vector<16x16xf32>
    %c68 = arith.constant 68 : index
    %475 = memref.load %arg2[%c68] : memref<100xf32, #tpu.memory_space<smem>>
    %476 = vector.broadcast %475 : f32 to vector<16x16xf32>
    %477 = arith.mulf %474, %476 : vector<16x16xf32>
    %478 = arith.addf %473, %477 : vector<16x16xf32>
    %479 = vector.extract_strided_slice %463 {offsets = [3, 0], sizes = [16, 16], strides = [1, 1]} : vector<22x16xf32> to vector<16x16xf32>
    %c75 = arith.constant 75 : index
    %480 = memref.load %arg2[%c75] : memref<100xf32, #tpu.memory_space<smem>>
    %481 = vector.broadcast %480 : f32 to vector<16x16xf32>
    %482 = arith.mulf %479, %481 : vector<16x16xf32>
    %483 = arith.addf %478, %482 : vector<16x16xf32>
    %484 = vector.extract_strided_slice %463 {offsets = [4, 0], sizes = [16, 16], strides = [1, 1]} : vector<22x16xf32> to vector<16x16xf32>
    %c82 = arith.constant 82 : index
    %485 = memref.load %arg2[%c82] : memref<100xf32, #tpu.memory_space<smem>>
    %486 = vector.broadcast %485 : f32 to vector<16x16xf32>
    %487 = arith.mulf %484, %486 : vector<16x16xf32>
    %488 = arith.addf %483, %487 : vector<16x16xf32>
    %489 = vector.extract_strided_slice %463 {offsets = [5, 0], sizes = [16, 16], strides = [1, 1]} : vector<22x16xf32> to vector<16x16xf32>
    %c89 = arith.constant 89 : index
    %490 = memref.load %arg2[%c89] : memref<100xf32, #tpu.memory_space<smem>>
    %491 = vector.broadcast %490 : f32 to vector<16x16xf32>
    %492 = arith.mulf %489, %491 : vector<16x16xf32>
    %493 = arith.addf %488, %492 : vector<16x16xf32>
    %494 = vector.extract_strided_slice %463 {offsets = [6, 0], sizes = [16, 16], strides = [1, 1]} : vector<22x16xf32> to vector<16x16xf32>
    %c96 = arith.constant 96 : index
    %495 = memref.load %arg2[%c96] : memref<100xf32, #tpu.memory_space<smem>>
    %496 = vector.broadcast %495 : f32 to vector<16x16xf32>
    %497 = arith.mulf %494, %496 : vector<16x16xf32>
    %498 = arith.addf %493, %497 : vector<16x16xf32>
    %c1_57 = arith.constant 1 : index
    %c0_58 = arith.constant 0 : index
    %c6_59 = arith.constant 6 : index
    %499 = vector.load %arg4[%c1_57, %c0_58, %c6_59] : memref<2x22x22xf32, #tpu.memory_space<vmem>>, vector<1x22x16xf32>
    %500 = vector.shape_cast %499 : vector<1x22x16xf32> to vector<22x16xf32>
    %501 = vector.extract_strided_slice %500 {offsets = [0, 0], sizes = [16, 16], strides = [1, 1]} : vector<22x16xf32> to vector<16x16xf32>
    %c55 = arith.constant 55 : index
    %502 = memref.load %arg2[%c55] : memref<100xf32, #tpu.memory_space<smem>>
    %503 = vector.broadcast %502 : f32 to vector<16x16xf32>
    %504 = arith.mulf %501, %503 : vector<16x16xf32>
    %505 = arith.addf %498, %504 : vector<16x16xf32>
    %506 = vector.extract_strided_slice %500 {offsets = [1, 0], sizes = [16, 16], strides = [1, 1]} : vector<22x16xf32> to vector<16x16xf32>
    %c62 = arith.constant 62 : index
    %507 = memref.load %arg2[%c62] : memref<100xf32, #tpu.memory_space<smem>>
    %508 = vector.broadcast %507 : f32 to vector<16x16xf32>
    %509 = arith.mulf %506, %508 : vector<16x16xf32>
    %510 = arith.addf %505, %509 : vector<16x16xf32>
    %511 = vector.extract_strided_slice %500 {offsets = [2, 0], sizes = [16, 16], strides = [1, 1]} : vector<22x16xf32> to vector<16x16xf32>
    %c69 = arith.constant 69 : index
    %512 = memref.load %arg2[%c69] : memref<100xf32, #tpu.memory_space<smem>>
    %513 = vector.broadcast %512 : f32 to vector<16x16xf32>
    %514 = arith.mulf %511, %513 : vector<16x16xf32>
    %515 = arith.addf %510, %514 : vector<16x16xf32>
    %516 = vector.extract_strided_slice %500 {offsets = [3, 0], sizes = [16, 16], strides = [1, 1]} : vector<22x16xf32> to vector<16x16xf32>
    %c76 = arith.constant 76 : index
    %517 = memref.load %arg2[%c76] : memref<100xf32, #tpu.memory_space<smem>>
    %518 = vector.broadcast %517 : f32 to vector<16x16xf32>
    %519 = arith.mulf %516, %518 : vector<16x16xf32>
    %520 = arith.addf %515, %519 : vector<16x16xf32>
    %521 = vector.extract_strided_slice %500 {offsets = [4, 0], sizes = [16, 16], strides = [1, 1]} : vector<22x16xf32> to vector<16x16xf32>
    %c83 = arith.constant 83 : index
    %522 = memref.load %arg2[%c83] : memref<100xf32, #tpu.memory_space<smem>>
    %523 = vector.broadcast %522 : f32 to vector<16x16xf32>
    %524 = arith.mulf %521, %523 : vector<16x16xf32>
    %525 = arith.addf %520, %524 : vector<16x16xf32>
    %526 = vector.extract_strided_slice %500 {offsets = [5, 0], sizes = [16, 16], strides = [1, 1]} : vector<22x16xf32> to vector<16x16xf32>
    %c90 = arith.constant 90 : index
    %527 = memref.load %arg2[%c90] : memref<100xf32, #tpu.memory_space<smem>>
    %528 = vector.broadcast %527 : f32 to vector<16x16xf32>
    %529 = arith.mulf %526, %528 : vector<16x16xf32>
    %530 = arith.addf %525, %529 : vector<16x16xf32>
    %531 = vector.extract_strided_slice %500 {offsets = [6, 0], sizes = [16, 16], strides = [1, 1]} : vector<22x16xf32> to vector<16x16xf32>
    %c97 = arith.constant 97 : index
    %532 = memref.load %arg2[%c97] : memref<100xf32, #tpu.memory_space<smem>>
    %533 = vector.broadcast %532 : f32 to vector<16x16xf32>
    %534 = arith.mulf %531, %533 : vector<16x16xf32>
    %535 = arith.addf %530, %534 : vector<16x16xf32>
    %c98 = arith.constant 98 : index
    %536 = memref.load %arg2[%c98] : memref<100xf32, #tpu.memory_space<smem>>
    %537 = vector.broadcast %536 : f32 to vector<16x16xf32>
    %538 = arith.mulf %535, %537 : vector<16x16xf32>
    %c99 = arith.constant 99 : index
    %539 = memref.load %arg2[%c99] : memref<100xf32, #tpu.memory_space<smem>>
    %540 = vector.broadcast %539 : f32 to vector<16x16xf32>
    %541 = arith.addf %538, %540 : vector<16x16xf32>
    %542 = arith.negf %541 : vector<16x16xf32>
    %543 = math.exp %542 : vector<16x16xf32>
    %cst_60 = arith.constant 1.000000e+00 : f32
    %544 = vector.broadcast %cst_60 : f32 to vector<16x16xf32>
    %545 = arith.addf %544, %543 : vector<16x16xf32>
    %546 = arith.divf %544, %545 : vector<16x16xf32>
    %c0_61 = arith.constant 0 : index
    %c0_62 = arith.constant 0 : index
    %c0_63 = arith.constant 0 : index
    %547 = vector.load %arg3[%c0_61, %c0_62, %c0_63] : memref<1x16x16xf32, #tpu.memory_space<vmem>>, vector<1x16x16xf32>
    %548 = vector.shape_cast %547 : vector<1x16x16xf32> to vector<16x16xf32>
    %549 = vector.shape_cast %546 : vector<16x16xf32> to vector<1x16x16xf32>
    tpu.vector_store %arg3[%c0_61, %c0_62, %c0_63], %549 {strides = array<i32>} : memref<1x16x16xf32, #tpu.memory_space<vmem>>, vector<1x16x16xf32>,
    return
  }
  func.func @transform_0(%arg0: i32) -> (i32, i32, i32, i32) {
    %c0_i32 = arith.constant 0 : i32
    %c0_i32_0 = arith.constant 0 : i32
    %c0_i32_1 = arith.constant 0 : i32
    %c0_i32_2 = arith.constant 0 : i32
    return %arg0, %c0_i32, %c0_i32_0, %c0_i32_1 : i32, i32, i32, i32
  }
  func.func @transform_1(%arg0: i32) -> i32 {
    %c0_i32 = arith.constant 0 : i32
    %c0_i32_0 = arith.constant 0 : i32
    return %c0_i32 : i32
  }
  func.func @transform_2(%arg0: i32) -> (i32, i32, i32) {
    %c0_i32 = arith.constant 0 : i32
    %c0_i32_0 = arith.constant 0 : i32
    %c0_i32_1 = arith.constant 0 : i32
    return %arg0, %c0_i32, %c0_i32_0 : i32, i32, i32
  }
}

module attributes {stable_mosaic.version = 11 : i64} {
  func.func @_conv3_fuse_kernel(%arg0: i32, %arg1: i32, %arg2: memref<1x256x144xbf16, #tpu.memory_space<vmem>>, %arg3: memref<144x16xbf16, #tpu.memory_space<vmem>>, %arg4: memref<1x256x16xf32, #tpu.memory_space<vmem>>, %arg5: memref<1x256x16xf32, #tpu.memory_space<vmem>>, %arg6: memref<1x256x1xf32, #tpu.memory_space<vmem>>, %arg7: memref<1x256x16xf32, #tpu.memory_space<vmem>>) attributes {dimension_semantics = [#tpu.dimension_semantics<parallel>, #tpu.dimension_semantics<parallel>], iteration_bounds = array<i64: 2, 1>, scalar_prefetch = 0 : i64, scratch_operands = 0 : i64, tpu.core_type = #tpu.core_type<tc>, window_params = [{transform_indices = @transform_0, window_bounds = array<i64: 1, 256, 144>}, {pipeline_mode = #tpu.pipeline_mode<synchronous>, transform_indices = @transform_1, window_bounds = array<i64: 144, 16>}, {transform_indices = @transform_2, window_bounds = array<i64: 1, 256, 16>}, {transform_indices = @transform_3, window_bounds = array<i64: 1, 256, 16>}, {transform_indices = @transform_4, window_bounds = array<i64: 1, 256, 1>}, {transform_indices = @transform_5, window_bounds = array<i64: 1, 256, 16>}]} {
    %c0 = arith.constant 0 : index
    %c0_0 = arith.constant 0 : index
    %c0_1 = arith.constant 0 : index
    %0 = vector.load %arg2[%c0, %c0_0, %c0_1] : memref<1x256x144xbf16, #tpu.memory_space<vmem>>, vector<1x256x144xbf16>
    %1 = vector.shape_cast %0 : vector<1x256x144xbf16> to vector<256x144xbf16>
    %c0_2 = arith.constant 0 : index
    %c0_3 = arith.constant 0 : index
    %2 = vector.load %arg3[%c0_2, %c0_3] : memref<144x16xbf16, #tpu.memory_space<vmem>>, vector<144x16xbf16>
    %cst = arith.constant dense<0.000000e+00> : vector<256x16xf32>
    %3 = tpu.matmul %1, %2, %cst {dimension_numbers = #tpu.dot_dimension_numbers<[1], [0], [0], [1], [0, 0, 1, 1], [], []>} : vector<256x144xbf16>, vector<144x16xbf16>, vector<256x16xf32> -> vector<256x16xf32>
    %c0_4 = arith.constant 0 : index
    %c0_5 = arith.constant 0 : index
    %c0_6 = arith.constant 0 : index
    %4 = vector.load %arg4[%c0_4, %c0_5, %c0_6] : memref<1x256x16xf32, #tpu.memory_space<vmem>>, vector<1x256x16xf32>
    %5 = vector.shape_cast %4 : vector<1x256x16xf32> to vector<256x16xf32>
    %c0_7 = arith.constant 0 : index
    %c0_8 = arith.constant 0 : index
    %c0_9 = arith.constant 0 : index
    %6 = vector.load %arg5[%c0_7, %c0_8, %c0_9] : memref<1x256x16xf32, #tpu.memory_space<vmem>>, vector<1x256x16xf32>
    %7 = vector.shape_cast %6 : vector<1x256x16xf32> to vector<256x16xf32>
    %c0_10 = arith.constant 0 : index
    %c0_11 = arith.constant 0 : index
    %c0_12 = arith.constant 0 : index
    %8 = vector.load %arg6[%c0_10, %c0_11, %c0_12] : memref<1x256x1xf32, #tpu.memory_space<vmem>>, vector<1x256x1xf32>
    %9 = vector.shape_cast %8 : vector<1x256x1xf32> to vector<256x1xf32>
    %10 = vector.broadcast %9 : vector<256x1xf32> to vector<256x16xf32>
    %11 = arith.mulf %7, %10 : vector<256x16xf32>
    %12 = arith.mulf %11, %3 : vector<256x16xf32>
    %13 = arith.addf %5, %12 : vector<256x16xf32>
    %cst_13 = arith.constant 0.000000e+00 : f32
    %14 = vector.broadcast %cst_13 : f32 to vector<256x16xf32>
    %15 = arith.maximumf %13, %14 : vector<256x16xf32>
    %c0_14 = arith.constant 0 : index
    %c0_15 = arith.constant 0 : index
    %c0_16 = arith.constant 0 : index
    %16 = vector.load %arg7[%c0_14, %c0_15, %c0_16] : memref<1x256x16xf32, #tpu.memory_space<vmem>>, vector<1x256x16xf32>
    %17 = vector.shape_cast %16 : vector<1x256x16xf32> to vector<256x16xf32>
    %18 = vector.shape_cast %15 : vector<256x16xf32> to vector<1x256x16xf32>
    tpu.vector_store %arg7[%c0_14, %c0_15, %c0_16], %18 {strides = array<i32>} : memref<1x256x16xf32, #tpu.memory_space<vmem>>, vector<1x256x16xf32>,
    return
  }
  func.func @transform_0(%arg0: i32, %arg1: i32) -> (i32, i32, i32) {
    %c0_i32 = arith.constant 0 : i32
    %c0_i32_0 = arith.constant 0 : i32
    return %arg0, %arg1, %c0_i32 : i32, i32, i32
  }
  func.func @transform_1(%arg0: i32, %arg1: i32) -> (i32, i32) {
    %c0_i32 = arith.constant 0 : i32
    %c0_i32_0 = arith.constant 0 : i32
    %c0_i32_1 = arith.constant 0 : i32
    return %c0_i32, %c0_i32_0 : i32, i32
  }
  func.func @transform_2(%arg0: i32, %arg1: i32) -> (i32, i32, i32) {
    %c0_i32 = arith.constant 0 : i32
    %c0_i32_0 = arith.constant 0 : i32
    return %arg0, %arg1, %c0_i32 : i32, i32, i32
  }
  func.func @transform_3(%arg0: i32, %arg1: i32) -> (i32, i32, i32) {
    %c0_i32 = arith.constant 0 : i32
    %c0_i32_0 = arith.constant 0 : i32
    return %arg0, %arg1, %c0_i32 : i32, i32, i32
  }
  func.func @transform_4(%arg0: i32, %arg1: i32) -> (i32, i32, i32) {
    %c0_i32 = arith.constant 0 : i32
    %c0_i32_0 = arith.constant 0 : i32
    return %arg0, %arg1, %c0_i32 : i32, i32, i32
  }
  func.func @transform_5(%arg0: i32, %arg1: i32) -> (i32, i32, i32) {
    %c0_i32 = arith.constant 0 : i32
    %c0_i32_0 = arith.constant 0 : i32
    return %arg0, %arg1, %c0_i32 : i32, i32, i32
  }
}

</mosaic_0001>

<bundles_post_ra>
// kernel: maf_forward.4
= control target key start
LH: loop header
LB: loop body
LE: loop exit
PB: predicated region body
PF: predicated region fallthrough
CT: control target
= control target key end

     0   :  { %vm18_vm0 = vcmask 261120   ;;  %vm65_vm1 = vcmask 253952   ;;  %vm151_vm2 = vcmask 254976   ;;  %s282_s0 = inlined_call_operand.vmem [shape: f32[2,64,32], index: 0, kind: input, shape index: {}]   ;;  %s283_s1 = inlined_call_operand.vmem [shape: f32[2,32], index: 1, kind: output, shape index: {0}]   ;;  %s284_s2 = inlined_call_operand.vmem [shape: f32[2,32], index: 2, kind: output, shape index: {1}]  }
   0x1   :  { %v10_v0 = vld [vmem:[%s282_s0] sm:$0xff]  ;;  %v11_v1 = vld [vmem:[%s282_s0 + $0x8] sm:$0xff]  ;;  %v12_v2 = vld [vmem:[%s282_s0 + $0x10] sm:$0xff] }
   0x2   :  { %v13_v3 = vld [vmem:[%s282_s0 + $0x18] sm:$0xff]  ;;  %v14_v4 = vld [vmem:[%s282_s0 + $0x20] sm:$0xff]  ;;  %v15_v5 = vld [vmem:[%s282_s0 + $0x28] sm:$0xff]  ;;  %v19_v6 = vsel %vm18_vm0, %v10_v0, 0.0  ;;  %v20_v7 = vsel %vm18_vm0, %v11_v1, 0.0  ;;  %v22_v8 = vsel %vm18_vm0, %v12_v2, 0.0 }
   0x3   :  { %v16_v9 = vld [vmem:[%s282_s0 + $0x30] sm:$0xff]  ;;  %v17_v10 = vld [vmem:[%s282_s0 + $0x38] sm:$0xff]  ;;  %v21_v11 = vadd.f32 %v20_v7, %v19_v6  ;;  %v24_v12 = vsel %vm18_vm0, %v13_v3, 0.0  ;;  %v26_v13 = vsel %vm18_vm0, %v14_v4, 0.0  ;;  %v28_v14 = vsel %vm18_vm0, %v15_v5, 0.0  ;;  %v161_v15 = vld [vmem:[%s282_s0 + $0x40] sm:$0xff] }
   0x4   :  { %v30_v16 = vsel %vm18_vm0, %v16_v9, 0.0  ;;  %v32_v17 = vsel %vm18_vm0, %v17_v10, 0.0  ;;  %v50_v18 = vsel %vm18_vm0, %v17_v10, -inf  ;;  %v162_v19 = vld [vmem:[%s282_s0 + $0x48] sm:$0xff]  ;;  %v163_v20 = vld [vmem:[%s282_s0 + $0x50] sm:$0xff]  ;;  %v164_v21 = vld [vmem:[%s282_s0 + $0x58] sm:$0xff] }
   0x5   :  { %v23_v22 = vadd.f32 %v22_v8, %v21_v11  ;;  %v165_v23 = vld [vmem:[%s282_s0 + $0x60] sm:$0xff]  ;;  %v166_v24 = vld [vmem:[%s282_s0 + $0x68] sm:$0xff]  ;;  %v167_v25 = vld [vmem:[%s282_s0 + $0x70] sm:$0xff]  ;;  %v88_v26 = vsel %vm18_vm0, %v161_v15, 0.0  ;;  %v89_v27 = vsel %vm18_vm0, %v162_v19, 0.0  ;;  %v91_v28 = vsel %vm18_vm0, %v163_v20, 0.0 }
   0x6   :  { %v168_v29 = vld [vmem:[%s282_s0 + $0x78] sm:$0xff]  ;;  %v90_v30 = vadd.f32 %v89_v27, %v88_v26  ;;  %v93_v31 = vsel %vm18_vm0, %v164_v21, 0.0  ;;  %v95_v32 = vsel %vm18_vm0, %v165_v23, 0.0  ;;  %v97_v33 = vsel %vm18_vm0, %v166_v24, 0.0 }
   0x7   :  { %v25_v34 = vadd.f32 %v24_v12, %v23_v22  ;;  %v99_v35 = vsel %vm18_vm0, %v167_v25, 0.0  ;;  %v101_v36 = vsel %vm18_vm0, %v168_v29, 0.0  ;;  %v119_v37 = vsel %vm18_vm0, %v168_v29, -inf }
   0x8   :  { %v92_v38 = vadd.f32 %v91_v28, %v90_v30  ;;  %v40_v39 = vsel %vm18_vm0, %v10_v0, -inf  ;;  %v41_v40 = vsel %vm18_vm0, %v11_v1, -inf  ;;  %v42_v41 = vsel %vm18_vm0, %v12_v2, -inf }
   0x9   :  { %v27_v42 = vadd.f32 %v26_v13, %v25_v34  ;;  %v43_v43 = vsel %vm18_vm0, %v13_v3, -inf  ;;  %v44_v44 = vsel %vm18_vm0, %v14_v4, -inf  ;;  %v46_v45 = vsel %vm18_vm0, %v15_v5, -inf }
   0xa   :  { %v94_v46 = vadd.f32 %v93_v31, %v92_v38  ;;  %v45_v47 = vmax.f32 %v40_v39, %v44_v44  ;;  %v47_v48 = vmax.f32 %v41_v40, %v46_v45  ;;  %v48_v49 = vsel %vm18_vm0, %v16_v9, -inf }
   0xb   :  { %v29_v50 = vadd.f32 %v28_v14, %v27_v42  ;;  %v49_v51 = vmax.f32 %v42_v41, %v48_v49  ;;  %v51_v52 = vmax.f32 %v43_v43, %v50_v18  ;;  %v109_v53 = vsel %vm18_vm0, %v161_v15, -inf }
   0xc   :  { %v96_v54 = vadd.f32 %v95_v32, %v94_v46  ;;  %v52_v55 = vmax.f32 %v45_v47, %v47_v48  ;;  %v110_v56 = vsel %vm18_vm0, %v162_v19, -inf  ;;  %v111_v57 = vsel %vm18_vm0, %v163_v20, -inf }
   0xd   :  { %v31_v58 = vadd.f32 %v30_v16, %v29_v50  ;;  %v53_v59 = vmax.f32 %v49_v51, %v51_v52  ;;  %v112_v60 = vsel %vm18_vm0, %v164_v21, -inf  ;;  %v113_v61 = vsel %vm18_vm0, %v165_v23, -inf }
   0xe   :  { %v98_v62 = vadd.f32 %v97_v33, %v96_v54  ;;  %v114_v63 = vmax.f32 %v109_v53, %v113_v61  ;;  %v115_v0 = vsel %vm18_vm0, %v166_v24, -inf  ;;  %v117_v1 = vsel %vm18_vm0, %v167_v25, -inf }
   0xf   :  { %v33_v2 = vadd.f32 %v32_v17, %v31_v58  ;;  %v54_v3 = vmax.f32 %v52_v55, %v53_v59  ;;  %v116_v4 = vmax.f32 %v110_v56, %v115_v0  ;;  %v118_v5 = vmax.f32 %v111_v57, %v117_v1 }
  0x10   :  { %v100_v6 = vadd.f32 %v99_v35, %v98_v62  ;;  %v120_v7 = vmax.f32 %v112_v60, %v119_v37 }
  0x11   :  { %v34_v8 = vrot.slane %v33_v2, 4  ;;  %v55_v9 = vrot.slane %v54_v3, 4  ;;  %v121_v10 = vmax.f32 %v114_v63, %v116_v4 }
  0x12   :  { %v102_v11 = vadd.f32 %v101_v36, %v100_v6  ;;  %v122_v12 = vmax.f32 %v118_v5, %v120_v7 }
  0x13   :  { %v35_v13 = vadd.f32 %v34_v8, %v33_v2  ;;  %v56_v14 = vmax.f32 %v54_v3, %v55_v9 }
  0x14   :  { %v103_v15 = vrot.slane %v102_v11, 4  ;;  %v123_v16 = vmax.f32 %v121_v10, %v122_v12 }
  0x15   :  { %v36_v18 = vrot.slane %v35_v13, 2  ;;  %v57_v19 = vrot.slane %v56_v14, 2 }
  0x16   :  { %v104_v20 = vadd.f32 %v103_v15, %v102_v11  ;;  %v124_v21 = vrot.slane %v123_v16, 4 }
  0x17   :  { %v37_v22 = vadd.f32 %v36_v18, %v35_v13  ;;  %v58_v17 = vmax.f32 %v56_v14, %v57_v19 }
  0x18   :  { %v105_v23 = vrot.slane %v104_v20, 2  ;;  %v125_v24 = vmax.f32 %v123_v16, %v124_v21 }
  0x19   :  { %v38_v25 = vrot.slane %v37_v22, 1  ;;  %v59_v26 = vrot.slane %v58_v17, 1 }
  0x1a   :  { %v106_v27 = vadd.f32 %v105_v23, %v104_v20  ;;  %v126_v28 = vrot.slane %v125_v24, 2 }
  0x1b   :  { %v39_v29 = vadd.f32 %v38_v25, %v37_v22  ;;  %v60_v30 = vmax.f32 %v58_v17, %v59_v26 }
  0x1c   :  { %v107_v31 = vrot.slane %v106_v27, 1  ;;  %v127_v32 = vmax.f32 %v125_v24, %v126_v28 }
  0x1d   :  { %66 = vst.msk [vmem:[%s283_s1] sm:$0x1] %vm65_vm1, %v39_v29  ;;  %67 = vst.msk [vmem:[%s284_s2] sm:$0x1] %vm65_vm1, %v60_v30 }
  0x1e   :  { %v108_v33 = vadd.f32 %v107_v31, %v106_v27  ;;  %v128_v34 = vrot.slane %v127_v32, 1 }
  0x20   :  { %134 = vst.msk [vmem:[%s283_s1 + $0x1] sm:$0x1] %vm65_vm1, %v108_v33  ;;  %v129_v35 = vmax.f32 %v127_v32, %v128_v34 }
  0x22   :  { %135 = vst.msk [vmem:[%s284_s2 + $0x1] sm:$0x1] %vm65_vm1, %v129_v35 }
  0x27   :  { %v149_v36 = vld [vmem:[%s283_s1] sm:$0x3] }
  0x28   :  { %v150_v37 = vmul.f32 0.015625, %v149_v36 }
  0x2a   :  { %152 = vst.msk [vmem:[%s283_s1] sm:$0x3] %vm151_vm2, %v150_v37 }

// kernel: maf_forward.5
= control target key start
LH: loop header
LB: loop body
LE: loop exit
PB: predicated region body
PF: predicated region fallthrough
CT: control target
= control target key end

     0   :  { %s673_s15 = smov 0   ;;  %s675_s16 = smov 0   ;;  %s738_s0 = inlined_call_operand.vmem [shape: bf16[2,64,32], index: 0, kind: input, shape index: {}]   ;;  %s739_s1 = inlined_call_operand.vmem [shape: f32[2,32,1], index: 1, kind: input, shape index: {}]   ;;  %s740_s2 = inlined_call_operand.vmem [shape: f32[32,64], index: 2, kind: input, shape index: {}]   ;;  %s741_s3 = inlined_call_operand.vmem [shape: f32[1,128], index: 3, kind: input, shape index: {}]   ;;  %s742_s4 = inlined_call_operand.vmem [shape: f32[2,64,128], index: 4, kind: output, shape index: {}]  }
   0x1   :  { %s677_s17 = smov 0  }
   0x2 LB: > { %s26_s18 = sadd.s32 1, %s640_s16  ;;  %p537_p0 = scmp.ge.s32.totalorder %s644_s17, 1  ;;  %s644_s17 = sphi %s677_s17, %s14_s17   ;;  %s640_s16 = sphi %s675_s16, %s744_s16   ;;  %s636_s15 = sphi %s673_s15, %s743_s15  }
   0x3   : > { %p28_p1 = scmp.ge.s32.totalorder %s26_s18, 2  ;;  %p193_p2 = scmp.lt.s32.totalorder %s644_s17, 3 }
   0x5   : > { %s746_s18 = smov (%p28_p1, %s26_s18), 0  ;;  %p194_p3 = pnand %p537_p0, %p193_p2 }
   0x6   : > { %p233_p4 = scmp.lt.s32.totalorder (!%p194_p3), %s636_s15, 1  ;;  %v646_v0 = vmov (!%p194_p3), 0   ;;  %v260_v5 = vld [vmem:[%s740_s2 + $0x10] sm:$0xff] (!%p194_p3)  ;;  %v258_v8 = vld [vmem:[%s740_s2] sm:$0xff] (!%p194_p3)  ;;  %v261_v9 = vld [vmem:[%s740_s2 + $0x18] sm:$0xff] (!%p194_p3)  ;;  %vm348_vm0 = vcmask (!%p194_p3), 261120  }
   0x7   : > { %197 = sbr.rel (%p194_p3) target bundleno = 500 (0x1f4), region = 36  ;;  %607 = vset.pattern.permute.xlu1 (!%p194_p3), %v646_v0  ;;  %606 = vset.pattern.permute.xlu0 (!%p194_p3), %v646_v0  ;;  %v259_v10 = vld [vmem:[%s740_s2 + $0x8] sm:$0xff] (!%p194_p3)  ;;  %s647_s8 = smov (!%p194_p3), 64   ;;  %vm306_vm1 = vcmask (!%p194_p3), 523264   ;;  %v544_v35 = vld [vmem:[%s741_s3] ss:$0 sm:$0xff] (!%p194_p3) }
   0xe   : > { %s748_s15 = smov (!%p233_p4, %s636_s15), 1 }
   0xf   : > { %s555_s19 = sshll.u32 %s748_s15, 5  ;;  %s557_s9 = sshll.u32 %s748_s15, 6 }
  0x10   : > { %s246_s22 = scalar_lea.vmem %s739_s1, %s555_s19  ;;  %s700_s25 = scalar_lea.vmem %s738_s0, %s555_s19 }
  0x11   : > { %v264_v1 = vld [vmem:[%s246_s22 + $0x10] sm:$0xff]  ;;  %v262_v2 = vld [vmem:[%s246_s22] sm:$0xff]  ;;  %v265_v3 = vld [vmem:[%s246_s22 + $0x18] sm:$0xff]  ;;  %s255_s14 = scalar_lea.vmem %s742_s4, %s557_s9 }
  0x12   : > { %278 = vperm.xlu1 %607, %v264_v1   ;;  %268 = vperm.xlu0 %606, %v262_v2   ;;  %v263_v4 = vld [vmem:[%s246_s22 + $0x8] sm:$0xff]  ;;  %v618_v17 = vld [vmem:[%s700_s25] sm:$0xff]   ;;  %v619_v18 = vld [vmem:[%s700_s25 + $0x10] sm:$0xff]  }
  0x13   : > { %568 = vmatprep.mubr.msk.bf16.mxu0 %vm348_vm0, %v618_v17  ;;  %572 = vmatprep.mubr.msk.bf16.mxu1 %vm348_vm0, %v619_v18  ;;  %v620_v33 = vld [vmem:[%s700_s25 + $0x8] sm:$0xff]   ;;  %v621_v34 = vld [vmem:[%s700_s25 + $0x18] sm:$0xff]  }
  0x16   : > { %283 = vperm.xlu1 %607, %v265_v3   ;;  %273 = vperm.xlu0 %606, %v263_v4  }
  0x91   : > { %v279_v6 = vpop.permute.xlu1 %278  ;;  %v269_v7 = vpop.permute.xlu0 %268 }
  0x92   : > { %v288_v11 = vmul.f32 %v279_v6, %v260_v5  ;;  %v286_v14 = vmul.f32 %v269_v7, %v258_v8 }
  0x95   : > { %v284_v12 = vpop.permute.xlu1 %283  ;;  %v274_v13 = vpop.permute.xlu0 %273 }
  0x96   : > { %v289_v15 = vmul.f32 %v284_v12, %v261_v9  ;;  %v287_v16 = vmul.f32 %v274_v13, %v259_v10 }
  0x98   : > { %v613_v19 = vpack.i.bf16 %v289_v15, %v288_v11  ;;  %v608_v20 = vpack.i.bf16 %v287_v16, %v286_v14 }
  0x9a   : > { %614 = vrot.lane.b32.xlu1 %v613_v19, %s647_s8  ;;  %609 = vrot.lane.b32.xlu0 %v608_v20, %s647_s8 }
 0x10c   : > { %v615_v21 = vpop.permute.xlu1 %614  ;;  %v610_v22 = vpop.permute.xlu0 %609 }
 0x10d   : > { %v617_v23 = vunpack.i.h.bf16 %v615_v21  ;;  %v616_v24 = vunpack.i.l.bf16 %v615_v21  ;;  %v612_v25 = vunpack.i.h.bf16 %v610_v22  ;;  %v611_v26 = vunpack.i.l.bf16 %v610_v22 }
 0x10f   : > { %v310_v27 = vsel %vm306_vm1, %v261_v9, %v617_v23  ;;  %v309_v28 = vsel %vm306_vm1, %v260_v5, %v616_v24  ;;  %v308_v29 = vsel %vm306_vm1, %v259_v10, %v612_v25  ;;  %v307_v30 = vsel %vm306_vm1, %v258_v8, %v611_v26 }
 0x110   : > { %v311_v31 = vpack.c.bf16 %v308_v29, %v307_v30  ;;  %v312_v32 = vpack.c.bf16 %v310_v27, %v309_v28 }
 0x112   : > { %564 = vmatprep.subr.bf16.mxu0 %v311_v31  ;;  %576 = vmatprep.subr.bf16.mxu1 %v311_v31 }
 0x113   : > { %565 = vmatpush3.bf16.msra.mxu0 %v311_v31  ;;  %578 = vmatpush3.bf16.msra.mxu1 %v311_v31 }
 0x114   : > { %566 = vmatprep.subr.bf16.mxu0 %v312_v32  ;;  %577 = vmatprep.subr.bf16.mxu1 %v312_v32 }
 0x117   : > { %567 = vmatpush3.bf16.msra.mxu0 %v312_v32  ;;  %579 = vmatpush3.bf16.msra.mxu1 %v312_v32 }
 0x11a   : > { %569 = vmatmul.mubr.msk.bf16.vlgmr.msra.gmra.mrb[0].mxu0 %vm348_vm0, %v620_v33  ;;  %573 = vmatmul.mubr.msk.bf16.vlgmr.msra.gmra.mrb[0].mxu1 %vm348_vm0, %v621_v34 }
 0x1ed   : > { %v570_v36 = vpop.f32.mrb[0].mxu0  ;;  %v574_v37 = vpop.f32.mrb[0].mxu1 }
 0x1ee   : > { %v404_v38 = vadd.f32 %v570_v36, %v544_v35  ;;  %v420_v39 = vadd.f32 %v574_v37, %v544_v35  ;;  %v395_v40 = vpop.f32.mrb[1].mxu0  ;;  %v411_v41 = vpop.f32.mrb[1].mxu1 }
 0x1ef   : > { %v396_v42 = vadd.f32 %v544_v35, %v395_v40  ;;  %v412_v43 = vadd.f32 %v544_v35, %v411_v41  ;;  %v571_v44 = vpop.f32.mrb[2].mxu0  ;;  %v575_v45 = vpop.f32.mrb[2].mxu1 }
 0x1f0   : > { %428 = vst [vmem:[%s255_s14 + $0x10] sm:$0xff] %v404_v38  ;;  %432 = vst [vmem:[%s255_s14 + $0x30] sm:$0xff] %v420_v39  ;;  %v407_v46 = vadd.f32 %v571_v44, %v544_v35  ;;  %v423_v47 = vadd.f32 %v575_v45, %v544_v35  ;;  %v398_v48 = vpop.f32.mrb[3].mxu0  ;;  %v414_v49 = vpop.f32.mrb[3].mxu1 }
 0x1f1   : > { %426 = vst [vmem:[%s255_s14] sm:$0xff] %v396_v42  ;;  %430 = vst [vmem:[%s255_s14 + $0x20] sm:$0xff] %v412_v43  ;;  %v399_v50 = vadd.f32 %v544_v35, %v398_v48  ;;  %v415_v51 = vadd.f32 %v544_v35, %v414_v49 }
 0x1f2   : > { %429 = vst [vmem:[%s255_s14 + $0x18] sm:$0xff] %v407_v46  ;;  %433 = vst [vmem:[%s255_s14 + $0x38] sm:$0xff] %v423_v47 }
 0x1f3   : > { %427 = vst [vmem:[%s255_s14 + $0x8] sm:$0xff] %v399_v50  ;;  %431 = vst [vmem:[%s255_s14 + $0x28] sm:$0xff] %v415_v51 }
 0x1f4 PF: > { %s14_s17 = sadd.s32 1, %s644_s17   ;;  %s743_s15 = smov %s640_s16 }
 0x1f5   : > { %p11_p5 = scmp.ge.s32.totalorder %s14_s17, 4   ;;  %s744_s16 = smov %s746_s18 }
 0x1f7   :  { %13 = sbr.rel (!%p11_p5) target bundleno = 2 (0x2), region = 69 }

// kernel: maf_forward.7
= control target key start
LH: loop header
LB: loop body
LE: loop exit
PB: predicated region body
PF: predicated region fallthrough
CT: control target
= control target key end

     0   :  { %s1630_s18 = smov 0   ;;  %s1632_s19 = smov 0   ;;  %s1983_s0 = inlined_call_operand.vmem [shape: bf16[2,256,144], index: 0, kind: input, shape index: {}]   ;;  %s1984_s1 = inlined_call_operand.vmem [shape: bf16[144,16], index: 1, kind: input, shape index: {}]   ;;  %s1985_s2 = inlined_call_operand.vmem [shape: f32[2,256,16], index: 2, kind: input, shape index: {}]   ;;  %s1986_s3 = inlined_call_operand.vmem [shape: f32[2,256,16], index: 3, kind: input, shape index: {}]   ;;  %s1987_s4 = inlined_call_operand.vmem [shape: f32[2,256,1], index: 4, kind: input, shape index: {}]   ;;  %s1988_s5 = inlined_call_operand.vmem [shape: f32[2,256,16], index: 5, kind: output, shape index: {}]  }
   0x1   :  { %s1634_s20 = smov 0  }
   0x2 LB: > { %s27_s21 = sadd.s32 1, %s1593_s19  ;;  %p1398_p0 = scmp.ge.s32.totalorder %s1597_s20, 1  ;;  %s1597_s20 = sphi %s1634_s20, %s15_s20   ;;  %s1593_s19 = sphi %s1632_s19, %s1990_s19   ;;  %s1589_s18 = sphi %s1630_s18, %s1989_s18  }
   0x3   : > { %p29_p1 = scmp.ge.s32.totalorder %s27_s21, 2  ;;  %p260_p2 = scmp.lt.s32.totalorder %s1597_s20, 3 }
   0x5   : > { %s1992_s21 = smov (%p29_p1, %s27_s21), 0  ;;  %p261_p3 = pnand %p1398_p0, %p260_p2 }
   0x6   : > { %v1518_v0 = vld [vmem:[%s1984_s1] sm:$0xff] (!%p261_p3)   ;;  %v1599_v1 = vmov (!%p261_p3), 0   ;;  %p325_p4 = scmp.lt.s32.totalorder (!%p261_p3), %s1589_s18, 1  ;;  %v1519_v2 = vld [vmem:[%s1984_s1 + $0x8] sm:$0xff] (!%p261_p3)   ;;  %v1520_v3 = vld [vmem:[%s1984_s1 + $0x10] sm:$0xff] (!%p261_p3)   ;;  %vm624_vm0 = vcmask (!%p261_p3), 130048  }
   0x7   : > { %264 = sbr.rel (%p261_p3) target bundleno = 320 (0x140), region = 40  ;;  %673 = vmatprep.subr.bf16.mxu0 (!%p261_p3), %v1599_v1  ;;  %1473 = vmatprep.subr.bf16.mxu1 (!%p261_p3), %v1599_v1  ;;  %v1521_v4 = vld [vmem:[%s1984_s1 + $0x18] sm:$0xff] (!%p261_p3)   ;;  %v1522_v7 = vld [vmem:[%s1984_s1 + $0x20] sm:$0xff] (!%p261_p3)   ;;  %v1523_v10 = vld [vmem:[%s1984_s1 + $0x28] sm:$0xff] (!%p261_p3)  }
   0x8   : > { %674 = vmatpush1.bf16.msra.mxu0 (!%p261_p3), %v1518_v0  ;;  %1482 = vmatpush1.bf16.msra.mxu1 (!%p261_p3), %v1518_v0  ;;  %v1524_v13 = vld [vmem:[%s1984_s1 + $0x30] sm:$0xff] (!%p261_p3)   ;;  %v1525_v16 = vld [vmem:[%s1984_s1 + $0x38] sm:$0xff] (!%p261_p3)   ;;  %v1526_v19 = vld [vmem:[%s1984_s1 + $0x40] sm:$0xff] (!%p261_p3)  }
   0x9   : > { %675 = vmatprep.subr.bf16.mxu0 (!%p261_p3), %v1599_v1  ;;  %1474 = vmatprep.subr.bf16.mxu1 (!%p261_p3), %v1599_v1 }
   0xa   : > { %1517 = vset.pattern.permute.xlu1 (!%p261_p3), %v1599_v1  ;;  %1516 = vset.pattern.permute.xlu0 (!%p261_p3), %v1599_v1 }
   0xc   : > { %676 = vmatpush1.bf16.msra.mxu0 (!%p261_p3), %v1519_v2  ;;  %1483 = vmatpush1.bf16.msra.mxu1 (!%p261_p3), %v1519_v2 }
   0xd   : > { %677 = vmatprep.subr.bf16.mxu0 (!%p261_p3), %v1599_v1  ;;  %1475 = vmatprep.subr.bf16.mxu1 (!%p261_p3), %v1599_v1 }
   0xe   : > { %s1994_s18 = smov (!%p325_p4, %s1589_s18), 1 }
   0xf   : > { %s1660_s26 = sshll.u32 %s1994_s18, 8 }
  0x10   : > { %s1671_s6 = scalar_lea.vmem %s1983_s0, %s1660_s26  ;;  %678 = vmatpush1.bf16.msra.mxu0 %v1520_v3  ;;  %1484 = vmatpush1.bf16.msra.mxu1 %v1520_v3  ;;  %s1689_s13 = scalar_lea.vmem %s1987_s4, %s1660_s26 }
  0x11   : > { %v1529_v5 = vld [vmem:[%s1671_s6 + $0x4] ss:$8 sps:$4 sm:$0xff]   ;;  %679 = vmatprep.subr.bf16.mxu0 %v1599_v1  ;;  %1476 = vmatprep.subr.bf16.mxu1 %v1599_v1  ;;  %v900_v8 = vld [vmem:[%s1689_s13 + $0x10] sm:$0xff]  ;;  %v901_v11 = vld [vmem:[%s1689_s13 + $0x18] sm:$0xff]  ;;  %s1817_s28 = scalar_lea.vmem %s1986_s3, %s1660_s26  ;;  %s1841_s9 = scalar_lea.vmem %s1988_s5, %s1660_s26 }
  0x12   : > { %v1532_v6 = vld [vmem:[%s1671_s6 + $0x84] ss:$8 sps:$4 sm:$0xff]   ;;  %1450 = vmatprep.mubr.msk.bf16.mxu0 %vm624_vm0, %v1529_v5  ;;  %942 = vperm.xlu1 %1517, %v900_v8   ;;  %v905_v17 = vld [vmem:[%s1689_s13 + $0x38] sm:$0xff]  ;;  %v904_v18 = vld [vmem:[%s1689_s13 + $0x30] sm:$0xff] }
  0x13   : > { %1458 = vmatprep.mubr.msk.bf16.mxu1 %vm624_vm0, %v1532_v6  ;;  %v898_v9 = vld [vmem:[%s1689_s13] sm:$0xff]  ;;  %v899_v12 = vld [vmem:[%s1689_s13 + $0x8] sm:$0xff]  ;;  %v1533_v22 = vld [vmem:[%s1671_s6 + $0x14] ss:$8 sps:$4 sm:$0xff]  }
  0x14   : > { %680 = vmatpush1.bf16.msra.mxu0 %v1521_v4  ;;  %1485 = vmatpush1.bf16.msra.mxu1 %v1521_v4  ;;  %v903_v14 = vld [vmem:[%s1689_s13 + $0x28] sm:$0xff]  ;;  %v902_v15 = vld [vmem:[%s1689_s13 + $0x20] sm:$0xff]  ;;  %v1535_v25 = vld [vmem:[%s1671_s6 + $0x94] ss:$8 sps:$4 sm:$0xff]  }
  0x15   : > { %681 = vmatprep.subr.bf16.mxu0 %v1599_v1  ;;  %1477 = vmatprep.subr.bf16.mxu1 %v1599_v1  ;;  %v1527_v20 = vld [vmem:[%s1671_s6] ss:$8 sps:$4 sm:$0xff]   ;;  %v909_v26 = vld [vmem:[%s1689_s13 + $0x58] sm:$0xff]  ;;  %v908_v27 = vld [vmem:[%s1689_s13 + $0x50] sm:$0xff] }
  0x16   : > { %932 = vperm.xlu0 %1516, %v898_v9   ;;  %947 = vperm.xlu1 %1517, %v901_v11   ;;  %v1530_v21 = vld [vmem:[%s1671_s6 + $0x80] ss:$8 sps:$4 sm:$0xff]   ;;  %v1537_v28 = vld [vmem:[%s1671_s6 + $0x10] ss:$8 sps:$4 sm:$0xff]   ;;  %v1539_v32 = vld [vmem:[%s1671_s6 + $0x24] ss:$8 sps:$4 sm:$0xff]  }
  0x17   : > { %v907_v23 = vld [vmem:[%s1689_s13 + $0x48] sm:$0xff]  ;;  %v906_v24 = vld [vmem:[%s1689_s13 + $0x40] sm:$0xff]  ;;  %v1538_v29 = vld [vmem:[%s1671_s6 + $0x90] ss:$8 sps:$4 sm:$0xff]  }
  0x18   : > { %682 = vmatpush1.bf16.msra.mxu0 %v1522_v7  ;;  %1486 = vmatpush1.bf16.msra.mxu1 %v1522_v7  ;;  %v911_v30 = vld [vmem:[%s1689_s13 + $0x68] sm:$0xff]  ;;  %v910_v31 = vld [vmem:[%s1689_s13 + $0x60] sm:$0xff]  ;;  %v913_v34 = vld [vmem:[%s1689_s13 + $0x78] sm:$0xff] }
  0x19   : > { %683 = vmatprep.subr.bf16.mxu0 %v1599_v1  ;;  %1478 = vmatprep.subr.bf16.mxu1 %v1599_v1  ;;  %v1541_v33 = vld [vmem:[%s1671_s6 + $0xa4] ss:$8 sps:$4 sm:$0xff]   ;;  %v912_v35 = vld [vmem:[%s1689_s13 + $0x70] sm:$0xff]  ;;  %v1543_v36 = vld [vmem:[%s1671_s6 + $0x20] ss:$8 sps:$4 sm:$0xff]  }
  0x1a   : > { %937 = vperm.xlu0 %1516, %v899_v12   ;;  %957 = vperm.xlu1 %1517, %v903_v14   ;;  %v1544_v37 = vld [vmem:[%s1671_s6 + $0xa0] ss:$8 sps:$4 sm:$0xff]   ;;  %v1545_v40 = vld [vmem:[%s1671_s6 + $0x34] ss:$8 sps:$4 sm:$0xff]   ;;  %v1549_v44 = vld [vmem:[%s1671_s6 + $0x30] ss:$8 sps:$4 sm:$0xff]  }
  0x1b   : > { %v915_v38 = vld [vmem:[%s1689_s13 + $0x88] sm:$0xff]  ;;  %v914_v39 = vld [vmem:[%s1689_s13 + $0x80] sm:$0xff]  ;;  %v1547_v41 = vld [vmem:[%s1671_s6 + $0xb4] ss:$8 sps:$4 sm:$0xff]  }
  0x1c   : > { %684 = vmatpush1.bf16.msra.mxu0 %v1523_v10  ;;  %1487 = vmatpush1.bf16.msra.mxu1 %v1523_v10  ;;  %v917_v42 = vld [vmem:[%s1689_s13 + $0x98] sm:$0xff]  ;;  %v916_v43 = vld [vmem:[%s1689_s13 + $0x90] sm:$0xff]  ;;  %v919_v46 = vld [vmem:[%s1689_s13 + $0xa8] sm:$0xff] }
  0x1d   : > { %685 = vmatprep.subr.bf16.mxu0 %v1599_v1  ;;  %1479 = vmatprep.subr.bf16.mxu1 %v1599_v1  ;;  %v1550_v45 = vld [vmem:[%s1671_s6 + $0xb0] ss:$8 sps:$4 sm:$0xff]   ;;  %v918_v47 = vld [vmem:[%s1689_s13 + $0xa0] sm:$0xff]  ;;  %v923_v54 = vld [vmem:[%s1689_s13 + $0xc8] sm:$0xff] }
  0x1e   : > { %952 = vperm.xlu0 %1516, %v902_v15   ;;  %967 = vperm.xlu1 %1517, %v905_v17   ;;  %v1551_v48 = vld [vmem:[%s1671_s6 + $0x44] ss:$8 sps:$4 sm:$0xff]   ;;  %v921_v50 = vld [vmem:[%s1689_s13 + $0xb8] sm:$0xff]  ;;  %v920_v51 = vld [vmem:[%s1689_s13 + $0xb0] sm:$0xff] }
  0x1f   : > { %v1553_v49 = vld [vmem:[%s1671_s6 + $0xc4] ss:$8 sps:$4 sm:$0xff]   ;;  %v1555_v52 = vld [vmem:[%s1671_s6 + $0x40] ss:$8 sps:$4 sm:$0xff]   ;;  %v1557_v56 = vld [vmem:[%s1671_s6 + $0x54] ss:$8 sps:$4 sm:$0xff]  }
  0x20   : > { %686 = vmatpush1.bf16.msra.mxu0 %v1524_v13  ;;  %1488 = vmatpush1.bf16.msra.mxu1 %v1524_v13  ;;  %v1556_v53 = vld [vmem:[%s1671_s6 + $0xc0] ss:$8 sps:$4 sm:$0xff]   ;;  %v1559_v57 = vld [vmem:[%s1671_s6 + $0xd4] ss:$8 sps:$4 sm:$0xff]   ;;  %v1561_v60 = vld [vmem:[%s1671_s6 + $0x50] ss:$8 sps:$4 sm:$0xff]  }
  0x21   : > { %687 = vmatprep.subr.bf16.mxu0 %v1599_v1  ;;  %1480 = vmatprep.subr.bf16.mxu1 %v1599_v1  ;;  %v922_v55 = vld [vmem:[%s1689_s13 + $0xc0] sm:$0xff]  ;;  %v925_v58 = vld [vmem:[%s1689_s13 + $0xd8] sm:$0xff]  ;;  %v924_v59 = vld [vmem:[%s1689_s13 + $0xd0] sm:$0xff] }
  0x22   : > { %962 = vperm.xlu0 %1516, %v904_v18   ;;  %977 = vperm.xlu1 %1517, %v907_v23   ;;  %v1562_v61 = vld [vmem:[%s1671_s6 + $0xd0] ss:$8 sps:$4 sm:$0xff]   ;;  %v927_v62 = vld [vmem:[%s1689_s13 + $0xe8] sm:$0xff]  ;;  %v926_v63 = vld [vmem:[%s1689_s13 + $0xe0] sm:$0xff] }
  0x23   : > { %v1563_v0 = vld [vmem:[%s1671_s6 + $0x64] ss:$8 sps:$4 sm:$0xff]   ;;  %v929_v2 = vld [vmem:[%s1689_s13 + $0xf8] sm:$0xff]  ;;  %v928_v3 = vld [vmem:[%s1689_s13 + $0xf0] sm:$0xff] }
  0x24   : > { %688 = vmatpush1.bf16.msra.mxu0 %v1525_v16  ;;  %1489 = vmatpush1.bf16.msra.mxu1 %v1525_v16  ;;  %v1567_v4 = vld [vmem:[%s1671_s6 + $0x60] ss:$8 sps:$4 sm:$0xff]   ;;  %v1569_v6 = vld [vmem:[%s1671_s6 + $0x74] ss:$8 sps:$4 sm:$0xff]   ;;  %v1573_v8 = vld [vmem:[%s1671_s6 + $0x70] ss:$8 sps:$4 sm:$0xff]  }
  0x25   : > { %689 = vmatprep.subr.bf16.mxu0 %v1599_v1  ;;  %1481 = vmatprep.subr.bf16.mxu1 %v1599_v1  ;;  %v1565_v1 = vld [vmem:[%s1671_s6 + $0xe4] ss:$8 sps:$4 sm:$0xff]   ;;  %v1568_v5 = vld [vmem:[%s1671_s6 + $0xe0] ss:$8 sps:$4 sm:$0xff]   ;;  %v1571_v7 = vld [vmem:[%s1671_s6 + $0xf4] ss:$8 sps:$4 sm:$0xff]  }
  0x26   : > { %972 = vperm.xlu0 %1516, %v906_v24   ;;  %987 = vperm.xlu1 %1517, %v909_v26   ;;  %v1574_v9 = vld [vmem:[%s1671_s6 + $0xf0] ss:$8 sps:$4 sm:$0xff]   ;;  %v866_v26 = vld [vmem:[%s1817_s28] sm:$0xff]  ;;  %s1827_s6 = scalar_lea.vmem %s1985_s2, %s1660_s26 }
  0x28   : > { %690 = vmatpush1.bf16.msra.mxu0 %v1526_v19  ;;  %1490 = vmatpush1.bf16.msra.mxu1 %v1526_v19 }
  0x2a   : > { %982 = vperm.xlu0 %1516, %v908_v27   ;;  %997 = vperm.xlu1 %1517, %v911_v30   ;;  %v882_v27 = vld [vmem:[%s1817_s28 + $0x80] sm:$0xff] }
  0x2b   : > { %706 = vmatmul.mubr.bf16.vlgmr.msra.gmra.mrb[0].mxu0 %v1527_v20  ;;  %770 = vmatmul.mubr.bf16.vlgmr.msra.gmra.mrb[0].mxu1 %v1530_v21 }
  0x2c   : > { %1451 = vmatprep.mubr.msk.bf16.mxu0 %vm624_vm0, %v1533_v22  ;;  %1459 = vmatprep.mubr.msk.bf16.mxu1 %vm624_vm0, %v1535_v25 }
  0x2e   : > { %992 = vperm.xlu0 %1516, %v910_v31   ;;  %1007 = vperm.xlu1 %1517, %v913_v34  }
  0x32   : > { %1002 = vperm.xlu0 %1516, %v912_v35   ;;  %1017 = vperm.xlu1 %1517, %v915_v38   ;;  %v834_v35 = vld [vmem:[%s1827_s6] sm:$0xff] }
  0x33   : > { %714 = vmatmul.mubr.bf16.gmra.mrb[4].mxu0 %v1537_v28  ;;  %778 = vmatmul.mubr.bf16.gmra.mrb[4].mxu1 %v1538_v29  ;;  %v867_v28 = vld [vmem:[%s1817_s28 + $0x8] sm:$0xff] }
  0x34   : > { %1452 = vmatprep.mubr.msk.bf16.mxu0 %vm624_vm0, %v1539_v32  ;;  %1460 = vmatprep.mubr.msk.bf16.mxu1 %vm624_vm0, %v1541_v33  ;;  %v883_v29 = vld [vmem:[%s1817_s28 + $0x88] sm:$0xff] }
  0x36   : > { %1012 = vperm.xlu0 %1516, %v914_v39   ;;  %1027 = vperm.xlu1 %1517, %v917_v42  }
  0x3a   : > { %1022 = vperm.xlu0 %1516, %v916_v43   ;;  %1037 = vperm.xlu1 %1517, %v919_v46  }
  0x3b   : > { %722 = vmatmul.mubr.bf16.gmra.mrb[8].mxu0 %v1543_v36  ;;  %786 = vmatmul.mubr.bf16.gmra.mrb[8].mxu1 %v1544_v37  ;;  %v850_v37 = vld [vmem:[%s1827_s6 + $0x80] sm:$0xff] }
  0x3c   : > { %1453 = vmatprep.mubr.msk.bf16.mxu0 %vm624_vm0, %v1545_v40  ;;  %1461 = vmatprep.mubr.msk.bf16.mxu1 %vm624_vm0, %v1547_v41 }
  0x3e   : > { %1032 = vperm.xlu0 %1516, %v918_v47   ;;  %1047 = vperm.xlu1 %1517, %v921_v50   ;;  %v851_v47 = vld [vmem:[%s1827_s6 + $0x88] sm:$0xff] }
  0x42   : > { %1042 = vperm.xlu0 %1516, %v920_v51   ;;  %1057 = vperm.xlu1 %1517, %v923_v54   ;;  %v868_v54 = vld [vmem:[%s1817_s28 + $0x10] sm:$0xff] }
  0x43   : > { %730 = vmatmul.mubr.bf16.gmra.mrb[12].mxu0 %v1549_v44  ;;  %794 = vmatmul.mubr.bf16.gmra.mrb[12].mxu1 %v1550_v45  ;;  %v835_v45 = vld [vmem:[%s1827_s6 + $0x8] sm:$0xff] }
  0x44   : > { %1454 = vmatprep.mubr.msk.bf16.mxu0 %vm624_vm0, %v1551_v48  ;;  %1462 = vmatprep.mubr.msk.bf16.mxu1 %vm624_vm0, %v1553_v49 }
  0x46   : > { %1052 = vperm.xlu0 %1516, %v922_v55   ;;  %1067 = vperm.xlu1 %1517, %v925_v58   ;;  %v884_v55 = vld [vmem:[%s1817_s28 + $0x90] sm:$0xff] }
  0x4a   : > { %1062 = vperm.xlu0 %1516, %v924_v59   ;;  %1077 = vperm.xlu1 %1517, %v927_v62  }
  0x4b   : > { %738 = vmatmul.mubr.bf16.gmra.mrb[16].mxu0 %v1555_v52  ;;  %802 = vmatmul.mubr.bf16.gmra.mrb[16].mxu1 %v1556_v53 }
  0x4c   : > { %1455 = vmatprep.mubr.msk.bf16.mxu0 %vm624_vm0, %v1557_v56  ;;  %1463 = vmatprep.mubr.msk.bf16.mxu1 %vm624_vm0, %v1559_v57 }
  0x4e   : > { %1072 = vperm.xlu0 %1516, %v926_v63   ;;  %1087 = vperm.xlu1 %1517, %v929_v2  }
  0x52   : > { %1082 = vperm.xlu0 %1516, %v928_v3  }
  0x53   : > { %746 = vmatmul.mubr.bf16.gmra.mrb[20].mxu0 %v1561_v60  ;;  %810 = vmatmul.mubr.bf16.gmra.mrb[20].mxu1 %v1562_v61  ;;  %v869_v60 = vld [vmem:[%s1817_s28 + $0x18] sm:$0xff] }
  0x54   : > { %1456 = vmatprep.mubr.msk.bf16.mxu0 %vm624_vm0, %v1563_v0  ;;  %1464 = vmatprep.mubr.msk.bf16.mxu1 %vm624_vm0, %v1565_v1  ;;  %v885_v61 = vld [vmem:[%s1817_s28 + $0x98] sm:$0xff] }
  0x5b   : > { %754 = vmatmul.mubr.bf16.gmra.mrb[24].mxu0 %v1567_v4  ;;  %818 = vmatmul.mubr.bf16.gmra.mrb[24].mxu1 %v1568_v5  ;;  %v836_v5 = vld [vmem:[%s1827_s6 + $0x10] sm:$0xff] }
  0x5c   : > { %1457 = vmatprep.mubr.msk.bf16.mxu0 %vm624_vm0, %v1569_v6  ;;  %1465 = vmatprep.mubr.msk.bf16.mxu1 %vm624_vm0, %v1571_v7  ;;  %v852_v7 = vld [vmem:[%s1827_s6 + $0x90] sm:$0xff] }
  0x63   : > { %762 = vmatmul.mubr.bf16.gmra.mrb[28].mxu0 %v1573_v8  ;;  %826 = vmatmul.mubr.bf16.gmra.mrb[28].mxu1 %v1574_v9 }
  0x91   : > { %v943_v11 = vpop.permute.xlu1 %942 }
  0x92   : > { %v1092_v63 = vmul.f32 %v943_v11, %v868_v54 }
  0x95   : > { %v933_v10 = vpop.permute.xlu0 %932  ;;  %v1789_v13 = vpop.permute.xlu1 %947 }
  0x96   : > { %v1090_v31 = vmul.f32 %v933_v10, %v866_v26  ;;  %v1093_v8 = vmul.f32 %v1789_v13, %v869_v60  ;;  %v839_v60 = vld [vmem:[%s1827_s6 + $0x28] sm:$0xff] }
  0x99   : > { %v938_v12 = vpop.permute.xlu0 %937  ;;  %v1793_v15 = vpop.permute.xlu1 %957 }
  0x9a   : > { %v1091_v38 = vmul.f32 %v938_v12, %v867_v28  ;;  %v837_v28 = vld [vmem:[%s1827_s6 + $0x18] sm:$0xff] }
  0x9d   : > { %v1791_v14 = vpop.permute.xlu0 %952  ;;  %v1797_v17 = vpop.permute.xlu1 %967 }
  0xa1   : > { %v1795_v16 = vpop.permute.xlu0 %962  ;;  %v1801_v19 = vpop.permute.xlu1 %977 }
  0xa5   : > { %v1799_v18 = vpop.permute.xlu0 %972  ;;  %v1805_v21 = vpop.permute.xlu1 %987 }
  0xa9   : > { %v1803_v20 = vpop.permute.xlu0 %982  ;;  %v1809_v23 = vpop.permute.xlu1 %997 }
  0xad   : > { %v1807_v22 = vpop.permute.xlu0 %992  ;;  %v1819_v25 = vpop.permute.xlu1 %1007 }
  0xb1   : > { %v1811_v24 = vpop.permute.xlu0 %1002  ;;  %v1018_v32 = vpop.permute.xlu1 %1017 }
  0xb2   : > { %v1107_v39 = vmul.f32 %v1018_v32, %v883_v29 }
  0xb5   : > { %v1013_v30 = vpop.permute.xlu0 %1012  ;;  %v1028_v0 = vpop.permute.xlu1 %1027 }
  0xb6   : > { %v1106_v33 = vmul.f32 %v1013_v30, %v882_v27  ;;  %v1109_v9 = vmul.f32 %v1028_v0, %v885_v61  ;;  %v853_v30 = vld [vmem:[%s1827_s6 + $0x98] sm:$0xff] }
  0xb9   : > { %v1023_v62 = vpop.permute.xlu0 %1022 }
  0xba   : > { %v1108_v1 = vmul.f32 %v1023_v62, %v884_v55  ;;  %v855_v62 = vld [vmem:[%s1827_s6 + $0xa8] sm:$0xff] }
  0xfe   : > { %v707_v34 = vpop.f32.mrb[0].mxu0  ;;  %v771_v36 = vpop.f32.mrb[0].mxu1 }
  0xff   : > { %v1122_v40 = vmul.f32 %v1090_v31, %v707_v34  ;;  %v1138_v41 = vmul.f32 %v1106_v33, %v771_v36  ;;  %v709_v42 = vpop.f32.mrb[1].mxu0  ;;  %v773_v43 = vpop.f32.mrb[1].mxu1  ;;  %v870_v36 = vld [vmem:[%s1817_s28 + $0x20] sm:$0xff] }
 0x100   : > { %v710_v44 = vpop.f32.mrb[2].mxu0  ;;  %v774_v46 = vpop.f32.mrb[2].mxu1  ;;  %v871_v42 = vld [vmem:[%s1817_s28 + $0x28] sm:$0xff] }
 0x101   : > { %v1154_v48 = vadd.f32 %v1122_v40, %v834_v35  ;;  %v1170_v49 = vadd.f32 %v1138_v41, %v850_v37  ;;  %v1123_v50 = vmul.f32 %v1091_v38, %v710_v44  ;;  %v1139_v51 = vmul.f32 %v1107_v39, %v774_v46  ;;  %v712_v52 = vpop.f32.mrb[3].mxu0  ;;  %v776_v53 = vpop.f32.mrb[3].mxu1  ;;  %v886_v37 = vld [vmem:[%s1817_s28 + $0xa0] sm:$0xff]  ;;  %v887_v43 = vld [vmem:[%s1817_s28 + $0xa8] sm:$0xff] }
 0x102   : > { %v1033_v44 = vpop.permute.xlu0 %1032  ;;  %v1038_v46 = vpop.permute.xlu1 %1037  ;;  %v854_v53 = vld [vmem:[%s1827_s6 + $0xa0] sm:$0xff]  ;;  %v1095_v54 = vmul.f32 %v1793_v15, %v871_v42  ;;  %v857_v42 = vld [vmem:[%s1827_s6 + $0xb8] sm:$0xff] }
 0x103   : > { %v1186_v56 = vmax.f32 %v1154_v48, 0.0  ;;  %v1202_v57 = vmax.f32 %v1170_v49, 0.0  ;;  %v1155_v58 = vadd.f32 %v1123_v50, %v835_v45  ;;  %v1171_v59 = vadd.f32 %v1139_v51, %v851_v47  ;;  %v838_v51 = vld [vmem:[%s1827_s6 + $0x20] sm:$0xff] }
 0x104   : > { %v1094_v45 = vmul.f32 %v1791_v14, %v870_v36  ;;  %v1110_v47 = vmul.f32 %v1033_v44, %v886_v37  ;;  %v1111_v55 = vmul.f32 %v1038_v46, %v887_v43 }
 0x105   : > { %1218 = vst.msk [vmem:[%s1841_s9] sm:$0xff] %vm624_vm0, %v1186_v56  ;;  %1234 = vst.msk [vmem:[%s1841_s9 + $0x80] sm:$0xff] %vm624_vm0, %v1202_v57  ;;  %v1187_v2 = vmax.f32 %v1155_v58, 0.0  ;;  %v1203_v3 = vmax.f32 %v1171_v59, 0.0 }
 0x106   : > { %v715_v4 = vpop.f32.mrb[4].mxu0  ;;  %v779_v6 = vpop.f32.mrb[4].mxu1 }
 0x107   : > { %1219 = vst.msk [vmem:[%s1841_s9 + $0x8] sm:$0xff] %vm624_vm0, %v1187_v2  ;;  %1235 = vst.msk [vmem:[%s1841_s9 + $0x88] sm:$0xff] %vm624_vm0, %v1203_v3  ;;  %v1124_v10 = vmul.f32 %v1092_v63, %v715_v4  ;;  %v1140_v11 = vmul.f32 %v1108_v1, %v779_v6  ;;  %v717_v12 = vpop.f32.mrb[5].mxu0  ;;  %v781_v26 = vpop.f32.mrb[5].mxu1  ;;  %v872_v4 = vld [vmem:[%s1817_s28 + $0x30] sm:$0xff] }
 0x108   : > { %v718_v27 = vpop.f32.mrb[6].mxu0  ;;  %v782_v29 = vpop.f32.mrb[6].mxu1  ;;  %v1096_v26 = vmul.f32 %v1795_v16, %v872_v4 }
 0x109   : > { %v1156_v31 = vadd.f32 %v1124_v10, %v836_v5  ;;  %v1172_v32 = vadd.f32 %v1140_v11, %v852_v7  ;;  %v1125_v13 = vmul.f32 %v1093_v8, %v718_v27  ;;  %v1141_v33 = vmul.f32 %v1109_v9, %v782_v29  ;;  %v720_v34 = vpop.f32.mrb[7].mxu0  ;;  %v784_v35 = vpop.f32.mrb[7].mxu1  ;;  %v888_v5 = vld [vmem:[%s1817_s28 + $0xb0] sm:$0xff]  ;;  %v873_v10 = vld [vmem:[%s1817_s28 + $0x38] sm:$0xff] }
 0x10a   : > { %v889_v11 = vld [vmem:[%s1817_s28 + $0xb8] sm:$0xff]  ;;  %v1043_v12 = vpop.permute.xlu0 %1042  ;;  %v1048_v27 = vpop.permute.xlu1 %1047  ;;  %v1097_v34 = vmul.f32 %v1797_v17, %v873_v10 }
 0x10b   : > { %v1188_v38 = vmax.f32 %v1156_v31, 0.0  ;;  %v1204_v39 = vmax.f32 %v1172_v32, 0.0  ;;  %v1157_v40 = vadd.f32 %v1125_v13, %v837_v28  ;;  %v1173_v41 = vadd.f32 %v1141_v33, %v853_v30  ;;  %v840_v32 = vld [vmem:[%s1827_s6 + $0x30] sm:$0xff] }
 0x10c   : > { %v1112_v28 = vmul.f32 %v1043_v12, %v888_v5  ;;  %v856_v33 = vld [vmem:[%s1827_s6 + $0xb0] sm:$0xff]  ;;  %v1113_v35 = vmul.f32 %v1048_v27, %v889_v11 }
 0x10d   : > { %1220 = vst.msk [vmem:[%s1841_s9 + $0x10] sm:$0xff] %vm624_vm0, %v1188_v38  ;;  %1236 = vst.msk [vmem:[%s1841_s9 + $0x90] sm:$0xff] %vm624_vm0, %v1204_v39  ;;  %v1189_v48 = vmax.f32 %v1157_v40, 0.0  ;;  %v1205_v49 = vmax.f32 %v1173_v41, 0.0  ;;  %v841_v40 = vld [vmem:[%s1827_s6 + $0x38] sm:$0xff]  ;;  %v876_v27 = vld [vmem:[%s1817_s28 + $0x50] sm:$0xff] }
 0x10e   : > { %v723_v50 = vpop.f32.mrb[8].mxu0  ;;  %v787_v52 = vpop.f32.mrb[8].mxu1 }
 0x10f   : > { %1221 = vst.msk [vmem:[%s1841_s9 + $0x18] sm:$0xff] %vm624_vm0, %v1189_v48  ;;  %1237 = vst.msk [vmem:[%s1841_s9 + $0x98] sm:$0xff] %vm624_vm0, %v1205_v49  ;;  %v1126_v14 = vmul.f32 %v1094_v45, %v723_v50  ;;  %v1142_v56 = vmul.f32 %v1110_v47, %v787_v52  ;;  %v725_v57 = vpop.f32.mrb[9].mxu0  ;;  %v789_v58 = vpop.f32.mrb[9].mxu1  ;;  %v874_v48 = vld [vmem:[%s1817_s28 + $0x40] sm:$0xff] }
 0x110   : > { %v726_v59 = vpop.f32.mrb[10].mxu0  ;;  %v790_v61 = vpop.f32.mrb[10].mxu1  ;;  %v890_v49 = vld [vmem:[%s1817_s28 + $0xc0] sm:$0xff] }
 0x111   : > { %v1158_v63 = vadd.f32 %v1126_v14, %v838_v51  ;;  %v1174_v0 = vadd.f32 %v1142_v56, %v854_v53  ;;  %v1127_v15 = vmul.f32 %v1095_v54, %v726_v59  ;;  %v1143_v1 = vmul.f32 %v1111_v55, %v790_v61  ;;  %v728_v2 = vpop.f32.mrb[11].mxu0  ;;  %v792_v3 = vpop.f32.mrb[11].mxu1  ;;  %v875_v54 = vld [vmem:[%s1817_s28 + $0x48] sm:$0xff] }
 0x112   : > { %v891_v55 = vld [vmem:[%s1817_s28 + $0xc8] sm:$0xff]  ;;  %v1053_v14 = vpop.permute.xlu0 %1052  ;;  %v1098_v56 = vmul.f32 %v1799_v18, %v874_v48  ;;  %v1058_v57 = vpop.permute.xlu1 %1057  ;;  %v845_v48 = vld [vmem:[%s1827_s6 + $0x58] sm:$0xff] }
 0x113   : > { %v1190_v6 = vmax.f32 %v1158_v63, 0.0  ;;  %v1206_v7 = vmax.f32 %v1174_v0, 0.0  ;;  %v1159_v8 = vadd.f32 %v1127_v15, %v839_v60  ;;  %v1175_v9 = vadd.f32 %v1143_v1, %v855_v62  ;;  %v842_v62 = vld [vmem:[%s1827_s6 + $0x40] sm:$0xff] }
 0x114   : > { %v1114_v58 = vmul.f32 %v1053_v14, %v890_v49  ;;  %v858_v0 = vld [vmem:[%s1827_s6 + $0xc0] sm:$0xff]  ;;  %v1099_v15 = vmul.f32 %v1801_v19, %v875_v54  ;;  %v1115_v1 = vmul.f32 %v1058_v57, %v891_v55 }
 0x115   : > { %1222 = vst.msk [vmem:[%s1841_s9 + $0x20] sm:$0xff] %vm624_vm0, %v1190_v6  ;;  %1238 = vst.msk [vmem:[%s1841_s9 + $0xa0] sm:$0xff] %vm624_vm0, %v1206_v7  ;;  %v1191_v29 = vmax.f32 %v1159_v8, 0.0  ;;  %v1207_v30 = vmax.f32 %v1175_v9, 0.0  ;;  %v843_v6 = vld [vmem:[%s1827_s6 + $0x48] sm:$0xff]  ;;  %v878_v14 = vld [vmem:[%s1817_s28 + $0x60] sm:$0xff] }
 0x116   : > { %v731_v31 = vpop.f32.mrb[12].mxu0  ;;  %v795_v13 = vpop.f32.mrb[12].mxu1  ;;  %v859_v8 = vld [vmem:[%s1827_s6 + $0xc8] sm:$0xff] }
 0x117   : > { %1223 = vst.msk [vmem:[%s1841_s9 + $0x28] sm:$0xff] %vm624_vm0, %v1191_v29  ;;  %1239 = vst.msk [vmem:[%s1841_s9 + $0xa8] sm:$0xff] %vm624_vm0, %v1207_v30  ;;  %v1128_v16 = vmul.f32 %v1096_v26, %v731_v31  ;;  %v1144_v36 = vmul.f32 %v1112_v28, %v795_v13  ;;  %v733_v37 = vpop.f32.mrb[13].mxu0  ;;  %v797_v38 = vpop.f32.mrb[13].mxu1  ;;  %v892_v28 = vld [vmem:[%s1817_s28 + $0xd0] sm:$0xff]  ;;  %v877_v13 = vld [vmem:[%s1817_s28 + $0x58] sm:$0xff] }
 0x118   : > { %v734_v39 = vpop.f32.mrb[14].mxu0  ;;  %v798_v41 = vpop.f32.mrb[14].mxu1 }
 0x119   : > { %v1160_v43 = vadd.f32 %v1128_v16, %v840_v32  ;;  %v1176_v44 = vadd.f32 %v1144_v36, %v856_v33  ;;  %v1129_v17 = vmul.f32 %v1097_v34, %v734_v39  ;;  %v1145_v45 = vmul.f32 %v1113_v35, %v798_v41  ;;  %v736_v46 = vpop.f32.mrb[15].mxu0  ;;  %v800_v47 = vpop.f32.mrb[15].mxu1  ;;  %v893_v33 = vld [vmem:[%s1817_s28 + $0xd8] sm:$0xff] }
 0x11a   : > { %v1063_v34 = vpop.permute.xlu0 %1062  ;;  %v1100_v35 = vmul.f32 %v1803_v20, %v876_v27  ;;  %v1068_v16 = vpop.permute.xlu1 %1067  ;;  %v863_v27 = vld [vmem:[%s1827_s6 + $0xe8] sm:$0xff] }
 0x11b   : > { %v1192_v50 = vmax.f32 %v1160_v43, 0.0  ;;  %v1208_v51 = vmax.f32 %v1176_v44, 0.0  ;;  %v1161_v52 = vadd.f32 %v1129_v17, %v841_v40  ;;  %v1177_v53 = vadd.f32 %v1145_v45, %v857_v42  ;;  %v844_v40 = vld [vmem:[%s1827_s6 + $0x50] sm:$0xff] }
 0x11c   : > { %v1116_v36 = vmul.f32 %v1063_v34, %v892_v28  ;;  %v860_v42 = vld [vmem:[%s1827_s6 + $0xd0] sm:$0xff]  ;;  %v1101_v43 = vmul.f32 %v1805_v21, %v877_v13  ;;  %v1117_v44 = vmul.f32 %v1068_v16, %v893_v33 }
 0x11d   : > { %1224 = vst.msk [vmem:[%s1841_s9 + $0x30] sm:$0xff] %vm624_vm0, %v1192_v50  ;;  %1240 = vst.msk [vmem:[%s1841_s9 + $0xb0] sm:$0xff] %vm624_vm0, %v1208_v51  ;;  %v1193_v59 = vmax.f32 %v1161_v52, 0.0  ;;  %v1209_v60 = vmax.f32 %v1177_v53, 0.0  ;;  %v861_v50 = vld [vmem:[%s1827_s6 + $0xd8] sm:$0xff]  ;;  %v880_v13 = vld [vmem:[%s1817_s28 + $0x70] sm:$0xff] }
 0x11e   : > { %v739_v61 = vpop.f32.mrb[16].mxu0  ;;  %v803_v63 = vpop.f32.mrb[16].mxu1  ;;  %v896_v34 = vld [vmem:[%s1817_s28 + $0xf0] sm:$0xff] }
 0x11f   : > { %1225 = vst.msk [vmem:[%s1841_s9 + $0x38] sm:$0xff] %vm624_vm0, %v1193_v59  ;;  %1241 = vst.msk [vmem:[%s1841_s9 + $0xb8] sm:$0xff] %vm624_vm0, %v1209_v60  ;;  %v1130_v18 = vmul.f32 %v1098_v56, %v739_v61  ;;  %v1146_v2 = vmul.f32 %v1114_v58, %v803_v63  ;;  %v741_v3 = vpop.f32.mrb[17].mxu0  ;;  %v805_v4 = vpop.f32.mrb[17].mxu1  ;;  %v894_v56 = vld [vmem:[%s1817_s28 + $0xe0] sm:$0xff]  ;;  %v879_v61 = vld [vmem:[%s1817_s28 + $0x68] sm:$0xff] }
 0x120   : > { %v742_v5 = vpop.f32.mrb[18].mxu0  ;;  %v806_v7 = vpop.f32.mrb[18].mxu1  ;;  %v846_v4 = vld [vmem:[%s1827_s6 + $0x60] sm:$0xff] }
 0x121   : > { %v1162_v9 = vadd.f32 %v1130_v18, %v842_v62  ;;  %v1178_v10 = vadd.f32 %v1146_v2, %v858_v0  ;;  %v1131_v19 = vmul.f32 %v1099_v15, %v742_v5  ;;  %v1147_v11 = vmul.f32 %v1115_v1, %v806_v7  ;;  %v744_v12 = vpop.f32.mrb[19].mxu0  ;;  %v808_v26 = vpop.f32.mrb[19].mxu1  ;;  %v895_v62 = vld [vmem:[%s1817_s28 + $0xe8] sm:$0xff] }
 0x122   : > { %v1073_v63 = vpop.permute.xlu0 %1072  ;;  %v1102_v0 = vmul.f32 %v1807_v22, %v878_v14  ;;  %v1078_v15 = vpop.permute.xlu1 %1077  ;;  %v1103_v7 = vmul.f32 %v1809_v23, %v879_v61  ;;  %v847_v12 = vld [vmem:[%s1827_s6 + $0x68] sm:$0xff] }
 0x123   : > { %v1194_v29 = vmax.f32 %v1162_v9, 0.0  ;;  %v1210_v30 = vmax.f32 %v1178_v10, 0.0  ;;  %v1163_v31 = vadd.f32 %v1131_v19, %v843_v6  ;;  %v1179_v32 = vadd.f32 %v1147_v11, %v859_v8  ;;  %v862_v6 = vld [vmem:[%s1827_s6 + $0xe0] sm:$0xff] }
 0x124   : > { %v1118_v1 = vmul.f32 %v1073_v63, %v894_v56  ;;  %v1119_v8 = vmul.f32 %v1078_v15, %v895_v62 }
 0x125   : > { %1226 = vst.msk [vmem:[%s1841_s9 + $0x40] sm:$0xff] %vm624_vm0, %v1194_v29  ;;  %1242 = vst.msk [vmem:[%s1841_s9 + $0xc0] sm:$0xff] %vm624_vm0, %v1210_v30  ;;  %v1195_v37 = vmax.f32 %v1163_v31, 0.0  ;;  %v1211_v38 = vmax.f32 %v1179_v32, 0.0 }
 0x126   : > { %v747_v39 = vpop.f32.mrb[20].mxu0  ;;  %v811_v41 = vpop.f32.mrb[20].mxu1 }
 0x127   : > { %1227 = vst.msk [vmem:[%s1841_s9 + $0x48] sm:$0xff] %vm624_vm0, %v1195_v37  ;;  %1243 = vst.msk [vmem:[%s1841_s9 + $0xc8] sm:$0xff] %vm624_vm0, %v1211_v38  ;;  %v1132_v20 = vmul.f32 %v1100_v35, %v747_v39  ;;  %v1148_v17 = vmul.f32 %v1116_v36, %v811_v41  ;;  %v749_v45 = vpop.f32.mrb[21].mxu0  ;;  %v813_v46 = vpop.f32.mrb[21].mxu1  ;;  %v881_v38 = vld [vmem:[%s1817_s28 + $0x78] sm:$0xff]  ;;  %v1104_v41 = vmul.f32 %v1811_v24, %v880_v13 }
 0x128   : > { %v750_v47 = vpop.f32.mrb[22].mxu0  ;;  %v814_v49 = vpop.f32.mrb[22].mxu1  ;;  %v864_v46 = vld [vmem:[%s1827_s6 + $0xf0] sm:$0xff] }
 0x129   : > { %v1164_v51 = vadd.f32 %v1132_v20, %v844_v40  ;;  %v1180_v52 = vadd.f32 %v1148_v17, %v860_v42  ;;  %v1133_v21 = vmul.f32 %v1101_v43, %v750_v47  ;;  %v1149_v53 = vmul.f32 %v1117_v44, %v814_v49  ;;  %v752_v54 = vpop.f32.mrb[23].mxu0  ;;  %v816_v55 = vpop.f32.mrb[23].mxu1  ;;  %v897_v40 = vld [vmem:[%s1817_s28 + $0xf8] sm:$0xff]  ;;  %v848_v17 = vld [vmem:[%s1827_s6 + $0x70] sm:$0xff] }
 0x12a   : > { %v1083_v33 = vpop.permute.xlu0 %1082  ;;  %v1088_v39 = vpop.permute.xlu1 %1087  ;;  %v1105_v47 = vmul.f32 %v1819_v25, %v881_v38  ;;  %v865_v54 = vld [vmem:[%s1827_s6 + $0xf8] sm:$0xff] }
 0x12b   : > { %v1196_v57 = vmax.f32 %v1164_v51, 0.0  ;;  %v1212_v58 = vmax.f32 %v1180_v52, 0.0  ;;  %v1165_v59 = vadd.f32 %v1133_v21, %v845_v48  ;;  %v1181_v60 = vadd.f32 %v1149_v53, %v861_v50  ;;  %v849_v21 = vld [vmem:[%s1827_s6 + $0x78] sm:$0xff] }
 0x12c   : > { %v1120_v42 = vmul.f32 %v1083_v33, %v896_v34  ;;  %v1121_v48 = vmul.f32 %v1088_v39, %v897_v40 }
 0x12d   : > { %1228 = vst.msk [vmem:[%s1841_s9 + $0x50] sm:$0xff] %vm624_vm0, %v1196_v57  ;;  %1244 = vst.msk [vmem:[%s1841_s9 + $0xd0] sm:$0xff] %vm624_vm0, %v1212_v58  ;;  %v1197_v18 = vmax.f32 %v1165_v59, 0.0  ;;  %v1213_v2 = vmax.f32 %v1181_v60, 0.0 }
 0x12e   : > { %v755_v3 = vpop.f32.mrb[24].mxu0  ;;  %v819_v5 = vpop.f32.mrb[24].mxu1 }
 0x12f   : > { %1229 = vst.msk [vmem:[%s1841_s9 + $0x58] sm:$0xff] %vm624_vm0, %v1197_v18  ;;  %1245 = vst.msk [vmem:[%s1841_s9 + $0xd8] sm:$0xff] %vm624_vm0, %v1213_v2  ;;  %v1134_v22 = vmul.f32 %v1102_v0, %v755_v3  ;;  %v1150_v9 = vmul.f32 %v1118_v1, %v819_v5  ;;  %v757_v10 = vpop.f32.mrb[25].mxu0  ;;  %v821_v19 = vpop.f32.mrb[25].mxu1 }
 0x130   : > { %v758_v11 = vpop.f32.mrb[26].mxu0  ;;  %v822_v26 = vpop.f32.mrb[26].mxu1 }
 0x131   : > { %v1166_v28 = vadd.f32 %v1134_v22, %v846_v4  ;;  %v1182_v29 = vadd.f32 %v1150_v9, %v862_v6  ;;  %v1135_v23 = vmul.f32 %v1103_v7, %v758_v11  ;;  %v1151_v30 = vmul.f32 %v1119_v8, %v822_v26  ;;  %v760_v31 = vpop.f32.mrb[27].mxu0  ;;  %v824_v32 = vpop.f32.mrb[27].mxu1 }
 0x133   : > { %v1198_v35 = vmax.f32 %v1166_v28, 0.0  ;;  %v1214_v16 = vmax.f32 %v1182_v29, 0.0  ;;  %v1167_v36 = vadd.f32 %v1135_v23, %v847_v12  ;;  %v1183_v37 = vadd.f32 %v1151_v30, %v863_v27 }
 0x135   : > { %1230 = vst.msk [vmem:[%s1841_s9 + $0x60] sm:$0xff] %vm624_vm0, %v1198_v35  ;;  %1246 = vst.msk [vmem:[%s1841_s9 + $0xe0] sm:$0xff] %vm624_vm0, %v1214_v16  ;;  %v1199_v43 = vmax.f32 %v1167_v36, 0.0  ;;  %v1215_v44 = vmax.f32 %v1183_v37, 0.0 }
 0x136   : > { %v763_v20 = vpop.f32.mrb[28].mxu0  ;;  %v827_v45 = vpop.f32.mrb[28].mxu1 }
 0x137   : > { %1231 = vst.msk [vmem:[%s1841_s9 + $0x68] sm:$0xff] %vm624_vm0, %v1199_v43  ;;  %1247 = vst.msk [vmem:[%s1841_s9 + $0xe8] sm:$0xff] %vm624_vm0, %v1215_v44  ;;  %v1136_v24 = vmul.f32 %v1104_v41, %v763_v20  ;;  %v1152_v49 = vmul.f32 %v1120_v42, %v827_v45  ;;  %v765_v50 = vpop.f32.mrb[29].mxu0  ;;  %v829_v51 = vpop.f32.mrb[29].mxu1 }
 0x138   : > { %v766_v52 = vpop.f32.mrb[30].mxu0  ;;  %v830_v53 = vpop.f32.mrb[30].mxu1 }
 0x139   : > { %v1168_v55 = vadd.f32 %v1136_v24, %v848_v17  ;;  %v1184_v14 = vadd.f32 %v1152_v49, %v864_v46  ;;  %v1137_v25 = vmul.f32 %v1105_v47, %v766_v52  ;;  %v1153_v56 = vmul.f32 %v1121_v48, %v830_v53  ;;  %v768_v57 = vpop.f32.mrb[31].mxu0  ;;  %v832_v58 = vpop.f32.mrb[31].mxu1 }
 0x13b   : > { %v1200_v59 = vmax.f32 %v1168_v55, 0.0  ;;  %v1216_v60 = vmax.f32 %v1184_v14, 0.0  ;;  %v1169_v61 = vadd.f32 %v1137_v25, %v849_v21  ;;  %v1185_v62 = vadd.f32 %v1153_v56, %v865_v54 }
 0x13d   : > { %1232 = vst.msk [vmem:[%s1841_s9 + $0x70] sm:$0xff] %vm624_vm0, %v1200_v59  ;;  %1248 = vst.msk [vmem:[%s1841_s9 + $0xf0] sm:$0xff] %vm624_vm0, %v1216_v60  ;;  %v1201_v63 = vmax.f32 %v1169_v61, 0.0  ;;  %v1217_v0 = vmax.f32 %v1185_v62, 0.0 }
 0x13f   : > { %1233 = vst.msk [vmem:[%s1841_s9 + $0x78] sm:$0xff] %vm624_vm0, %v1201_v63  ;;  %1249 = vst.msk [vmem:[%s1841_s9 + $0xf8] sm:$0xff] %vm624_vm0, %v1217_v0 }
 0x140 PF: > { %s15_s20 = sadd.s32 1, %s1597_s20   ;;  %s1989_s18 = smov %s1593_s19 }
 0x141   : > { %p12_p5 = scmp.ge.s32.totalorder %s15_s20, 4   ;;  %s1990_s19 = smov %s1992_s21 }
 0x143   :  { %14 = sbr.rel (!%p12_p5) target bundleno = 2 (0x2), region = 79 }

// kernel: maf_forward.6
= control target key start
LH: loop header
LB: loop body
LE: loop exit
PB: predicated region body
PF: predicated region fallthrough
CT: control target
= control target key end

     0   :  { %7 = vsyncpa [#allocation4], 0  ;;  %s3038_s9 = smov 0   ;;  %s5353_s0 = inlined_call_operand.vmem [shape: f32[2,16,16,16], index: 0, kind: input, shape index: {}]   ;;  %s5354_s1 = inlined_call_operand.vmem [shape: f32[100], index: 1, kind: input, shape index: {}]   ;;  %s5355_s2 = inlined_call_operand.vmem [shape: f32[2,16,16], index: 2, kind: output, shape index: {}]  }
   0x1 LB: > { %s2832_s10 = sadd.s32 4294967295, %s3013_s9   ;;  %p2834_p0 = scmp.ge.s32.totalorder %s3013_s9, 1  ;;  %s3013_s9 = sphi %s3038_s9, %s13_s9  }
   0x2   : > { %p91_p1 = scmp.lt.s32.totalorder %s3013_s9, 3  ;;  %s104_s13 = sshll.u32 %s5354_s1, 4  ;;  %s105_s13 = int_to_ptr.vmem [resolvable:$true] %s104_s13 }
   0x3   : > { %p2956_p3 = scmp.eq.s32.totalorder %s2832_s10, 0  ;;  %s2988_s15 = scalar_lea.vmem %s105_s13, 16 }
   0x4   : > { %p3049_p2 = pnand %p2834_p0, %p91_p1  ;;  %p2989_p6 = scmp.ne.s32.totalorder %s105_s13, %s2988_s15 }
   0x5   : > { %p2996_p10 = scmp.lt.s32.totalorder %s105_s13, %s105_s13  ;;  %p2997_p11 = scmp.lt.s32.totalorder %s2988_s15, %s2988_s15 }
   0x6   : > { %p2952_p4 = pneg %p3049_p2 }
   0x7   : > { %p2998_p12 = por %p2997_p11, %p2996_p10 }
   0x8   : > { %p2953_p5 = pnand %p2956_p3, %p2952_p4 }
   0xa   : > { %p2990_p7 = pneg %p2953_p5 }
   0xc   : > { %p2991_p8 = pnand %p2990_p7, %p2989_p6 }
   0xe   : > { %p2992_p9 = pneg %p2991_p8 }
  0x10   : > { %p2999_p13 = pnand %p2998_p12, %p2992_p9 }
  0x12   : > { %3002 = shalt.err (!%p2999_p13)
}
  0x13   : > { %s3015_s16 = smov [#allocation3]   ;;  %125 = sbr.rel (%p3049_p2) target bundleno = 739 (0x2e3), region = 28 }
  0x14   : > { %2955 = dma.vmem_to_smem (!%p2953_p5), %s105_s13, 16, %s3015_s16, [#allocation4]  }
  0x1a   : > { %3008 = dma.done.wait (%p2956_p3), [#allocation4], 16  }
  0x1b   : > { %3010 = vsyncadd (%p2956_p3), [#allocation4], 4294967280 }
  0x1c   : > { %131 = sfence }
  0x1d   : > { %p148_p0 = scmp.lt.s32.totalorder %s2832_s10, 1  ;;  %vm5356_vm0 = vcmask 130048   ;;  %vm190_vm1 = vcmask 179200   ;;  %v3016_v50 = vmov 0.0   ;;  %vm193_vm2 = vcmask 177152   ;;  %s3331_s21 = sld [smem:[#allocation3 + $0x1]] }
  0x1e   : > { %191 = vst.msk [vmem:[#allocation2] sm:$0xff] %vm190_vm1, %v3016_v50  ;;  %192 = vst.msk [vmem:[#allocation2 + $0x8] sm:$0xff] %vm190_vm1, %v3016_v50  ;;  %vm339_vm3 = vcmask 154712   ;;  %vm476_vm4 = vcmask 1041409   ;;  %vm478_vm5 = vcmask 1042434   ;;  %vm5357_vm6 = vcmask 1043459  }
  0x1f   : > { %s5395_s10 = smov (!%p148_p0, %s2832_s10), 1  ;;  %195 = vst.msk [vmem:[#allocation2 + $0x18] sm:$0xff] %vm190_vm1, %v3016_v50  ;;  %196 = vst.msk [vmem:[#allocation2 + $0x20] sm:$0xff] %vm190_vm1, %v3016_v50  ;;  %vm482_vm7 = vcmask 1044484   ;;  %vm484_vm8 = vcmask 1045509   ;;  %vm486_vm9 = vcmask 1046534  }
  0x20   : > { %s2946_s17 = sshll.u32 %s5395_s10, 8  ;;  %194 = vst.msk [vmem:[#allocation2 + $0x10] sm:$0x3f] %vm193_vm2, %v3016_v50  ;;  %197 = vst.msk [vmem:[#allocation2 + $0x28] sm:$0x3f] %vm193_vm2, %v3016_v50  ;;  %vm488_vm10 = vcmask 1047559  }
  0x21   : > { %s3066_s20 = scalar_lea.vmem %s5353_s0, %s2946_s17  ;;  %vm499_vm11 = vcmask 23552   ;;  %vm502_vm12 = vcmask 154624   ;;  %s3336_s22 = sld [smem:[#allocation3 + $0x2]]  ;;  %vm870_vm13 = vcmask 1045504   ;;  %vm888_vm14 = vcmask 1044480  }
  0x22   : > { %v3069_v0 = vld [vmem:[%s3066_s20 + $0x10] sm:$0xff]  ;;  %v3072_v1 = vld [vmem:[%s3066_s20] sm:$0xff]  ;;  %v3075_v2 = vld [vmem:[%s3066_s20 + $0x18] sm:$0xff]  ;;  %s3017_s23 = smov 127   ;;  %s3018_s24 = smov 126   ;;  %vm852_vm15 = vcmask 1046528  }
  0x23   : > { %v205_v3 = vsel %vm5356_vm0, %v3069_v0, -inf  ;;  %v199_v4 = vsel %vm5356_vm0, %v3072_v1, -inf  ;;  %v3082_v5 = vld [vmem:[%s3066_s20 + $0x8] sm:$0xff]  ;;  %v208_v6 = vsel %vm5356_vm0, %v3075_v2, -inf  ;;  %v3092_v9 = vld [vmem:[%s3066_s20 + $0x20] sm:$0xff]  ;;  %v3099_v12 = vld [vmem:[%s3066_s20 + $0x38] sm:$0xff] }
  0x24   : > { %206 = vmax.xlane.f32.xlu1 %v205_v3  ;;  %200 = vmax.xlane.f32.xlu0 %v199_v4  ;;  %v202_v7 = vsel %vm5356_vm0, %v3082_v5, -inf  ;;  %v3089_v8 = vld [vmem:[%s3066_s20 + $0x28] sm:$0xff]  ;;  %v211_v11 = vsel %vm5356_vm0, %v3092_v9, -inf  ;;  %v3102_v13 = vld [vmem:[%s3066_s20 + $0x30] sm:$0xff]  ;;  %v220_v14 = vsel %vm5356_vm0, %v3099_v12, -inf  ;;  %v3112_v17 = vld [vmem:[%s3066_s20 + $0x40] sm:$0xff] }
  0x25   : > { %v214_v10 = vsel %vm5356_vm0, %v3089_v8, -inf  ;;  %v217_v15 = vsel %vm5356_vm0, %v3102_v13, -inf  ;;  %v3109_v16 = vld [vmem:[%s3066_s20 + $0x48] sm:$0xff]  ;;  %v223_v19 = vsel %vm5356_vm0, %v3112_v17, -inf  ;;  %v3119_v20 = vld [vmem:[%s3066_s20 + $0x58] sm:$0xff]  ;;  %v3122_v21 = vld [vmem:[%s3066_s20 + $0x50] sm:$0xff] }
  0x26   : > { %v226_v18 = vsel %vm5356_vm0, %v3109_v16, -inf  ;;  %v232_v22 = vsel %vm5356_vm0, %v3119_v20, -inf  ;;  %v229_v23 = vsel %vm5356_vm0, %v3122_v21, -inf  ;;  %v3129_v24 = vld [vmem:[%s3066_s20 + $0x68] sm:$0xff]  ;;  %v3132_v25 = vld [vmem:[%s3066_s20 + $0x60] sm:$0xff]  ;;  %v3139_v28 = vld [vmem:[%s3066_s20 + $0x78] sm:$0xff] }
  0x27   : > { %v238_v26 = vsel %vm5356_vm0, %v3129_v24, -inf  ;;  %v235_v27 = vsel %vm5356_vm0, %v3132_v25, -inf  ;;  %v3142_v29 = vld [vmem:[%s3066_s20 + $0x70] sm:$0xff]  ;;  %v244_v30 = vsel %vm5356_vm0, %v3139_v28, -inf  ;;  %v3149_v32 = vld [vmem:[%s3066_s20 + $0x88] sm:$0xff]  ;;  %v3152_v33 = vld [vmem:[%s3066_s20 + $0x80] sm:$0xff] }
  0x28   : > { %209 = vmax.xlane.f32.xlu1 %v208_v6  ;;  %203 = vmax.xlane.f32.xlu0 %v202_v7  ;;  %v241_v31 = vsel %vm5356_vm0, %v3142_v29, -inf  ;;  %v250_v34 = vsel %vm5356_vm0, %v3149_v32, -inf  ;;  %v247_v35 = vsel %vm5356_vm0, %v3152_v33, -inf  ;;  %v3159_v36 = vld [vmem:[%s3066_s20 + $0x98] sm:$0xff]  ;;  %v3162_v37 = vld [vmem:[%s3066_s20 + $0x90] sm:$0xff]  ;;  %v3169_v40 = vld [vmem:[%s3066_s20 + $0xa8] sm:$0xff] }
  0x29   : > { %v256_v38 = vsel %vm5356_vm0, %v3159_v36, -inf  ;;  %v253_v39 = vsel %vm5356_vm0, %v3162_v37, -inf  ;;  %v3172_v41 = vld [vmem:[%s3066_s20 + $0xa0] sm:$0xff]  ;;  %v262_v42 = vsel %vm5356_vm0, %v3169_v40, -inf  ;;  %v3179_v44 = vld [vmem:[%s3066_s20 + $0xb8] sm:$0xff]  ;;  %v3182_v45 = vld [vmem:[%s3066_s20 + $0xb0] sm:$0xff] }
  0x2a   : > { %v259_v43 = vsel %vm5356_vm0, %v3172_v41, -inf  ;;  %v268_v46 = vsel %vm5356_vm0, %v3179_v44, -inf  ;;  %v265_v47 = vsel %vm5356_vm0, %v3182_v45, -inf  ;;  %v3189_v48 = vld [vmem:[%s3066_s20 + $0xc8] sm:$0xff]  ;;  %v3192_v49 = vld [vmem:[%s3066_s20 + $0xc0] sm:$0xff]  ;;  %v3203_v53 = vld [vmem:[%s3066_s20 + $0xd8] sm:$0xff] }
  0x2b   : > { %v274_v51 = vsel %vm5356_vm0, %v3189_v48, -inf  ;;  %v271_v52 = vsel %vm5356_vm0, %v3192_v49, -inf  ;;  %v3206_v54 = vld [vmem:[%s3066_s20 + $0xd0] sm:$0xff]  ;;  %v280_v55 = vsel %vm5356_vm0, %v3203_v53, -inf  ;;  %v3213_v57 = vld [vmem:[%s3066_s20 + $0xe8] sm:$0xff]  ;;  %v3216_v58 = vld [vmem:[%s3066_s20 + $0xe0] sm:$0xff] }
  0x2c   : > { %215 = vmax.xlane.f32.xlu1 %v214_v10  ;;  %212 = vmax.xlane.f32.xlu0 %v211_v11  ;;  %v277_v56 = vsel %vm5356_vm0, %v3206_v54, -inf  ;;  %v286_v59 = vsel %vm5356_vm0, %v3213_v57, -inf  ;;  %v283_v60 = vsel %vm5356_vm0, %v3216_v58, -inf  ;;  %v3223_v61 = vld [vmem:[%s3066_s20 + $0xf8] sm:$0xff]  ;;  %v3226_v62 = vld [vmem:[%s3066_s20 + $0xf0] sm:$0xff]  ;;  %v510_v4 = vsel %vm5356_vm0, %v3082_v5, 0.0 }
  0x2d   : > { %v292_v63 = vsel %vm5356_vm0, %v3223_v61, -inf  ;;  %v289_v3 = vsel %vm5356_vm0, %v3226_v62, -inf  ;;  %v507_v6 = vsel %vm5356_vm0, %v3072_v1, 0.0  ;;  %v516_v7 = vsel %vm5356_vm0, %v3075_v2, 0.0  ;;  %s2851_s25 = sld [smem:[#allocation3 + $0xf]]  ;;  %s2852_s26 = sld [smem:[#allocation3 + $0x16]] }
  0x2e   : > { %v513_v10 = vsel %vm5356_vm0, %v3069_v0, 0.0  ;;  %v522_v11 = vsel %vm5356_vm0, %v3089_v8, 0.0  ;;  %v528_v1 = vsel %vm5356_vm0, %v3099_v12, 0.0  ;;  %v525_v5 = vsel %vm5356_vm0, %v3102_v13, 0.0  ;;  %s2850_s27 = sld [smem:[#allocation3 + $0x8]]  ;;  %s2853_s28 = sld [smem:[#allocation3 + $0x1d]] }
  0x2f   : > { %v534_v0 = vsel %vm5356_vm0, %v3109_v16, 0.0  ;;  %v531_v2 = vsel %vm5356_vm0, %v3112_v17, 0.0  ;;  %v540_v8 = vsel %vm5356_vm0, %v3119_v20, 0.0  ;;  %v546_v12 = vsel %vm5356_vm0, %v3129_v24, 0.0  ;;  %s2854_s29 = sld [smem:[#allocation3 + $0x24]]  ;;  %s2855_s30 = sld [smem:[#allocation3 + $0x2b]] }
  0x30   : > { %221 = vmax.xlane.f32.xlu1 %v220_v14  ;;  %218 = vmax.xlane.f32.xlu0 %v217_v15  ;;  %v519_v14 = vsel %vm5356_vm0, %v3092_v9, 0.0  ;;  %v537_v9 = vsel %vm5356_vm0, %v3122_v21, 0.0  ;;  %v543_v13 = vsel %vm5356_vm0, %v3132_v25, 0.0  ;;  %v552_v15 = vsel %vm5356_vm0, %v3139_v28, 0.0  ;;  %s2857_s3 = sld [smem:[#allocation3 + $0x9]]  ;;  %s2858_s4 = sld [smem:[#allocation3 + $0x10]] }
  0x31   : > { %v549_v16 = vsel %vm5356_vm0, %v3142_v29, 0.0  ;;  %v558_v17 = vsel %vm5356_vm0, %v3149_v32, 0.0  ;;  %v561_v20 = vsel %vm5356_vm0, %v3162_v37, 0.0  ;;  %v570_v21 = vsel %vm5356_vm0, %v3169_v40, 0.0  ;;  %s3468_s5 = sld [smem:[#allocation3 + $0x17]]  ;;  %s3491_s6 = sld [smem:[#allocation3 + $0x1e]] }
  0x32   : > { %v573_v24 = vsel %vm5356_vm0, %v3182_v45, 0.0  ;;  %v582_v25 = vsel %vm5356_vm0, %v3189_v48, 0.0  ;;  %v585_v28 = vsel %vm5356_vm0, %v3206_v54, 0.0  ;;  %v594_v29 = vsel %vm5356_vm0, %v3213_v57, 0.0  ;;  %s3525_s7 = sld [smem:[#allocation3 + $0x25]]  ;;  %s3553_s8 = sld [smem:[#allocation3 + $0x2c]] }
  0x33   : > { %v597_v32 = vsel %vm5356_vm0, %v3226_v62, 0.0  ;;  %v327_v37 = vlaneseq  ;;  %vm906_vm2 = vcmask 1043456   ;;  %s3614_s11 = sld [smem:[#allocation3 + $0xa]]  ;;  %s3621_s12 = sld [smem:[#allocation3 + $0x3]] }
  0x34   : > { %227 = vmax.xlane.f32.xlu1 %v226_v18  ;;  %224 = vmax.xlane.f32.xlu0 %v223_v19  ;;  %v555_v18 = vsel %vm5356_vm0, %v3152_v33, 0.0  ;;  %v564_v19 = vsel %vm5356_vm0, %v3159_v36, 0.0  ;;  %s3623_s13 = sld [smem:[#allocation3 + $0x11]]  ;;  %s3645_s14 = sld [smem:[#allocation3 + $0x18]] }
  0x35   : > { %v328_v40 = vand.u32 127, %v327_v37  ;;  %v331_v45 = vshrl.u32 %v327_v37, 7  ;;  %s3697_s15 = sld [smem:[#allocation3 + $0x1f]]  ;;  %s3019_s16 = smov 125  }
  0x36   : > { %s2868_s17 = sld [smem:[#allocation3 + $0x26]]  ;;  %s2869_s18 = sld [smem:[#allocation3 + $0x2d]] }
  0x37   : > { %s2871_s19 = sld [smem:[#allocation3 + $0xb]]  ;;  %s3760_s20 = sld [smem:[#allocation3 + $0x4]] }
  0x38   : > { %233 = vmax.xlane.f32.xlu1 %v232_v22  ;;  %230 = vmax.xlane.f32.xlu0 %v229_v23  ;;  %v567_v22 = vsel %vm5356_vm0, %v3172_v41, 0.0  ;;  %v576_v23 = vsel %vm5356_vm0, %v3179_v44, 0.0  ;;  %v334_v41 = vadd.s32 4294967285, %v328_v40  ;;  %v329_v44 = vadd.s32 4294967293, %v328_v40 }
  0x3c   : > { %239 = vmax.xlane.f32.xlu1 %v238_v26  ;;  %236 = vmax.xlane.f32.xlu0 %v235_v27  ;;  %v579_v26 = vsel %vm5356_vm0, %v3192_v49, 0.0  ;;  %v588_v27 = vsel %vm5356_vm0, %v3203_v53, 0.0  ;;  %v3298_v49 = vsub.s32 %v329_v44, %v331_v45 }
  0x40   : > { %245 = vmax.xlane.f32.xlu1 %v244_v30  ;;  %242 = vmax.xlane.f32.xlu0 %v241_v31  ;;  %v591_v30 = vsel %vm5356_vm0, %v3216_v58, 0.0  ;;  %v600_v31 = vsel %vm5356_vm0, %v3223_v61, 0.0  ;;  %vm924_vm0 = vcmask 1042432  }
  0x44   : > { %251 = vmax.xlane.f32.xlu1 %v250_v34  ;;  %248 = vmax.xlane.f32.xlu0 %v247_v35 }
  0x48   : > { %257 = vmax.xlane.f32.xlu1 %v256_v38  ;;  %254 = vmax.xlane.f32.xlu0 %v253_v39 }
  0x4c   : > { %263 = vmax.xlane.f32.xlu1 %v262_v42  ;;  %260 = vmax.xlane.f32.xlu0 %v259_v43 }
  0x50   : > { %269 = vmax.xlane.f32.xlu1 %v268_v46  ;;  %266 = vmax.xlane.f32.xlu0 %v265_v47  ;;  %v3296_v46 = vsub.s32 %v334_v41, %v331_v45 }
  0x54   : > { %275 = vmax.xlane.f32.xlu1 %v274_v51  ;;  %272 = vmax.xlane.f32.xlu0 %v271_v52 }
  0x58   : > { %281 = vmax.xlane.f32.xlu1 %v280_v55  ;;  %278 = vmax.xlane.f32.xlu0 %v277_v56 }
  0x5c   : > { %287 = vmax.xlane.f32.xlu1 %v286_v59  ;;  %284 = vmax.xlane.f32.xlu0 %v283_v60 }
  0x60   : > { %293 = vmax.xlane.f32.xlu1 %v292_v63  ;;  %290 = vmax.xlane.f32.xlu0 %v289_v3 }
  0x64   : > { %511 = vadd.xlane.f32.xlu1 %v510_v4  ;;  %508 = vadd.xlane.f32.xlu0 %v507_v6 }
  0x68   : > { %517 = vadd.xlane.f32.xlu1 %v516_v7  ;;  %514 = vadd.xlane.f32.xlu0 %v513_v10 }
  0x6c   : > { %523 = vadd.xlane.f32.xlu1 %v522_v11  ;;  %520 = vadd.xlane.f32.xlu0 %v519_v14 }
  0x70   : > { %529 = vadd.xlane.f32.xlu1 %v528_v1  ;;  %526 = vadd.xlane.f32.xlu0 %v525_v5 }
  0x74   : > { %535 = vadd.xlane.f32.xlu1 %v534_v0  ;;  %532 = vadd.xlane.f32.xlu0 %v531_v2 }
  0x78   : > { %541 = vadd.xlane.f32.xlu1 %v540_v8  ;;  %538 = vadd.xlane.f32.xlu0 %v537_v9 }
  0x7c   : > { %547 = vadd.xlane.f32.xlu1 %v546_v12  ;;  %544 = vadd.xlane.f32.xlu0 %v543_v13 }
  0x80   : > { %553 = vadd.xlane.f32.xlu1 %v552_v15  ;;  %550 = vadd.xlane.f32.xlu0 %v549_v16 }
  0x84   : > { %559 = vadd.xlane.f32.xlu1 %v558_v17  ;;  %556 = vadd.xlane.f32.xlu0 %v555_v18 }
  0x88   : > { %565 = vadd.xlane.f32.xlu1 %v564_v19  ;;  %562 = vadd.xlane.f32.xlu0 %v561_v20 }
  0x8c   : > { %571 = vadd.xlane.f32.xlu1 %v570_v21  ;;  %568 = vadd.xlane.f32.xlu0 %v567_v22 }
  0x90   : > { %577 = vadd.xlane.f32.xlu1 %v576_v23  ;;  %574 = vadd.xlane.f32.xlu0 %v573_v24 }
  0x94   : > { %583 = vadd.xlane.f32.xlu1 %v582_v25  ;;  %580 = vadd.xlane.f32.xlu0 %v579_v26 }
  0x98   : > { %589 = vadd.xlane.f32.xlu1 %v588_v27  ;;  %586 = vadd.xlane.f32.xlu0 %v585_v28 }
  0x9c   : > { %595 = vadd.xlane.f32.xlu1 %v594_v29  ;;  %592 = vadd.xlane.f32.xlu0 %v591_v30 }
  0xa0   : > { %601 = vadd.xlane.f32.xlu1 %v600_v31  ;;  %598 = vadd.xlane.f32.xlu0 %v597_v32  ;;  %v953_v31 = vstv %s3331_s21  ;;  %s2872_s21 = sld [smem:[#allocation3 + $0x12]] }
  0xb1   : > { %v207_v33 = vpop.xlane.xlu1 %206  ;;  %v201_v34 = vpop.xlane.xlu0 %200 }
  0xb2   : > { %v344_v56 = vrot.slane %v207_v33, %v3298_v49  ;;  %v333_v57 = vrot.slane %v201_v34, %v3298_v49 }
  0xb5   : > { %v210_v35 = vpop.xlane.xlu1 %209  ;;  %v204_v36 = vpop.xlane.xlu0 %203 }
  0xb6   : > { %v348_v50 = vrot.slane %v210_v35, %v3296_v46  ;;  %v338_v51 = vrot.slane %v204_v36, %v3296_v46  ;;  %v1093_v36 = vstv %s3336_s22  ;;  %s2873_s22 = sld [smem:[#allocation3 + $0x19]] }
  0xb8   : > { %v349_v62 = vsel %vm339_vm3, %v348_v50, %v344_v56  ;;  %v340_v63 = vsel %vm339_vm3, %v338_v51, %v333_v57 }
  0xb9   : > { %v216_v38 = vpop.xlane.xlu1 %215  ;;  %v213_v39 = vpop.xlane.xlu0 %212  ;;  %v477_v5 = vsel %vm476_vm4, %v349_v62, %v340_v63 }
  0xba   : > { %v357_v52 = vrot.slane %v216_v38, %v3296_v46  ;;  %v353_v53 = vrot.slane %v213_v39, %v3298_v49 }
  0xbc   : > { %v358_v6 = vsel %vm339_vm3, %v357_v52, %v353_v53 }
  0xbd   : > { %v222_v42 = vpop.xlane.xlu1 %221  ;;  %v219_v43 = vpop.xlane.xlu0 %218  ;;  %v479_v2 = vsel %vm478_vm5, %v358_v6, %v477_v5 }
  0xbe   : > { %v366_v58 = vrot.slane %v222_v42, %v3296_v46  ;;  %v362_v59 = vrot.slane %v219_v43, %v3298_v49 }
  0xc0   : > { %v367_v11 = vsel %vm339_vm3, %v366_v58, %v362_v59 }
  0xc1   : > { %v228_v47 = vpop.xlane.xlu1 %227  ;;  %v225_v48 = vpop.xlane.xlu0 %224  ;;  %v481_v9 = vsel %vm5357_vm6, %v367_v11, %v479_v2 }
  0xc2   : > { %v375_v60 = vrot.slane %v228_v47, %v3296_v46  ;;  %v371_v61 = vrot.slane %v225_v48, %v3298_v49 }
  0xc4   : > { %v376_v0 = vsel %vm339_vm3, %v375_v60, %v371_v61 }
  0xc5   : > { %v234_v54 = vpop.xlane.xlu1 %233  ;;  %v231_v55 = vpop.xlane.xlu0 %230  ;;  %v483_v16 = vsel %vm482_vm7, %v376_v0, %v481_v9 }
  0xc6   : > { %v384_v3 = vrot.slane %v234_v54, %v3296_v46  ;;  %v380_v4 = vrot.slane %v231_v55, %v3298_v49 }
  0xc8   : > { %v385_v8 = vsel %vm339_vm3, %v384_v3, %v380_v4 }
  0xc9   : > { %v240_v7 = vpop.xlane.xlu1 %239  ;;  %v237_v10 = vpop.xlane.xlu0 %236  ;;  %v485_v19 = vsel %vm484_vm8, %v385_v8, %v483_v16 }
  0xca   : > { %v393_v14 = vrot.slane %v240_v7, %v3296_v46  ;;  %v389_v1 = vrot.slane %v237_v10, %v3298_v49 }
  0xcc   : > { %v394_v12 = vsel %vm339_vm3, %v393_v14, %v389_v1 }
  0xcd   : > { %v246_v13 = vpop.xlane.xlu1 %245  ;;  %v243_v15 = vpop.xlane.xlu0 %242  ;;  %v487_v20 = vsel %vm486_vm9, %v394_v12, %v485_v19 }
  0xce   : > { %v402_v17 = vrot.slane %v246_v13, %v3296_v46  ;;  %v398_v18 = vrot.slane %v243_v15, %v3298_v49 }
  0xd0   : > { %v403_v21 = vsel %vm339_vm3, %v402_v17, %v398_v18 }
  0xd1   : > { %v489_v22 = vsel %vm488_vm10, %v403_v21, %v487_v20  ;;  %v252_v23 = vpop.xlane.xlu1 %251  ;;  %v249_v24 = vpop.xlane.xlu0 %248 }
  0xd2   : > { %v500_v25 = vsel %vm499_vm11, 0.0, %v489_v22  ;;  %v411_v47 = vrot.slane %v252_v23, %v3296_v46  ;;  %v407_v48 = vrot.slane %v249_v24, %v3298_v49 }
  0xd3   : > { %v503_v26 = vsel %vm502_vm12, %v500_v25, 0.0 }
  0xd4   : > { %505 = vst.msk [vmem:[#allocation2 + $0x3] sm:$0xff] %vm190_vm1, %v503_v26  ;;  %v412_v60 = vsel %vm339_vm3, %v411_v47, %v407_v48 }
  0xd5   : > { %v258_v27 = vpop.xlane.xlu1 %257  ;;  %v255_v28 = vpop.xlane.xlu0 %254 }
  0xd6   : > { %v420_v40 = vrot.slane %v258_v27, %v3296_v46  ;;  %v416_v41 = vrot.slane %v255_v28, %v3298_v49  ;;  %v3386_v27 = vstv %s2851_s25  ;;  %s2874_s25 = sld [smem:[#allocation3 + $0x20]] }
  0xd8   : > { %v421_v54 = vsel %vm339_vm3, %v420_v40, %v416_v41  ;;  %v3398_v40 = vstv %s2857_s3  ;;  %s2879_s3 = sld [smem:[#allocation3 + $0x13]] }
  0xd9   : > { %v264_v29 = vpop.xlane.xlu1 %263  ;;  %v261_v30 = vpop.xlane.xlu0 %260  ;;  %v490_v3 = vsel %vm476_vm4, %v421_v54, %v412_v60 }
  0xda   : > { %v429_v42 = vrot.slane %v264_v29, %v3296_v46  ;;  %v425_v43 = vrot.slane %v261_v30, %v3298_v49  ;;  %v3390_v30 = vstv %s2852_s26  ;;  %s3020_s26 = smov 124  }
  0xdb   : > { %v3339_v32 = vld [vmem:[#allocation2] sm:$0xff] }
  0xdc   : > { %v954_v33 = vmul.f32 %v953_v31, %v3339_v32  ;;  %v1094_v37 = vmul.f32 %v1093_v36, %v3339_v32  ;;  %v430_v57 = vsel %vm339_vm3, %v429_v42, %v425_v43  ;;  %v989_v41 = vmul.f32 %v3386_v27, %v3339_v32 }
  0xdd   : > { %v270_v34 = vpop.xlane.xlu1 %269  ;;  %v267_v35 = vpop.xlane.xlu0 %266  ;;  %v491_v6 = vsel %vm478_vm5, %v430_v57, %v490_v3  ;;  %v1010_v48 = vmul.f32 %v3390_v30, %v3339_v32 }
  0xde   : > { %958 = vrot.lane.b32.xlu0 %v954_v33, %s3017_s23  ;;  %v438_v50 = vrot.slane %v270_v34, %v3296_v46  ;;  %v434_v51 = vrot.slane %v267_v35, %v3298_v49  ;;  %v967_v33 = vstv %s2850_s27  ;;  %v995_v60 = vrot.slane %v989_v41, 2  ;;  %s2875_s27 = sld [smem:[#allocation3 + $0x27]] }
  0xdf   : > { %v968_v57 = vmul.f32 %v967_v33, %v3339_v32 }
  0xe0   : > { %v439_v61 = vsel %vm339_vm3, %v438_v50, %v434_v51 }
  0xe1   : > { %v276_v38 = vpop.xlane.xlu1 %275  ;;  %v273_v39 = vpop.xlane.xlu0 %272  ;;  %v492_v10 = vsel %vm5357_vm6, %v439_v61, %v491_v6 }
  0xe2   : > { %1098 = vrot.lane.b32.xlu0 %v1094_v37, %s3018_s24  ;;  %v447_v52 = vrot.slane %v276_v38, %v3296_v46  ;;  %v443_v53 = vrot.slane %v273_v39, %v3298_v49  ;;  %v3392_v37 = vstv %s2853_s28  ;;  %v3394_v38 = vstv %s2854_s29  ;;  %s2876_s28 = sld [smem:[#allocation3 + $0x2e]]  ;;  %s2878_s29 = sld [smem:[#allocation3 + $0xc]] }
  0xe3   : > { %v3396_v39 = vstv %s2855_s30  ;;  %s3814_s30 = sld [smem:[#allocation3 + $0x5]] }
  0xe4   : > { %v448_v4 = vsel %vm339_vm3, %v447_v52, %v443_v53 }
  0xe5   : > { %v282_v44 = vpop.xlane.xlu1 %281  ;;  %v279_v45 = vpop.xlane.xlu0 %278  ;;  %v493_v5 = vsel %vm482_vm7, %v448_v4, %v492_v10 }
  0xe6   : > { %v456_v55 = vrot.slane %v282_v44, %v3296_v46  ;;  %v452_v56 = vrot.slane %v279_v45, %v3298_v49  ;;  %v3402_v44 = vstv %s2858_s4  ;;  %s2880_s4 = sld [smem:[#allocation3 + $0x1a]] }
  0xe8   : > { %v457_v7 = vsel %vm339_vm3, %v456_v55, %v452_v56 }
  0xe9   : > { %v288_v58 = vpop.xlane.xlu1 %287  ;;  %v285_v59 = vpop.xlane.xlu0 %284  ;;  %v494_v8 = vsel %vm484_vm8, %v457_v7, %v493_v5  ;;  %v1016_v5 = vrot.slane %v1010_v48, 3 }
  0xea   : > { %v465_v62 = vrot.slane %v288_v58, %v3296_v46  ;;  %v461_v63 = vrot.slane %v285_v59, %v3298_v49 }
  0xec   : > { %v466_v11 = vsel %vm339_vm3, %v465_v62, %v461_v63 }
  0xed   : > { %v294_v14 = vpop.xlane.xlu1 %293  ;;  %v291_v1 = vpop.xlane.xlu0 %290  ;;  %v495_v9 = vsel %vm486_vm9, %v466_v11, %v494_v8 }
  0xee   : > { %v474_v0 = vrot.slane %v294_v14, %v3296_v46  ;;  %v470_v2 = vrot.slane %v291_v1, %v3298_v49 }
  0xf0   : > { %v475_v12 = vsel %vm339_vm3, %v474_v0, %v470_v2 }
  0xf1   : > { %v496_v13 = vsel %vm488_vm10, %v475_v12, %v495_v9  ;;  %v512_v15 = vpop.xlane.xlu1 %511  ;;  %v509_v16 = vpop.xlane.xlu0 %508  ;;  %v1031_v9 = vmul.f32 %v3392_v37, %v3339_v32 }
  0xf2   : > { %v501_v17 = vsel %vm499_vm11, 0.0, %v496_v13  ;;  %v605_v19 = vmul.f32 0.0625, %v512_v15  ;;  %v604_v20 = vmul.f32 0.0625, %v509_v16 }
  0xf3   : > { %v504_v18 = vsel %vm502_vm12, %v501_v17, 0.0  ;;  %v974_v17 = vrot.slane %v968_v57, 1 }
  0xf4   : > { %506 = vst.msk [vmem:[#allocation2 + $0xb] sm:$0xff] %vm190_vm1, %v504_v18  ;;  %v675_v25 = vrot.slane %v605_v19, %v3296_v46  ;;  %v671_v26 = vrot.slane %v604_v20, %v3298_v49 }
  0xf5   : > { %v518_v21 = vpop.xlane.xlu1 %517  ;;  %v515_v22 = vpop.xlane.xlu0 %514 }
  0xf6   : > { %v607_v23 = vmul.f32 0.0625, %v518_v21  ;;  %v606_v24 = vmul.f32 0.0625, %v515_v22  ;;  %v676_v47 = vsel %vm339_vm3, %v675_v25, %v671_v26  ;;  %v1052_v25 = vmul.f32 %v3394_v38, %v3339_v32 }
  0xf8   : > { %v684_v28 = vrot.slane %v607_v23, %v3296_v46  ;;  %v680_v29 = vrot.slane %v606_v24, %v3298_v49 }
  0xf9   : > { %v524_v34 = vpop.xlane.xlu1 %523  ;;  %v521_v35 = vpop.xlane.xlu0 %520 }
  0xfa   : > { %v609_v42 = vmul.f32 0.0625, %v524_v34  ;;  %v608_v43 = vmul.f32 0.0625, %v521_v35  ;;  %v685_v51 = vsel %vm339_vm3, %v684_v28, %v680_v29 }
  0xfb   : > { %v3404_v45 = vld [vmem:[#allocation2 + $0x8] sm:$0xff]  ;;  %v3425_v59 = vld [vmem:[#allocation2 + $0x10] sm:$0x3f]  ;;  %v812_v3 = vsel %vm476_vm4, %v685_v51, %v676_v47 }
  0xfc   : > { %v955_v50 = vmul.f32 %v953_v31, %v3404_v45  ;;  %v3415_v52 = vmul.f32 %v3386_v27, %v3404_v45  ;;  %v693_v53 = vrot.slane %v609_v42, %v3296_v46  ;;  %v689_v54 = vrot.slane %v608_v43, %v3298_v49 }
  0xfd   : > { %v3421_v55 = vmul.f32 %v3390_v30, %v3404_v45  ;;  %v530_v56 = vpop.xlane.xlu1 %529  ;;  %v969_v31 = vmul.f32 %v967_v33, %v3404_v45  ;;  %v527_v58 = vpop.xlane.xlu0 %526  ;;  %v1095_v4 = vmul.f32 %v1093_v36, %v3404_v45  ;;  %v3436_v7 = vmul.f32 %v3392_v37, %v3404_v45 }
  0xfe   : > { %960 = vrot.lane.b32.xlu1 %v955_v50, %s3017_s23  ;;  %v996_v61 = vrot.slane %v3415_v52, 2  ;;  %v611_v62 = vmul.f32 0.0625, %v530_v56  ;;  %v610_v63 = vmul.f32 0.0625, %v527_v58  ;;  %v694_v11 = vsel %vm339_vm3, %v693_v53, %v689_v54 }
  0xff   : > { %v1017_v6 = vrot.slane %v3421_v55, 3  ;;  %v975_v36 = vrot.slane %v969_v31, 1  ;;  %v970_v2 = vmul.f32 %v967_v33, %v3425_v59  ;;  %v813_v15 = vsel %vm478_vm5, %v694_v11, %v812_v3 }
 0x100   : > { %v997_v10 = vsel %vm870_vm13, %v995_v60, %v996_v61  ;;  %v702_v14 = vrot.slane %v611_v62, %v3296_v46  ;;  %v698_v1 = vrot.slane %v610_v63, %v3298_v49  ;;  %v1038_v18 = vrot.slane %v3436_v7, 4 }
 0x101   : > { %1000 = vrot.lane.b32.xlu0 %v997_v10, %s3017_s23  ;;  %v536_v0 = vpop.xlane.xlu1 %535  ;;  %v533_v8 = vpop.xlane.xlu0 %532  ;;  %v1018_v16 = vsel %vm888_vm14, %v1016_v5, %v1017_v6  ;;  %v3459_v22 = vmul.f32 %v3394_v38, %v3404_v45  ;;  %v976_v23 = vsel %vm852_vm15, %v974_v17, %v975_v36  ;;  %v977_v24 = vrot.slane %v970_v2, 1 }
 0x102   : > { %1100 = vrot.lane.b32.xlu1 %v1095_v4, %s3018_s24  ;;  %v613_v12 = vmul.f32 0.0625, %v536_v0  ;;  %v612_v13 = vmul.f32 0.0625, %v533_v8  ;;  %v703_v19 = vsel %vm339_vm3, %v702_v14, %v698_v1  ;;  %v991_v28 = vmul.f32 %v3386_v27, %v3425_v59 }
 0x103   : > { %v1037_v33 = vrot.slane %v1031_v9, 4  ;;  %v814_v41 = vsel %vm5357_vm6, %v703_v19, %v813_v15  ;;  %v1073_v43 = vmul.f32 %v3396_v39, %v3339_v32  ;;  %v3476_v47 = vmul.f32 %v3396_v39, %v3404_v45 }
 0x104   : > { %v711_v20 = vrot.slane %v613_v12, %v3296_v46  ;;  %v707_v21 = vrot.slane %v612_v13, %v3298_v49  ;;  %v1059_v48 = vrot.slane %v3459_v22, 5  ;;  %v978_v53 = vsel %vm852_vm15, %v975_v36, %v977_v24 }
 0x105   : > { %1021 = vrot.lane.b32.xlu0 %v1018_v16, %s3017_s23  ;;  %v542_v26 = vpop.xlane.xlu1 %541  ;;  %v539_v29 = vpop.xlane.xlu0 %538  ;;  %v1039_v27 = vsel %vm906_vm2, %v1037_v33, %v1038_v18  ;;  %v1058_v54 = vrot.slane %v1052_v25, 5  ;;  %v998_v56 = vrot.slane %v991_v28, 2  ;;  %v1012_v31 = vmul.f32 %v3390_v30, %v3425_v59 }
 0x106   : > { %979 = vrot.lane.b32.xlu1 %v976_v23, %s3017_s23  ;;  %v615_v34 = vmul.f32 0.0625, %v542_v26  ;;  %v614_v35 = vmul.f32 0.0625, %v539_v29  ;;  %v712_v42 = vsel %vm339_vm3, %v711_v20, %v707_v21  ;;  %vm942_vm6 = vcmask 1041408  }
 0x107   : > { %v815_v60 = vsel %vm482_vm7, %v712_v42, %v814_v41  ;;  %v1080_v4 = vrot.slane %v3476_v47, 6  ;;  %v3496_v10 = vmul.f32 %v3398_v40, %v3404_v45  ;;  %v1033_v30 = vmul.f32 %v3392_v37, %v3425_v59 }
 0x108   : > { %v720_v50 = vrot.slane %v615_v34, %v3296_v46  ;;  %v716_v51 = vrot.slane %v614_v35, %v3298_v49  ;;  %v1060_v11 = vsel %vm924_vm0, %v1058_v54, %v1059_v48  ;;  %v1108_v5 = vmul.f32 %v3398_v40, %v3339_v32 }
 0x109   : > { %1042 = vrot.lane.b32.xlu0 %v1039_v27, %s3017_s23  ;;  %v548_v57 = vpop.xlane.xlu1 %547  ;;  %v545_v58 = vpop.xlane.xlu0 %544  ;;  %v999_v36 = vsel %vm870_vm13, %v996_v61, %v998_v56  ;;  %v1079_v0 = vrot.slane %v1073_v43, 6  ;;  %v1019_v2 = vrot.slane %v1012_v31, 3  ;;  %v3515_v16 = vstv %s3468_s5  ;;  %s2881_s5 = sld [smem:[#allocation3 + $0x21]] }
 0x10a   : > { %981 = vrot.lane.b32.xlu1 %v978_v53, %s3017_s23  ;;  %v721_v62 = vsel %vm339_vm3, %v720_v50, %v716_v51  ;;  %v617_v63 = vmul.f32 0.0625, %v548_v57  ;;  %v616_v3 = vmul.f32 0.0625, %v545_v58  ;;  %v1115_v61 = vrot.slane %v3496_v10, 1 }
 0x10b   : > { %v816_v37 = vsel %vm484_vm8, %v721_v62, %v815_v60  ;;  %v1081_v52 = vsel %vm942_vm6, %v1079_v0, %v1080_v4  ;;  %v1040_v17 = vrot.slane %v1033_v30, 4  ;;  %v3523_v19 = vmul.f32 %v3402_v44, %v3404_v45 }
 0x10c   : > { %v729_v14 = vrot.slane %v617_v63, %v3296_v46  ;;  %v725_v1 = vrot.slane %v616_v3, %v3298_v49  ;;  %v1054_v24 = vmul.f32 %v3394_v38, %v3425_v59  ;;  %v1020_v25 = vsel %vm888_vm14, %v1017_v6, %v1019_v2 }
 0x10d   : > { %1063 = vrot.lane.b32.xlu0 %v1060_v11, %s3017_s23  ;;  %v554_v8 = vpop.xlane.xlu1 %553  ;;  %v551_v9 = vpop.xlane.xlu0 %550  ;;  %v1114_v26 = vrot.slane %v1108_v5, 1  ;;  %v1129_v34 = vmul.f32 %v3402_v44, %v3339_v32  ;;  %v3541_v35 = vstv %s3491_s6  ;;  %v1150_v6 = vmul.f32 %v3515_v16, %v3339_v32  ;;  %s3021_s6 = smov 123  }
 0x10e   : > { %1002 = vrot.lane.b32.xlu1 %v999_v36, %s3017_s23  ;;  %v730_v12 = vsel %vm339_vm3, %v729_v14, %v725_v1  ;;  %v619_v13 = vmul.f32 0.0625, %v554_v8  ;;  %v618_v15 = vmul.f32 0.0625, %v551_v9  ;;  %v3551_v41 = vmul.f32 %v3515_v16, %v3404_v45 }
 0x10f   : > { %v817_v20 = vsel %vm486_vm9, %v730_v12, %v816_v37  ;;  %v1116_v38 = vsel %vm852_vm15, %v1114_v26, %v1115_v61  ;;  %v1041_v42 = vsel %vm906_vm2, %v1038_v18, %v1040_v17  ;;  %v1136_v27 = vrot.slane %v3523_v19, 2 }
 0x110   : > { %v738_v21 = vrot.slane %v619_v13, %v3296_v46  ;;  %v734_v23 = vrot.slane %v618_v15, %v3298_v49  ;;  %v1061_v50 = vrot.slane %v1054_v24, 5  ;;  %v1075_v57 = vmul.f32 %v3396_v39, %v3425_v59 }
 0x111   : > { %1084 = vrot.lane.b32.xlu0 %v1081_v52, %s3017_s23  ;;  %v560_v28 = vpop.xlane.xlu1 %559  ;;  %v557_v29 = vpop.xlane.xlu0 %556  ;;  %v1135_v7 = vrot.slane %v1129_v34, 2  ;;  %v1156_v60 = vrot.slane %v1150_v6, 3  ;;  %v1171_v62 = vmul.f32 %v3541_v35, %v3339_v32  ;;  %v3569_v63 = vstv %s3525_s7  ;;  %s2882_s7 = sld [smem:[#allocation3 + $0x28]] }
 0x112   : > { %1023 = vrot.lane.b32.xlu1 %v1020_v25, %s3017_s23  ;;  %v739_v33 = vsel %vm339_vm3, %v738_v21, %v734_v23  ;;  %v621_v53 = vmul.f32 0.0625, %v560_v28  ;;  %v620_v54 = vmul.f32 0.0625, %v557_v29  ;;  %v1157_v39 = vrot.slane %v3551_v41, 3 }
 0x113   : > { %v818_v55 = vsel %vm488_vm10, %v739_v33, %v817_v20  ;;  %v1137_v3 = vsel %vm870_vm13, %v1135_v7, %v1136_v27  ;;  %v3577_v30 = vmul.f32 %v3541_v35, %v3404_v45  ;;  %v1110_v11 = vmul.f32 %v3398_v40, %v3425_v59 }
 0x114   : > { %v828_v43 = vsel %vm499_vm11, 0.0, %v818_v55  ;;  %v747_v14 = vrot.slane %v621_v53, %v3296_v46  ;;  %v1062_v1 = vsel %vm924_vm0, %v1059_v48, %v1061_v50  ;;  %v743_v5 = vrot.slane %v620_v54, %v3298_v49 }
 0x115   : > { %1119 = vrot.lane.b32.xlu0 %v1116_v38, %s3018_s24  ;;  %v830_v51 = vsel %vm502_vm12, %v828_v43, 0.0  ;;  %v566_v56 = vpop.xlane.xlu1 %565  ;;  %v563_v31 = vpop.xlane.xlu0 %562  ;;  %v1082_v36 = vrot.slane %v1075_v57, 6  ;;  %v1192_v12 = vmul.f32 %v3569_v63, %v3339_v32  ;;  %v3594_v22 = vmul.f32 %v3569_v63, %v3404_v45 }
 0x116   : > { %1044 = vrot.lane.b32.xlu1 %v1041_v42, %s3017_s23  ;;  %833 = vst.msk [vmem:[#allocation2 + $0x1b] sm:$0xff] %vm190_vm1, %v830_v51  ;;  %v623_v18 = vmul.f32 0.0625, %v566_v56  ;;  %v622_v58 = vmul.f32 0.0625, %v563_v31  ;;  %v3597_v48 = vstv %s3553_s8  ;;  %v1158_v13 = vsel %vm888_vm14, %v1156_v60, %v1157_v39  ;;  %s2883_s8 = sld [smem:[#allocation3 + $0x2f]] }
 0x117   : > { %v1177_v15 = vrot.slane %v1171_v62, 4  ;;  %v1178_v52 = vrot.slane %v3577_v30, 4  ;;  %v1117_v17 = vrot.slane %v1110_v11, 1  ;;  %v1083_v20 = vsel %vm942_vm6, %v1080_v4, %v1082_v36 }
 0x118   : > { %v756_v2 = vrot.slane %v623_v18, %v3296_v46  ;;  %v752_v8 = vrot.slane %v622_v58, %v3298_v49  ;;  %v1131_v25 = vmul.f32 %v3402_v44, %v3425_v59  ;;  %v748_v28 = vsel %vm339_vm3, %v747_v14, %v743_v5 }
 0x119   : > { %1140 = vrot.lane.b32.xlu0 %v1137_v3, %s3018_s24  ;;  %v572_v37 = vpop.xlane.xlu1 %571  ;;  %v569_v0 = vpop.xlane.xlu0 %568  ;;  %v1198_v47 = vrot.slane %v1192_v12, 5  ;;  %v1199_v4 = vrot.slane %v3594_v22, 5  ;;  %v3619_v38 = vmul.f32 %v3597_v48, %v3404_v45  ;;  %v1179_v44 = vsel %vm906_vm2, %v1177_v15, %v1178_v52 }
 0x11a   : > { %1065 = vrot.lane.b32.xlu1 %v1062_v1, %s3017_s23  ;;  %v625_v40 = vmul.f32 0.0625, %v572_v37  ;;  %v624_v9 = vmul.f32 0.0625, %v569_v0  ;;  %v757_v29 = vsel %vm339_vm3, %v756_v2, %v752_v8  ;;  %v1118_v55 = vsel %vm852_vm15, %v1115_v61, %v1117_v17 }
 0x11b   : > { %v819_v43 = vsel %vm476_vm4, %v757_v29, %v748_v28  ;;  %v1138_v51 = vrot.slane %v1131_v25, 2  ;;  %v1152_v54 = vmul.f32 %v3515_v16, %v3425_v59  ;;  %v1213_v10 = vmul.f32 %v3597_v48, %v3339_v32 }
 0x11c   : > { %v765_v21 = vrot.slane %v625_v40, %v3296_v46  ;;  %v761_v23 = vrot.slane %v624_v9, %v3298_v49  ;;  %v1200_v31 = vsel %vm924_vm0, %v1198_v47, %v1199_v4  ;;  %v1220_v7 = vrot.slane %v3619_v38, 6 }
 0x11d   : > { %1161 = vrot.lane.b32.xlu0 %v1158_v13, %s3018_s24  ;;  %v578_v24 = vpop.xlane.xlu1 %577  ;;  %v575_v26 = vpop.xlane.xlu0 %574  ;;  %v1139_v62 = vsel %vm870_vm13, %v1136_v27, %v1138_v51  ;;  %v1159_v3 = vrot.slane %v1152_v54, 3  ;;  %v1173_v14 = vmul.f32 %v3541_v35, %v3425_v59  ;;  %v1219_v5 = vrot.slane %v1213_v10, 6 }
 0x11e   : > { %1086 = vrot.lane.b32.xlu1 %v1083_v20, %s3017_s23  ;;  %v627_v33 = vmul.f32 0.0625, %v578_v24  ;;  %v626_v34 = vmul.f32 0.0625, %v575_v26  ;;  %v766_v50 = vsel %vm339_vm3, %v765_v21, %v761_v23  ;;  %v3659_v0 = vstv %s3614_s11  ;;  %s2885_s11 = sld [smem:[#allocation3 + $0xd]] }
 0x11f   : > { %v820_v18 = vsel %vm478_vm5, %v766_v50, %v819_v43  ;;  %vm5371_vm4 = vcmask 1043459   ;;  %v1233_v19 = vstv %s3621_s12  ;;  %v3665_v40 = vstv %s3623_s13  ;;  %s3895_s12 = sld [smem:[#allocation3 + $0x6]]  ;;  %s2843_s13 = sld [smem:[#allocation3 + $0x7]] }
 0x120   : > { %v774_v6 = vrot.slane %v627_v33, %v3296_v46  ;;  %v770_v42 = vrot.slane %v626_v34, %v3298_v49  ;;  %v1221_v27 = vsel %vm942_vm6, %v1219_v5, %v1220_v7  ;;  %v3674_v12 = vmul.f32 %v3659_v0, %v3404_v45 }
 0x121   : > { %1182 = vrot.lane.b32.xlu0 %v1179_v44, %s3018_s24  ;;  %v584_v53 = vpop.xlane.xlu1 %583  ;;  %v581_v56 = vpop.xlane.xlu0 %580  ;;  %v1160_v13 = vsel %vm888_vm14, %v1157_v39, %v1159_v3  ;;  %v1180_v15 = vrot.slane %v1173_v14, 4  ;;  %v1248_v17 = vmul.f32 %v3659_v0, %v3339_v32  ;;  %v1194_v21 = vmul.f32 %v3569_v63, %v3425_v59 }
 0x122   : > { %1121 = vrot.lane.b32.xlu1 %v1118_v55, %s3018_s24  ;;  %v629_v61 = vmul.f32 0.0625, %v584_v53  ;;  %v628_v57 = vmul.f32 0.0625, %v581_v56  ;;  %v775_v16 = vsel %vm339_vm3, %v774_v6, %v770_v42  ;;  %v1234_v41 = vmul.f32 %v1233_v19, %v3339_v32 }
 0x123   : > { %v821_v2 = vsel %vm5371_vm4, %v775_v16, %v820_v18  ;;  %v3692_v39 = vmul.f32 %v3665_v40, %v3404_v45  ;;  %v3695_v29 = vstv %s3645_s14  ;;  %v1255_v63 = vrot.slane %v3674_v12, 1  ;;  %s3904_s14 = sld [smem:[#allocation3 + $0x14]] }
 0x124   : > { %v783_v58 = vrot.slane %v629_v61, %v3296_v46  ;;  %v779_v60 = vrot.slane %v628_v57, %v3298_v49  ;;  %v1269_v47 = vmul.f32 %v3665_v40, %v3339_v32  ;;  %v1181_v44 = vsel %vm906_vm2, %v1178_v52, %v1180_v15 }
 0x125   : > { %1203 = vrot.lane.b32.xlu0 %v1200_v31, %s3018_s24  ;;  %v590_v11 = vpop.xlane.xlu1 %589  ;;  %v587_v1 = vpop.xlane.xlu0 %586  ;;  %v1201_v6 = vrot.slane %v1194_v21, 5  ;;  %v1215_v43 = vmul.f32 %v3597_v48, %v3425_v59  ;;  %v1254_v51 = vrot.slane %v1248_v17, 1  ;;  %v1276_v30 = vrot.slane %v3692_v39, 2 }
 0x126   : > { %1142 = vrot.lane.b32.xlu1 %v1139_v62, %s3018_s24  ;;  %v631_v36 = vmul.f32 0.0625, %v590_v11  ;;  %v630_v37 = vmul.f32 0.0625, %v587_v1  ;;  %v784_v8 = vsel %vm339_vm3, %v783_v58, %v779_v60  ;;  %v3716_v52 = vmul.f32 %v3695_v29, %v3404_v45 }
 0x127   : > { %v822_v24 = vsel %vm482_vm7, %v784_v8, %v821_v2  ;;  %v1256_v48 = vsel %vm852_vm15, %v1254_v51, %v1255_v63  ;;  %v1202_v31 = vsel %vm924_vm0, %v1199_v4, %v1201_v6  ;;  %v1222_v18 = vrot.slane %v1215_v43, 6 }
 0x128   : > { %v792_v35 = vrot.slane %v631_v36, %v3296_v46  ;;  %v788_v9 = vrot.slane %v630_v37, %v3298_v49  ;;  %v1275_v16 = vrot.slane %v1269_v47, 2  ;;  %v1290_v60 = vmul.f32 %v3695_v29, %v3339_v32 }
 0x129   : > { %1224 = vrot.lane.b32.xlu0 %v1221_v27, %s3018_s24  ;;  %v596_v20 = vpop.xlane.xlu1 %595  ;;  %v593_v23 = vpop.xlane.xlu0 %592  ;;  %v1297_v4 = vrot.slane %v3716_v52, 3  ;;  %v1223_v11 = vsel %vm942_vm6, %v1220_v7, %v1222_v18  ;;  %v1250_v1 = vmul.f32 %v3659_v0, %v3425_v59  ;;  %v1331_v37 = vstv %s2868_s17  ;;  %s3922_s17 = sld [smem:[#allocation3 + $0x1b]] }
 0x12a   : > { %1163 = vrot.lane.b32.xlu1 %v1160_v13, %s3018_s24  ;;  %v793_v25 = vsel %vm339_vm3, %v792_v35, %v788_v9  ;;  %v633_v26 = vmul.f32 0.0625, %v596_v20  ;;  %v632_v28 = vmul.f32 0.0625, %v593_v23  ;;  %v1296_v5 = vrot.slane %v1290_v60, 3 }
 0x12b   : > { %v823_v55 = vsel %vm484_vm8, %v793_v25, %v822_v24  ;;  %v1235_v38 = vmul.f32 %v1233_v19, %v3404_v45  ;;  %v1333_v7 = vmul.f32 %v1331_v37, %v3404_v45  ;;  %v1257_v27 = vrot.slane %v1250_v1, 1 }
 0x12c   : > { %v801_v33 = vrot.slane %v633_v26, %v3296_v46  ;;  %v797_v34 = vrot.slane %v632_v28, %v3298_v49  ;;  %v1298_v2 = vsel %vm888_vm14, %v1296_v5, %v1297_v4  ;;  %v1271_v0 = vmul.f32 %v3665_v40, %v3425_v59 }
 0x12d   : > { %1238 = vrot.lane.b32.xlu0 %v1234_v41, %s3019_s16  ;;  %v602_v42 = vpop.xlane.xlu1 %601  ;;  %v599_v50 = vpop.xlane.xlu0 %598  ;;  %v1332_v9 = vmul.f32 %v1331_v37, %v3339_v32  ;;  %v1352_v13 = vstv %s2869_s18  ;;  %v1339_v17 = vrot.slane %v1333_v7, 5  ;;  %v1258_v40 = vsel %vm852_vm15, %v1255_v63, %v1257_v27  ;;  %s3924_s18 = sld [smem:[#allocation3 + $0xe]] }
 0x12e   : > { %1184 = vrot.lane.b32.xlu1 %v1181_v44, %s3018_s24  ;;  %v802_v53 = vsel %vm339_vm3, %v801_v33, %v797_v34  ;;  %v635_v54 = vmul.f32 0.0625, %v602_v42  ;;  %v634_v56 = vmul.f32 0.0625, %v599_v50  ;;  %v1354_v19 = vmul.f32 %v1352_v13, %v3404_v45 }
 0x12f   : > { %v824_v10 = vsel %vm486_vm9, %v802_v53, %v823_v55  ;;  %v1278_v20 = vrot.slane %v1271_v0, 2  ;;  %v1292_v21 = vmul.f32 %v3695_v29, %v3425_v59  ;;  %v1338_v23 = vrot.slane %v1332_v9, 5 }
 0x130   : > { %v810_v61 = vrot.slane %v635_v54, %v3296_v46  ;;  %v806_v57 = vrot.slane %v634_v56, %v3298_v49  ;;  %v1310_v46 = vstv %s3697_s15  ;;  %v1277_v49 = vsel %vm870_vm13, %v1275_v16, %v1276_v30  ;;  %s3916_s15 = sld [smem:[#allocation3]] }
 0x131   : > { %1259 = vrot.lane.b32.xlu0 %v1256_v48, %s3019_s16  ;;  %v1312_v3 = vmul.f32 %v1310_v46, %v3404_v45  ;;  %v1311_v36 = vmul.f32 %v1310_v46, %v3339_v32  ;;  %v1353_v24 = vmul.f32 %v1352_v13, %v3339_v32  ;;  %v1340_v25 = vsel %vm924_vm0, %v1338_v23, %v1339_v17 }
 0x132   : > { %1205 = vrot.lane.b32.xlu1 %v1202_v31, %s3018_s24  ;;  %v811_v58 = vsel %vm339_vm3, %v810_v61, %v806_v57  ;;  %v1360_v26 = vrot.slane %v1354_v19, 6  ;;  %v1279_v12 = vsel %vm870_vm13, %v1276_v30, %v1278_v20  ;;  %v1299_v28 = vrot.slane %v1292_v21, 3 }
 0x133   : > { %v825_v62 = vsel %vm488_vm10, %v811_v58, %v824_v10  ;;  %v1318_v8 = vrot.slane %v1312_v3, 4  ;;  %v1317_v35 = vrot.slane %v1311_v36, 4  ;;  %v1313_v41 = vmul.f32 %v1310_v46, %v3425_v59 }
 0x134   : > { %v829_v22 = vsel %vm499_vm11, 0.0, %v825_v62  ;;  %v1359_v39 = vrot.slane %v1353_v24, 6  ;;  %v1387_v29 = vstv %s2871_s19  ;;  %v1373_v33 = vstv %s3760_s20  ;;  %s3936_s19 = sld [smem:[#allocation3 + $0x15]]  ;;  %s3943_s20 = sld [smem:[#allocation3 + $0x1c]] }
 0x135   : > { %1280 = vrot.lane.b32.xlu0 %v1277_v49, %s3019_s16  ;;  %v831_v14 = vsel %vm502_vm12, %v829_v22, 0.0  ;;  %v1319_v15 = vsel %vm906_vm2, %v1317_v35, %v1318_v8  ;;  %v1389_v34 = vmul.f32 %v1387_v29, %v3404_v45  ;;  %v1300_v47 = vsel %vm888_vm14, %v1297_v4, %v1299_v28 }
 0x136   : > { %1226 = vrot.lane.b32.xlu1 %v1223_v11, %s3018_s24  ;;  %834 = vst.msk [vmem:[#allocation2 + $0x23] sm:$0xff] %vm190_vm1, %v831_v14  ;;  %v1361_v63 = vsel %vm942_vm6, %v1359_v39, %v1360_v26  ;;  %v1320_v44 = vrot.slane %v1313_v41, 4  ;;  %v1334_v55 = vmul.f32 %v1331_v37, %v3425_v59  ;;  %v1388_v6 = vmul.f32 %v1387_v29, %v3339_v32 }
 0x137   : > { %v1374_v42 = vmul.f32 %v1373_v33, %v3339_v32  ;;  %v1408_v43 = vstv %s2872_s21  ;;  %v1395_v50 = vrot.slane %v1389_v34, 1  ;;  %v1355_v56 = vmul.f32 %v1352_v13, %v3425_v59  ;;  %s3952_s21 = sld [smem:[#allocation3 + $0x23]] }
 0x138   : > { %v1410_v51 = vmul.f32 %v1408_v43, %v3404_v45  ;;  %v1321_v53 = vsel %vm906_vm2, %v1318_v8, %v1320_v44  ;;  %v1341_v54 = vrot.slane %v1334_v55, 5  ;;  %v1394_v30 = vrot.slane %v1388_v6, 1 }
 0x139   : > { %1301 = vrot.lane.b32.xlu0 %v1298_v2, %s3019_s16  ;;  %v1409_v52 = vmul.f32 %v1408_v43, %v3339_v32  ;;  %v1429_v48 = vstv %s2873_s22  ;;  %v1362_v18 = vrot.slane %v1355_v56, 6  ;;  %v1450_v60 = vstv %s2874_s25  ;;  %s3962_s22 = sld [smem:[#allocation3 + $0x22]]  ;;  %s3022_s25 = smov 122  }
 0x13a   : > { %1240 = vrot.lane.b32.xlu1 %v1235_v38, %s3019_s16  ;;  %v1396_v10 = vsel %vm852_vm15, %v1394_v30, %v1395_v50  ;;  %v1416_v61 = vrot.slane %v1410_v51, 2  ;;  %v1431_v57 = vmul.f32 %v1429_v48, %v3404_v45  ;;  %v1342_v31 = vsel %vm924_vm0, %v1339_v17, %v1341_v54 }
 0x13b   : > { %v1415_v16 = vrot.slane %v1409_v52, 2  ;;  %v1430_v58 = vmul.f32 %v1429_v48, %v3339_v32  ;;  %v1452_v49 = vmul.f32 %v1450_v60, %v3404_v45  ;;  %v1363_v22 = vsel %vm942_vm6, %v1360_v26, %v1362_v18 }
 0x13c   : > { %v1437_v46 = vrot.slane %v1431_v57, 3  ;;  %v1390_v4 = vmul.f32 %v1387_v29, %v3425_v59  ;;  %v1451_v11 = vmul.f32 %v1450_v60, %v3339_v32  ;;  %v1471_v14 = vstv %s2875_s27  ;;  %s3980_s27 = sld [smem:[#allocation3 + $0x2a]] }
 0x13d   : > { %1322 = vrot.lane.b32.xlu0 %v1319_v15, %s3019_s16  ;;  %v1417_v62 = vsel %vm870_vm13, %v1415_v16, %v1416_v61  ;;  %v1436_v3 = vrot.slane %v1430_v58, 3  ;;  %v1375_v5 = vmul.f32 %v1373_v33, %v3404_v45  ;;  %v1458_v36 = vrot.slane %v1452_v49, 4 }
 0x13e   : > { %1261 = vrot.lane.b32.xlu1 %v1258_v40, %s3019_s16  ;;  %v1473_v37 = vmul.f32 %v1471_v14, %v3404_v45  ;;  %v1397_v2 = vrot.slane %v1390_v4, 1  ;;  %v1411_v38 = vmul.f32 %v1408_v43, %v3425_v59  ;;  %v1457_v8 = vrot.slane %v1451_v11, 4 }
 0x13f   : > { %v1438_v1 = vsel %vm888_vm14, %v1436_v3, %v1437_v46  ;;  %v1472_v7 = vmul.f32 %v1471_v14, %v3339_v32  ;;  %v1492_v27 = vstv %s2876_s28  ;;  %v1432_v17 = vmul.f32 %v1429_v48, %v3425_v59  ;;  %s3992_s28 = sld [smem:[#allocation3 + $0x29]] }
 0x140   : > { %v1459_v0 = vsel %vm906_vm2, %v1457_v8, %v1458_v36  ;;  %v1479_v35 = vrot.slane %v1473_v37, 5  ;;  %v3812_v9 = vmul.f32 %v1492_v27, %v3404_v45  ;;  %v1398_v13 = vsel %vm852_vm15, %v1395_v50, %v1397_v2 }
 0x141   : > { %1343 = vrot.lane.b32.xlu0 %v1340_v25, %s3019_s16  ;;  %v1418_v15 = vrot.slane %v1411_v38, 2  ;;  %v1478_v19 = vrot.slane %v1472_v7, 5  ;;  %v1493_v40 = vmul.f32 %v1492_v27, %v3339_v32  ;;  %v1439_v24 = vrot.slane %v1432_v17, 3 }
 0x142   : > { %1282 = vrot.lane.b32.xlu1 %v1279_v12, %s3019_s16  ;;  %v1500_v21 = vrot.slane %v3812_v9, 6  ;;  %v1453_v25 = vmul.f32 %v1450_v60, %v3425_v59  ;;  %v1527_v12 = vstv %s2878_s29  ;;  %v1513_v41 = vstv %s3814_s30  ;;  %s4037_s29 = sld [smem:[#allocation3 + $0x30]]  ;;  %s4102_s30 = sld [smem:[#allocation3 + $0x39]] }
 0x143   : > { %v1480_v20 = vsel %vm924_vm0, %v1478_v19, %v1479_v35  ;;  %v1419_v23 = vsel %vm870_vm13, %v1416_v61, %v1418_v15  ;;  %v1499_v26 = vrot.slane %v1493_v40, 6  ;;  %v3830_v39 = vmul.f32 %v1527_v12, %v3404_v45 }
 0x144   : > { %v1440_v29 = vsel %vm888_vm14, %v1437_v46, %v1439_v24  ;;  %v1474_v33 = vmul.f32 %v1471_v14, %v3425_v59  ;;  %v1528_v34 = vmul.f32 %v1527_v12, %v3339_v32  ;;  %v1548_v44 = vstv %s2879_s3  ;;  %s4131_s3 = sld [smem:[#allocation3 + $0x32]] }
 0x145   : > { %1364 = vrot.lane.b32.xlu0 %v1361_v63, %s3019_s16  ;;  %v1501_v28 = vsel %vm942_vm6, %v1499_v26, %v1500_v21  ;;  %v1460_v63 = vrot.slane %v1453_v25, 4  ;;  %v1535_v55 = vrot.slane %v3830_v39, 1  ;;  %v3840_v6 = vmul.f32 %v1548_v44, %v3404_v45 }
 0x146   : > { %1303 = vrot.lane.b32.xlu1 %v1300_v47, %s3019_s16  ;;  %v1514_v47 = vmul.f32 %v1513_v41, %v3339_v32  ;;  %v1481_v43 = vrot.slane %v1474_v33, 5  ;;  %v1495_v50 = vmul.f32 %v1492_v27, %v3425_v59  ;;  %v1534_v51 = vrot.slane %v1528_v34, 1 }
 0x147   : > { %v1569_v54 = vstv %s2880_s4  ;;  %v1556_v30 = vrot.slane %v3840_v6, 2  ;;  %v1590_v18 = vstv %s2881_s5  ;;  %v1530_v46 = vmul.f32 %v1527_v12, %v3425_v59  ;;  %s4142_s4 = sld [smem:[#allocation3 + $0x40]]  ;;  %s4154_s5 = sld [smem:[#allocation3 + $0x47]] }
 0x148   : > { %v1536_v56 = vsel %vm852_vm15, %v1534_v51, %v1535_v55  ;;  %v3850_v52 = vmul.f32 %v1569_v54, %v3404_v45  ;;  %v1502_v61 = vrot.slane %v1495_v50, 6  ;;  %v3863_v60 = vmul.f32 %v1590_v18, %v3404_v45 }
 0x149   : > { %1378 = vrot.lane.b32.xlu0 %v1374_v42, %s3020_s26  ;;  %v1461_v42 = vsel %vm906_vm2, %v1458_v36, %v1460_v63  ;;  %v1611_v3 = vstv %s2882_s7  ;;  %v1537_v37 = vrot.slane %v1530_v46, 1  ;;  %v1551_v2 = vmul.f32 %v1548_v44, %v3425_v59  ;;  %s4210_s7 = sld [smem:[#allocation3 + $0x4e]] }
 0x14a   : > { %1324 = vrot.lane.b32.xlu1 %v1321_v53, %s3019_s16  ;;  %v1549_v53 = vmul.f32 %v1548_v44, %v3339_v32  ;;  %v3857_v32 = vld [vmem:[#allocation2] sm:$0xff]  ;;  %v1577_v58 = vrot.slane %v3850_v52, 3  ;;  %v3878_v36 = vmul.f32 %v1611_v3, %v3404_v45  ;;  %v1632_v27 = vstv %s2883_s8  ;;  %v3967_v52 = vld [vmem:[#allocation2 + $0x8] sm:$0xff]  ;;  %s4230_s8 = sld [smem:[#allocation3 + $0x55]] }
 0x14b   : > { %v1612_v8 = vmul.f32 %v3857_v32, %v1611_v3  ;;  %v1538_v15 = vsel %vm852_vm15, %v1535_v55, %v1537_v37  ;;  %v1558_v17 = vrot.slane %v1551_v2, 2  ;;  %v1572_v19 = vmul.f32 %v1569_v54, %v3425_v59 }
 0x14c   : > { %v1555_v57 = vrot.slane %v1549_v53, 2  ;;  %v1619_v9 = vrot.slane %v3878_v36, 5  ;;  %v1653_v34 = vstv %s3895_s12  ;;  %v1614_v6 = vmul.f32 %v1611_v3, %v3425_v59  ;;  %s4333_s12 = sld [smem:[#allocation3 + $0x3a]] }
 0x14d   : > { %1399 = vrot.lane.b32.xlu0 %v1396_v10, %s3020_s26  ;;  %v1482_v10 = vsel %vm924_vm0, %v1479_v35, %v1481_v43  ;;  %v1618_v40 = vrot.slane %v1612_v8, 5  ;;  %v1559_v26 = vsel %vm870_vm13, %v1556_v30, %v1558_v17  ;;  %v1579_v12 = vrot.slane %v1572_v19, 3 }
 0x14e   : > { %1345 = vrot.lane.b32.xlu1 %v1342_v31, %s3019_s16  ;;  %v1570_v31 = vmul.f32 %v3857_v32, %v1569_v54  ;;  %v1557_v16 = vsel %vm870_vm13, %v1555_v57, %v1556_v30  ;;  %v1654_v53 = vmul.f32 %v3857_v32, %v1653_v34  ;;  %v3960_v54 = vstv %s3904_s14  ;;  %s4364_s14 = sld [smem:[#allocation3 + $0x41]] }
 0x14f   : > { %v1620_v24 = vsel %vm924_vm0, %v1618_v40, %v1619_v9  ;;  %v1580_v44 = vsel %vm888_vm14, %v1577_v58, %v1579_v12  ;;  %v1621_v57 = vrot.slane %v1614_v6, 5  ;;  %v4019_v8 = vstv %s3943_s20  ;;  %s4543_s20 = sld [smem:[#allocation3 + $0x34]] }
 0x150   : > { %v3852_v48 = vpop.permute.xlu0 %958  ;;  %v1576_v49 = vrot.slane %v1570_v31, 3  ;;  %v1635_v31 = vmul.f32 %v1632_v27, %v3425_v59  ;;  %v4030_v17 = vstv %s3952_s21  ;;  %v4035_v19 = vstv %s3962_s22  ;;  %s4557_s21 = sld [smem:[#allocation3 + $0x42]]  ;;  %s4580_s22 = sld [smem:[#allocation3 + $0x49]] }
 0x151   : > { %1420 = vrot.lane.b32.xlu0 %v1417_v62, %s3020_s26  ;;  %v1503_v62 = vsel %vm942_vm6, %v1500_v21, %v1502_v61  ;;  %v1622_v37 = vsel %vm924_vm0, %v1619_v9, %v1621_v57  ;;  %v4050_v12 = vmul.f32 %v3967_v52, %v4035_v19 }
 0x152   : > { %1366 = vrot.lane.b32.xlu1 %v1363_v22, %s3019_s16  ;;  %v1591_v22 = vmul.f32 %v3857_v32, %v1590_v18  ;;  %v1578_v14 = vsel %vm888_vm14, %v1576_v49, %v1577_v58  ;;  %v5359_v58 = vstv %s3916_s15  ;;  %v1642_v2 = vrot.slane %v1635_v31, 6 }
 0x153   : > { %v840_v40 = vmul.f32 %v3857_v32, %v5359_v58 }
 0x154   : > { %v3870_v4 = vpop.permute.xlu0 %1098  ;;  %v1597_v38 = vrot.slane %v1591_v22, 4 }
 0x155   : > { %1441 = vrot.lane.b32.xlu0 %v1438_v1, %s3020_s26  ;;  %v1515_v1 = vmul.f32 %v1513_v41, %v3404_v45 }
 0x156   : > { %1380 = vrot.lane.b32.xlu1 %v1375_v5, %s3020_s26  ;;  %v1598_v5 = vrot.slane %v3863_v60, 4  ;;  %v3990_v60 = vstv %s3922_s17  ;;  %s4420_s17 = sld [smem:[#allocation3 + $0x4f]] }
 0x158   : > { %v1599_v35 = vsel %vm906_vm2, %v1597_v38, %v1598_v5  ;;  %v4016_v38 = vstv %s3936_s19  ;;  %s4478_s19 = sld [smem:[#allocation3 + $0x5d]] }
 0x159   : > { %1462 = vrot.lane.b32.xlu0 %v1459_v0, %s3020_s26 }
 0x15a   : > { %1401 = vrot.lane.b32.xlu1 %v1398_v13, %s3020_s26  ;;  %v3893_v13 = vmul.f32 %v1632_v27, %v3404_v45 }
 0x15c   : > { %v1640_v25 = vrot.slane %v3893_v13, 6  ;;  %v882_v13 = vmul.f32 %v3857_v32, %v4016_v38 }
 0x15d   : > { %1483 = vrot.lane.b32.xlu0 %v1480_v20, %s3020_s26  ;;  %v1633_v20 = vmul.f32 %v3857_v32, %v1632_v27 }
 0x15e   : > { %1422 = vrot.lane.b32.xlu1 %v1419_v23, %s3020_s26 }
 0x15f   : > { %v1639_v41 = vrot.slane %v1633_v20, 6 }
 0x161   : > { %1504 = vrot.lane.b32.xlu0 %v1501_v28, %s3020_s26  ;;  %v1593_v28 = vmul.f32 %v1590_v18, %v3425_v59  ;;  %v1641_v33 = vsel %vm942_vm6, %v1639_v41, %v1640_v25  ;;  %v3995_v59 = vstv %s3924_s18  ;;  %v4055_v41 = vmul.f32 %v3967_v52, %v4016_v38  ;;  %s4435_s18 = sld [smem:[#allocation3 + $0x56]] }
 0x162   : > { %1443 = vrot.lane.b32.xlu1 %v1440_v29, %s3020_s26  ;;  %v3920_v29 = vstv %s2885_s11  ;;  %v864_v36 = vmul.f32 %v3857_v32, %v3995_v59  ;;  %s4272_s11 = sld [smem:[#allocation3 + $0x5c]] }
 0x163   : > { %v1600_v55 = vrot.slane %v1593_v28, 4  ;;  %v1668_v43 = vmul.f32 %v3857_v32, %v3920_v29 }
 0x165   : > { %1518 = vrot.lane.b32.xlu0 %v1514_v47, %s3021_s6  ;;  %v3934_v47 = vmul.f32 %v3920_v29, %v3404_v45  ;;  %v1601_v61 = vsel %vm906_vm2, %v1598_v5, %v1600_v55  ;;  %v1674_v18 = vrot.slane %v1668_v43, 1  ;;  %v4009_v5 = vmul.f32 %v3967_v52, %v3995_v59 }
 0x166   : > { %1464 = vrot.lane.b32.xlu1 %v1461_v42, %s3020_s26  ;;  %v3941_v42 = vstv %s2843_s13  ;;  %v4066_v43 = vstv %s3980_s27  ;;  %s4356_s13 = sld [smem:[#allocation3 + $0x33]]  ;;  %s4617_s27 = sld [smem:[#allocation3 + $0x50]] }
 0x167   : > { %v3950_v50 = vmul.f32 %v3941_v42, %v3404_v45  ;;  %v1675_v30 = vrot.slane %v3934_v47, 1  ;;  %v3971_v45 = vmul.f32 %v3967_v52, %v3960_v54  ;;  %v5358_v28 = vrot.slane %v4009_v5, 2 }
 0x168   : > { %v4150_v47 = vmul.f32 %v3967_v52, %v4066_v43 }
 0x169   : > { %1539 = vrot.lane.b32.xlu0 %v1536_v56, %s3021_s6  ;;  %v1676_v22 = vsel %vm852_vm15, %v1674_v18, %v1675_v30  ;;  %v1696_v3 = vrot.slane %v3971_v45, 2  ;;  %v936_v45 = vmul.f32 %v3857_v32, %v4066_v43 }
 0x16a   : > { %1485 = vrot.lane.b32.xlu1 %v1482_v10, %s3020_s26  ;;  %v846_v10 = vmul.f32 %v3857_v32, %v3941_v42 }
 0x16d   : > { %1560 = vrot.lane.b32.xlu0 %v1557_v16, %s3021_s6  ;;  %v1689_v16 = vmul.f32 %v3857_v32, %v3960_v54 }
 0x16e   : > { %1506 = vrot.lane.b32.xlu1 %v1503_v62, %s3020_s26  ;;  %v5360_v62 = vrot.slane %v3950_v50, 1 }
 0x16f   : > { %v1695_v27 = vrot.slane %v1689_v16, 2  ;;  %v1655_v16 = vmul.f32 %v3967_v52, %v1653_v34 }
 0x170   : > { %v3872_v11 = vpop.permute.xlu1 %960 }
 0x171   : > { %1581 = vrot.lane.b32.xlu0 %v1578_v14, %s3021_s6  ;;  %v4005_v14 = vmul.f32 %v3967_v52, %v3990_v60 }
 0x172   : > { %1520 = vrot.lane.b32.xlu1 %v1515_v1, %s3021_s6  ;;  %v853_v1 = vrot.slane %v846_v10, 1  ;;  %v1731_v10 = vmul.f32 %v3857_v32, %v4035_v19 }
 0x173   : > { %v3884_v7 = vpop.permute.xlu0 %1000 }
 0x174   : > { %v3886_v0 = vpop.permute.xlu1 %1100 }
 0x175   : > { %1602 = vrot.lane.b32.xlu0 %v1599_v35, %s3021_s6  ;;  %v1710_v35 = vmul.f32 %v3857_v32, %v3990_v60 }
 0x176   : > { %1541 = vrot.lane.b32.xlu1 %v1538_v15, %s3021_s6  ;;  %v855_v15 = vsel %vm852_vm15, %v853_v1, %v5360_v62 }
 0x177   : > { %v3902_v21 = vpop.permute.xlu0 %1021  ;;  %v860_v6 = vadd.f32 %v855_v15, %v840_v40  ;;  %v900_v15 = vmul.f32 %v3857_v32, %v4019_v8 }
 0x178   : > { %v3906_v23 = vpop.permute.xlu1 %979 }
 0x179   : > { %1623 = vrot.lane.b32.xlu0 %v1620_v24, %s3021_s6  ;;  %v1697_v24 = vsel %vm870_vm13, %v1695_v27, %v1696_v3  ;;  %v907_v62 = vrot.slane %v900_v15, 4 }
 0x17a   : > { %1562 = vrot.lane.b32.xlu1 %v1559_v26, %s3021_s6  ;;  %v1717_v26 = vrot.slane %v4005_v14, 3 }
 0x17b   : > { %v3918_v39 = vpop.permute.xlu0 %1042 }
 0x17c   : > { %v3926_v63 = vpop.permute.xlu1 %981 }
 0x17d   : > { %1644 = vrot.lane.b32.xlu0 %v1641_v33, %s3021_s6  ;;  %v1643_v33 = vsel %vm942_vm6, %v1640_v25, %v1642_v2  ;;  %v4075_v25 = vmul.f32 %v3967_v52, %v4019_v8  ;;  %v5363_v2 = vrot.slane %v4055_v41, 3 }
 0x17e   : > { %1583 = vrot.lane.b32.xlu1 %v1580_v44, %s3021_s6  ;;  %v4061_v44 = vld [vmem:[#allocation2 + $0x10] sm:$0x3f] }
 0x17f   : > { %v3954_v51 = vpop.permute.xlu0 %1063  ;;  %v1670_v55 = vmul.f32 %v4061_v44, %v3920_v29  ;;  %v4080_v29 = vstv %s3992_s28  ;;  %s4633_s28 = sld [smem:[#allocation3 + $0x57]] }
 0x180   : > { %v3964_v56 = vpop.permute.xlu1 %1002  ;;  %v4093_v1 = vmul.f32 %v3967_v52, %v4080_v29  ;;  %v1752_v40 = vmul.f32 %v3857_v32, %v4080_v29 }
 0x181   : > { %1658 = vrot.lane.b32.xlu0 %v1654_v53, %s3022_s25  ;;  %v1716_v53 = vrot.slane %v1710_v35, 3  ;;  %v1677_v27 = vrot.slane %v1670_v55, 1  ;;  %v1691_v35 = vmul.f32 %v4061_v44, %v3960_v54  ;;  %v4113_v55 = vmul.f32 %v3967_v52, %v4030_v17 }
 0x182   : > { %1604 = vrot.lane.b32.xlu1 %v1601_v61, %s3021_s6  ;;  %v871_v61 = vrot.slane %v864_v36, 2  ;;  %v1737_v36 = vrot.slane %v1731_v10, 4 }
 0x183   : > { %v3987_v46 = vpop.permute.xlu0 %1084  ;;  %v1718_v18 = vsel %vm888_vm14, %v1716_v53, %v1717_v26  ;;  %v5362_v53 = vrot.slane %v4075_v25, 4 }
 0x184   : > { %v3997_v49 = vpop.permute.xlu1 %1023 }
 0x185   : > { %1679 = vrot.lane.b32.xlu0 %v1676_v22, %s3022_s25  ;;  %v5361_v22 = vrot.slane %v4050_v12, 4 }
 0x186   : > { %1625 = vrot.lane.b32.xlu1 %v1622_v37, %s3021_s6  ;;  %v873_v37 = vsel %vm870_vm13, %v871_v61, %v5358_v28  ;;  %v1698_v28 = vrot.slane %v1691_v35, 2 }
 0x187   : > { %v4032_v9 = vpop.permute.xlu0 %1119  ;;  %v878_v34 = vadd.f32 %v873_v37, %v860_v6  ;;  %v4118_v6 = vstv %s4037_s29  ;;  %v1739_v10 = vsel %vm906_vm2, %v1737_v36, %v5361_v22  ;;  %v1678_v37 = vsel %vm852_vm15, %v1675_v30, %v1677_v27  ;;  %s4675_s29 = sld [smem:[#allocation3 + $0x5e]] }
 0x188   : > { %v4042_v20 = vpop.permute.xlu1 %1044  ;;  %v1712_v36 = vmul.f32 %v4061_v44, %v3990_v60  ;;  %v1758_v22 = vrot.slane %v1752_v40, 5  ;;  %v909_v60 = vsel %vm906_vm2, %v907_v62, %v5362_v53  ;;  %v4165_v40 = vld [vmem:[#allocation2 + $0x18] sm:$0xff]  ;;  %v1699_v62 = vsel %vm870_vm13, %v1696_v3, %v1698_v28 }
 0x189   : > { %1700 = vrot.lane.b32.xlu0 %v1697_v24, %s3022_s25  ;;  %v889_v24 = vrot.slane %v882_v13, 3  ;;  %v5364_v13 = vrot.slane %v4093_v1, 5  ;;  %v4176_v53 = vstv %s4102_s30  ;;  %v848_v28 = vmul.f32 %v4061_v44, %v3941_v42  ;;  %s4733_s30 = sld [smem:[#allocation3 + $0x35]] }
 0x18a   : > { %1646 = vrot.lane.b32.xlu1 %v1643_v33, %s3021_s6  ;;  %v918_v33 = vmul.f32 %v3857_v32, %v4030_v17 }
 0x18b   : > { %v4077_v57 = vpop.permute.xlu0 %1140 }
 0x18c   : > { %v4082_v31 = vpop.permute.xlu1 %1065  ;;  %v925_v27 = vrot.slane %v918_v33, 5  ;;  %v1719_v33 = vrot.slane %v1712_v36, 3 }
 0x18d   : > { %1721 = vrot.lane.b32.xlu0 %v1718_v18, %s3022_s25  ;;  %v4129_v18 = vmul.f32 %v3967_v52, %v4118_v6 }
 0x18e   : > { %1660 = vrot.lane.b32.xlu1 %v1655_v16, %s3022_s25  ;;  %v891_v16 = vsel %vm888_vm14, %v889_v24, %v5363_v2  ;;  %v1773_v24 = vmul.f32 %v3857_v32, %v4118_v6  ;;  %v1720_v42 = vsel %vm888_vm14, %v1717_v26, %v1719_v33 }
 0x18f   : > { %v4115_v54 = vpop.permute.xlu0 %1161  ;;  %v896_v58 = vadd.f32 %v891_v16, %v878_v34  ;;  %v1760_v34 = vsel %vm924_vm0, %v1758_v22, %v5364_v13  ;;  %v5366_v15 = vrot.slane %v4129_v18, 6  ;;  %v4167_v16 = vld [vmem:[#allocation2 + $0x20] sm:$0xff] }
 0x190   : > { %v4121_v61 = vpop.permute.xlu1 %1086  ;;  %v1779_v2 = vrot.slane %v1773_v24, 6  ;;  %v5367_v24 = vstv %s4131_s3  ;;  %v4199_v32 = vmul.f32 %v4176_v53, %v4167_v16 }
 0x191   : > { %1742 = vrot.lane.b32.xlu0 %v1739_v10, %s3022_s25  ;;  %v5365_v10 = vrot.slane %v4113_v55, 5  ;;  %v914_v22 = vadd.f32 %v909_v60, %v896_v58  ;;  %v1919_v60 = vmul.f32 %v4176_v53, %v4165_v40  ;;  %v1905_v14 = vmul.f32 %v5367_v24, %v4165_v40 }
 0x192   : > { %1681 = vrot.lane.b32.xlu1 %v1678_v37, %s3022_s25  ;;  %v1733_v37 = vmul.f32 %v4061_v44, %v4035_v19  ;;  %v1781_v58 = vsel %vm942_vm6, %v1779_v2, %v5366_v15  ;;  %v4208_v2 = vstv %s4142_s4  ;;  %v856_v15 = vrot.slane %v848_v28, 1  ;;  %s4764_s4 = sld [smem:[#allocation3 + $0x4a]] }
 0x193   : > { %v4152_v30 = vpop.permute.xlu0 %1182  ;;  %v927_v13 = vsel %vm924_vm0, %v925_v27, %v5365_v10  ;;  %v943_v10 = vrot.slane %v936_v45, 6  ;;  %v1925_v33 = vrot.slane %v1919_v60, 1  ;;  %v5375_v28 = vrot.slane %v4050_v12, 4 }
 0x194   : > { %v4159_v35 = vpop.permute.xlu1 %1121  ;;  %v1740_v27 = vrot.slane %v1733_v37, 4  ;;  %v1940_v37 = vmul.f32 %v4208_v2, %v4165_v40  ;;  %v1775_v24 = vmul.f32 %v4061_v44, %v4118_v6 }
 0x195   : > { %1763 = vrot.lane.b32.xlu0 %v1760_v34, %s3022_s25  ;;  %v1754_v34 = vmul.f32 %v4061_v44, %v4080_v29 }
 0x196   : > { %1702 = vrot.lane.b32.xlu1 %v1699_v62, %s3022_s25  ;;  %v932_v62 = vadd.f32 %v927_v13, %v914_v22  ;;  %v4228_v13 = vmul.f32 %v4208_v2, %v4167_v16  ;;  %v5374_v22 = vrot.slane %v4150_v47, 6  ;;  %v1741_v60 = vsel %vm906_vm2, %v5375_v28, %v1740_v27 }
 0x197   : > { %v4187_v19 = vpop.permute.xlu0 %1203 }
 0x198   : > { %v4189_v36 = vpop.permute.xlu1 %1142  ;;  %v945_v45 = vsel %vm942_vm6, %v943_v10, %v5374_v22  ;;  %v5376_v10 = vrot.slane %v3950_v50, 1  ;;  %v1946_v50 = vrot.slane %v1940_v37, 2  ;;  %v884_v37 = vmul.f32 %v4061_v44, %v4016_v38 }
 0x199   : > { %5372 = vst [vmem:[#allocation6_spill] sm:$0xff] %v4189_v36  ;;  %1784 = vrot.lane.b32.xlu0 %v1781_v58, %s3022_s25  ;;  %v4219_v58 = vstv %s4154_s5  ;;  %v950_v29 = vadd.f32 %v945_v45, %v932_v62  ;;  %v5378_v45 = vstv %s3916_s15  ;;  %v1782_v36 = vrot.slane %v1775_v24, 6  ;;  %s4375_s15 = sld [smem:[#allocation3 + $0x48]]  ;;  %s4783_s5 = sld [smem:[#allocation3 + $0x51]] }
 0x19a   : > { %1723 = vrot.lane.b32.xlu1 %v1720_v42, %s3022_s25  ;;  %v1761_v42 = vrot.slane %v1754_v34, 5  ;;  %v1961_v12 = vmul.f32 %v4219_v58, %v4165_v40  ;;  %v4253_v27 = vmul.f32 %v4219_v58, %v4167_v16  ;;  %v841_v28 = vmul.f32 %v3967_v52, %v5378_v45 }
 0x19b   : > { %v4213_v3 = vpop.permute.xlu0 %1224  ;;  %v964_v6 = vadd.f32 %v3852_v48, %v950_v29  ;;  %v4270_v48 = vstv %s4210_s7  ;;  %v4274_v29 = vld [vmem:[#allocation2 + $0x28] sm:$0x3f]  ;;  %s4801_s7 = sld [smem:[#allocation3 + $0x58]] }
 0x19c   : > { %v4221_v26 = vpop.permute.xlu1 %1163  ;;  %v5369_v24 = vrot.slane %v4253_v27, 3  ;;  %v1982_v38 = vmul.f32 %v4270_v48, %v4165_v40  ;;  %v1921_v45 = vmul.f32 %v4176_v53, %v4274_v29 }
 0x19d   : > { %5373 = vst [vmem:[#allocation7_spill] sm:$0xff] %v4221_v26  ;;  %1909 = vrot.lane.b32.xlu0 %v1905_v14, %s3017_s23  ;;  %v866_v26 = vmul.f32 %v4061_v44, %v3995_v59  ;;  %v857_v14 = vsel %vm852_vm15, %v5376_v10, %v856_v15  ;;  %v5377_v59 = vrot.slane %v4199_v32, 1  ;;  %v5368_v15 = vrot.slane %v4228_v13, 2 }
 0x19e   : > { %1744 = vrot.lane.b32.xlu1 %v1741_v60, %s3022_s25  ;;  %v5379_v60 = vrot.slane %v4093_v1, 5  ;;  %v985_v52 = vadd.f32 %v3906_v23, %v964_v6  ;;  %v4292_v23 = vmul.f32 %v4270_v48, %v4167_v16 }
 0x19f   : > { %v4247_v22 = vpop.permute.xlu0 %1238  ;;  %v1927_v62 = vsel %vm852_vm15, %v1925_v33, %v5377_v59  ;;  %v874_v33 = vrot.slane %v866_v26, 2  ;;  %v861_v59 = vadd.f32 %v857_v14, %v841_v28  ;;  %v1948_v26 = vsel %vm870_vm13, %v1946_v50, %v5368_v15 }
 0x1a0   : > { %v4256_v34 = vpop.permute.xlu1 %1184  ;;  %v1762_v10 = vsel %vm924_vm0, %v5379_v60, %v1761_v42  ;;  %v1967_v42 = vrot.slane %v1961_v12, 3  ;;  %v4295_v14 = vstv %s4230_s8  ;;  %v5380_v12 = vrot.slane %v4129_v18, 6  ;;  %s4818_s8 = sld [smem:[#allocation3 + $0x5f]] }
 0x1a1   : > { %1930 = vrot.lane.b32.xlu0 %v1927_v62, %s3017_s23  ;;  %v892_v28 = vrot.slane %v884_v37, 3  ;;  %v902_v50 = vmul.f32 %v4061_v44, %v4019_v8  ;;  %v5381_v60 = vrot.slane %v4009_v5, 2  ;;  %v1006_v15 = vadd.f32 %v3884_v7, %v985_v52 }
 0x1a2   : > { %1765 = vrot.lane.b32.xlu1 %v1762_v10, %s3022_s25  ;;  %v1783_v6 = vsel %vm942_vm6, %v5380_v12, %v1782_v36  ;;  %v5382_v36 = vstv %s4131_s3  ;;  %v2003_v53 = vmul.f32 %v4295_v14, %v4165_v40  ;;  %v1969_v5 = vsel %vm888_vm14, %v1967_v42, %v5369_v24  ;;  %s4737_s3 = sld [smem:[#allocation3 + $0x43]] }
 0x1a3   : > { %v4280_v1 = vpop.permute.xlu0 %1259  ;;  %v875_v10 = vsel %vm870_vm13, %v5381_v60, %v874_v33  ;;  %v1906_v12 = vmul.f32 %v5382_v36, %v4167_v16  ;;  %v1988_v8 = vrot.slane %v1982_v38, 4  ;;  %v1989_v7 = vrot.slane %v4292_v23, 4 }
 0x1a4   : > { %v4283_v62 = vpop.permute.xlu1 %1205  ;;  %v4325_v33 = vmul.f32 %v4295_v14, %v4167_v16  ;;  %v1928_v52 = vrot.slane %v1921_v45, 1  ;;  %v910_v60 = vrot.slane %v902_v50, 4  ;;  %v920_v42 = vmul.f32 %v4061_v44, %v4030_v17 }
 0x1a5   : > { %1951 = vrot.lane.b32.xlu0 %v1948_v26, %s3017_s23  ;;  %v879_v26 = vadd.f32 %v875_v10, %v861_v59  ;;  %v1942_v59 = vmul.f32 %v4208_v2, %v4274_v29  ;;  %v5383_v38 = vrot.slane %v4055_v41, 3  ;;  %v1027_v36 = vadd.f32 %v3902_v21, %v1006_v15 }
 0x1a6   : > { %1786 = vrot.lane.b32.xlu1 %v1783_v6, %s3022_s25  ;;  %v4331_v6 = vstv %s4272_s11  ;;  %v2009_v2 = vrot.slane %v2003_v53, 5  ;;  %v1990_v50 = vsel %vm906_vm2, %v1988_v8, %v1989_v7  ;;  %v2010_v17 = vrot.slane %v4325_v33, 5  ;;  %s4830_s11 = sld [smem:[#allocation3 + $0x38]] }
 0x1a7   : > { %v4310_v18 = vpop.permute.xlu0 %1280  ;;  %v893_v10 = vsel %vm888_vm14, %v5383_v38, %v892_v28  ;;  %v2024_v41 = vmul.f32 %v4331_v6, %v4165_v40  ;;  %v4354_v21 = vmul.f32 %v4331_v6, %v4167_v16  ;;  %v5384_v15 = vrot.slane %v4199_v32, 1 }
 0x1a8   : > { %v4317_v37 = vpop.permute.xlu1 %1226  ;;  %v897_v45 = vadd.f32 %v893_v10, %v879_v26  ;;  %v1949_v26 = vrot.slane %v1942_v59, 2  ;;  %v928_v53 = vrot.slane %v920_v42, 5  ;;  %v938_v8 = vmul.f32 %v4061_v44, %v4066_v43 }
 0x1a9   : > { %1972 = vrot.lane.b32.xlu0 %v1969_v5, %s3017_s23  ;;  %v1929_v28 = vsel %vm852_vm15, %v5384_v15, %v1928_v52  ;;  %v5385_v38 = vrot.slane %v4075_v25, 4  ;;  %v2011_v59 = vsel %vm924_vm0, %v2009_v2, %v2010_v17  ;;  %v2030_v44 = vrot.slane %v2024_v41, 6 }
 0x1aa   : > { %1911 = vrot.lane.b32.xlu1 %v1906_v12, %s3017_s23  ;;  %v1963_v12 = vmul.f32 %v4219_v58, %v4274_v29  ;;  %v2031_v43 = vrot.slane %v4354_v21, 6  ;;  %v1984_v42 = vmul.f32 %v4270_v48, %v4274_v29  ;;  %v5387_v2 = vrot.slane %v4113_v55, 5 }
 0x1ab   : > { %v4342_v5 = vpop.permute.xlu0 %1301  ;;  %v911_v10 = vsel %vm906_vm2, %v5385_v38, %v910_v60  ;;  %v4487_v33 = vstv %s4435_s18  ;;  %s4934_s18 = sld [smem:[#allocation3 + $0x5b]] }
 0x1ac   : > { %v4344_v24 = vpop.permute.xlu1 %1240  ;;  %v915_v32 = vadd.f32 %v911_v10, %v897_v45  ;;  %v1970_v60 = vrot.slane %v1963_v12, 3  ;;  %v946_v45 = vrot.slane %v938_v8, 6  ;;  %v929_v41 = vsel %vm924_vm0, %v5387_v2, %v928_v53 }
 0x1ad   : > { %1993 = vrot.lane.b32.xlu0 %v1990_v50, %s3017_s23  ;;  %v1048_v50 = vadd.f32 %v3918_v39, %v1027_v36  ;;  %v5386_v39 = vrot.slane %v4228_v13, 2  ;;  %v4390_v36 = vstv %s4333_s12  ;;  %v2032_v48 = vsel %vm942_vm6, %v2030_v44, %v2031_v43  ;;  %s4852_s12 = sld [smem:[#allocation3 + $0x3f]] }
 0x1ae   : > { %1932 = vrot.lane.b32.xlu1 %v1929_v28, %s3017_s23  ;;  %v933_v28 = vadd.f32 %v929_v41, %v915_v32  ;;  %v2044_v12 = vstv %s4356_s13  ;;  %v2059_v55 = vmul.f32 %v4390_v36, %v4165_v40  ;;  %v5388_v53 = vrot.slane %v4253_v27, 3  ;;  %s4867_s13 = sld [smem:[#allocation3 + $0x46]] }
 0x1af   : > { %v4373_v52 = vpop.permute.xlu0 %1322  ;;  %v1950_v25 = vsel %vm870_vm13, %v5386_v39, %v1949_v26  ;;  %v1069_v15 = vadd.f32 %v3954_v51, %v1048_v50  ;;  %v4409_v51 = vmul.f32 %v4390_v36, %v4167_v16  ;;  %v1991_v38 = vrot.slane %v1984_v42, 4 }
 0x1b0   : > { %v4377_v58 = vpop.permute.xlu1 %1261  ;;  %v1971_v8 = vsel %vm888_vm14, %v5388_v53, %v1970_v60  ;;  %v2005_v10 = vmul.f32 %v4295_v14, %v4274_v29  ;;  %v4418_v50 = vstv %s4364_s14  ;;  %v5389_v32 = vrot.slane %v4150_v47, 6  ;;  %s4876_s14 = sld [smem:[#allocation3 + $0x31]] }
 0x1b1   : > { %2014 = vrot.lane.b32.xlu0 %v2011_v59, %s3017_s23  ;;  %v1090_v44 = vadd.f32 %v3987_v46, %v1069_v15  ;;  %v4433_v60 = vstv %s4375_s15  ;;  %v2065_v42 = vrot.slane %v2059_v55, 1  ;;  %v2066_v47 = vrot.slane %v4409_v51, 1  ;;  %s4895_s15 = sld [smem:[#allocation3 + $0x4d]] }
 0x1b2   : > { %1953 = vrot.lane.b32.xlu1 %v1950_v25, %s3017_s23  ;;  %v947_v59 = vsel %vm942_vm6, %v5389_v32, %v946_v45  ;;  %v2045_v25 = vmul.f32 %v2044_v12, %v4165_v40  ;;  %v2080_v46 = vmul.f32 %v4418_v50, %v4165_v40  ;;  %v4444_v45 = vmul.f32 %v4418_v50, %v4167_v16 }
 0x1b3   : > { %v4397_v13 = vpop.permute.xlu0 %1343  ;;  %v951_v39 = vadd.f32 %v947_v59, %v933_v28  ;;  %v1992_v41 = vsel %vm906_vm2, %v1989_v7, %v1991_v38  ;;  %v2012_v15 = vrot.slane %v2005_v10, 5  ;;  %v2026_v28 = vmul.f32 %v4331_v6, %v4274_v29 }
 0x1b4   : > { %v4399_v26 = vpop.permute.xlu1 %1282  ;;  %v4462_v23 = vmul.f32 %v4433_v60, %v4167_v16  ;;  %v2086_v6 = vrot.slane %v2080_v46, 2  ;;  %v4476_v32 = vstv %s4420_s17  ;;  %v2143_v21 = vmul.f32 %v4487_v33, %v4165_v40  ;;  %s4917_s17 = sld [smem:[#allocation3 + $0x3d]] }
 0x1b5   : > { %2035 = vrot.lane.b32.xlu0 %v2032_v48, %s3017_s23  ;;  %v965_v2 = vadd.f32 %v3872_v11, %v951_v39  ;;  %v1104_v48 = vadd.f32 %v3870_v4, %v1090_v44  ;;  %v2101_v11 = vmul.f32 %v4433_v60, %v4165_v40  ;;  %v2067_v4 = vsel %vm852_vm15, %v2065_v42, %v2066_v47 }
 0x1b6   : > { %1974 = vrot.lane.b32.xlu1 %v1971_v8, %s3017_s23  ;;  %v2087_v8 = vrot.slane %v4444_v45, 2  ;;  %v2013_v38 = vsel %vm924_vm0, %v2010_v17, %v2012_v15  ;;  %v2033_v10 = vrot.slane %v2026_v28, 6  ;;  %v2122_v46 = vmul.f32 %v4476_v32, %v4165_v40 }
 0x1b7   : > { %v4427_v27 = vpop.permute.xlu0 %1364  ;;  %v986_v55 = vadd.f32 %v3926_v63, %v965_v2  ;;  %v1125_v59 = vadd.f32 %v4032_v9, %v1104_v48 }
 0x1b8   : > { %v4437_v14 = vpop.permute.xlu1 %1303  ;;  %v2088_v9 = vsel %vm870_vm13, %v2086_v6, %v2087_v8  ;;  %v2082_v6 = vmul.f32 %v4418_v50, %v4274_v29 }
 0x1b9   : > { %2049 = vrot.lane.b32.xlu0 %v2045_v25, %s3018_s24  ;;  %v1007_v63 = vadd.f32 %v3964_v56, %v986_v55  ;;  %v2107_v56 = vrot.slane %v2101_v11, 3  ;;  %v2108_v25 = vrot.slane %v4462_v23, 3  ;;  %v1146_v17 = vadd.f32 %v4077_v57, %v1125_v59 }
 0x1ba   : > { %1995 = vrot.lane.b32.xlu1 %v1992_v41, %s3017_s23  ;;  %v2034_v57 = vsel %vm942_vm6, %v2031_v43, %v2033_v10  ;;  %v2061_v41 = vmul.f32 %v4390_v36, %v4274_v29  ;;  %v4520_v43 = vmul.f32 %v4487_v33, %v4167_v16  ;;  %v2128_v55 = vrot.slane %v2122_v46, 4 }
 0x1bb   : > { %v4456_v53 = vpop.permute.xlu0 %1378  ;;  %v1028_v44 = vadd.f32 %v3997_v49, %v1007_v63  ;;  %v4499_v49 = vmul.f32 %v4476_v32, %v4167_v16  ;;  %v1167_v15 = vadd.f32 %v4115_v54, %v1146_v17  ;;  %v2149_v10 = vrot.slane %v2143_v21, 5 }
 0x1bc   : > { %v4464_v7 = vpop.permute.xlu1 %1324  ;;  %v2150_v59 = vrot.slane %v4520_v43, 5  ;;  %v2103_v46 = vmul.f32 %v4433_v60, %v4274_v29 }
 0x1bd   : > { %2070 = vrot.lane.b32.xlu0 %v2067_v4, %s3018_s24  ;;  %v1049_v2 = vadd.f32 %v4042_v20, %v1028_v44  ;;  %v2046_v20 = vmul.f32 %v2044_v12, %v4167_v16  ;;  %v1188_v36 = vadd.f32 %v4152_v30, %v1167_v15  ;;  %v2129_v11 = vrot.slane %v4499_v49, 4 }
 0x1be   : > { %2016 = vrot.lane.b32.xlu1 %v2013_v38, %s3017_s23  ;;  %v2068_v4 = vrot.slane %v2061_v41, 1  ;;  %v4536_v30 = vstv %s4478_s19  ;;  %s4936_s19 = sld [smem:[#allocation3 + $0x36]] }
 0x1bf   : > { %v4483_v39 = vpop.permute.xlu0 %1399  ;;  %v1070_v28 = vadd.f32 %v4082_v31, %v1049_v2  ;;  %v2109_v31 = vsel %vm888_vm14, %v2107_v56, %v2108_v25  ;;  %v1209_v63 = vadd.f32 %v4187_v19, %v1188_v36  ;;  %v2130_v50 = vsel %vm906_vm2, %v2128_v55, %v2129_v11  ;;  %v5390_v36 = vld [vmem:[#allocation6_spill] sm:$0xff] }
 0x1c0   : > { %v4490_v42 = vpop.permute.xlu1 %1345  ;;  %v2164_v19 = vmul.f32 %v4536_v30, %v4165_v40  ;;  %v4555_v56 = vmul.f32 %v4536_v30, %v4167_v16 }
 0x1c1   : > { %2091 = vrot.lane.b32.xlu0 %v2088_v9, %s3018_s24  ;;  %v1091_v12 = vadd.f32 %v4121_v61, %v1070_v28  ;;  %v1230_v61 = vadd.f32 %v4213_v3, %v1209_v63  ;;  %v2069_v3 = vsel %vm852_vm15, %v2066_v47, %v2068_v4  ;;  %v2089_v9 = vrot.slane %v2082_v6, 2  ;;  %v5391_v6 = vld [vmem:[#allocation7_spill] sm:$0xff] }
 0x1c2   : > { %2037 = vrot.lane.b32.xlu1 %v2034_v57, %s3017_s23  ;;  %s4529_s23 = sld [smem:[#allocation3 + $0x3b]]  ;;  %v2170_v47 = vrot.slane %v2164_v19, 6  ;;  %v2171_v15 = vrot.slane %v4555_v56, 6  ;;  %v4608_v4 = vstv %s4557_s21  ;;  %s5028_s21 = sld [smem:[#allocation3 + $0x52]] }
 0x1c3   : > { %v4511_v48 = vpop.permute.xlu0 %1420  ;;  %v1105_v17 = vadd.f32 %v3886_v0, %v1091_v12  ;;  %v1244_v2 = vadd.f32 %v4247_v22, %v1230_v61  ;;  %v2151_v0 = vsel %vm924_vm0, %v2149_v10, %v2150_v59  ;;  %v2090_v60 = vsel %vm870_vm13, %v2087_v8, %v2089_v9 }
 0x1c4   : > { %v4523_v54 = vpop.permute.xlu1 %1366  ;;  %v2184_v12 = vstv %s4543_s20  ;;  %v2145_v61 = vmul.f32 %v4487_v33, %v4274_v29  ;;  %s4982_s20 = sld [smem:[#allocation3 + $0x4b]] }
 0x1c5   : > { %2112 = vrot.lane.b32.xlu0 %v2109_v31, %s3018_s24  ;;  %v1265_v41 = vadd.f32 %v4280_v1, %v1244_v2  ;;  %v1126_v22 = vadd.f32 %v4159_v35, %v1105_v17  ;;  %v2124_v1 = vmul.f32 %v4476_v32, %v4274_v29  ;;  %v2172_v32 = vsel %vm942_vm6, %v2170_v47, %v2171_v15 }
 0x1c6   : > { %2051 = vrot.lane.b32.xlu1 %v2046_v20, %s3018_s24  ;;  %v2110_v20 = vrot.slane %v2103_v46, 3  ;;  %v2185_v23 = vmul.f32 %v2184_v12, %v4165_v40  ;;  %v4640_v46 = vstv %s4580_s22  ;;  %v2166_v47 = vmul.f32 %v4536_v30, %v4274_v29  ;;  %s5051_s22 = sld [smem:[#allocation3 + $0x59]] }
 0x1c7   : > { %v4540_v38 = vpop.permute.xlu0 %1441  ;;  %v1286_v21 = vadd.f32 %v4310_v18, %v1265_v41  ;;  %v1147_v31 = vadd.f32 %v5390_v36, %v1126_v22  ;;  %v2131_v10 = vrot.slane %v2124_v1, 4  ;;  %v2152_v41 = vrot.slane %v2145_v61, 5 }
 0x1c8   : > { %v4546_v44 = vpop.permute.xlu1 %1380  ;;  %v4578_v28 = vstv %s4529_s23  ;;  %v2241_v49 = vmul.f32 %v4640_v46, %v4165_v40  ;;  %v4673_v36 = vstv %s4617_s27  ;;  %s4943_s23 = sld [smem:[#allocation3 + $0x44]]  ;;  %s5091_s27 = sld [smem:[#allocation3 + $0x60]] }
 0x1c9   : > { %2133 = vrot.lane.b32.xlu0 %v2130_v50, %s3018_s24  ;;  %v2199_v35 = vmul.f32 %v4578_v28, %v4165_v40  ;;  %v1307_v45 = vadd.f32 %v4342_v5, %v1286_v21  ;;  %v4605_v18 = vmul.f32 %v4578_v28, %v4167_v16  ;;  %v1168_v63 = vadd.f32 %v5391_v6, %v1147_v31 }
 0x1ca   : > { %2072 = vrot.lane.b32.xlu1 %v2069_v3, %s3018_s24  ;;  %v2111_v5 = vsel %vm888_vm14, %v2108_v25, %v2110_v20  ;;  %v2220_v25 = vmul.f32 %v4608_v4, %v4165_v40  ;;  %v4631_v3 = vmul.f32 %v4608_v4, %v4167_v16  ;;  %v2153_v21 = vsel %vm924_vm0, %v2150_v59, %v2152_v41 }
 0x1cb   : > { %v4568_v57 = vpop.permute.xlu0 %1462  ;;  %v1328_v50 = vadd.f32 %v4373_v52, %v1307_v45  ;;  %v1189_v19 = vadd.f32 %v4256_v34, %v1168_v63  ;;  %v2205_v9 = vrot.slane %v2199_v35, 1  ;;  %v2206_v34 = vrot.slane %v4605_v18, 1 }
 0x1cc   : > { %v4574_v51 = vpop.permute.xlu1 %1401  ;;  %v2227_v20 = vrot.slane %v4631_v3, 2  ;;  %v2247_v43 = vrot.slane %v2241_v49, 3 }
 0x1cd   : > { %2154 = vrot.lane.b32.xlu0 %v2151_v0, %s3018_s24  ;;  %v1349_v52 = vadd.f32 %v4397_v13, %v1328_v50  ;;  %v1210_v2 = vadd.f32 %v4283_v62, %v1189_v19  ;;  %v2132_v0 = vsel %vm906_vm2, %v2129_v11, %v2131_v10  ;;  %v2226_v62 = vrot.slane %v2220_v25, 2 }
 0x1ce   : > { %2093 = vrot.lane.b32.xlu1 %v2090_v60, %s3018_s24  ;;  %v2186_v50 = vmul.f32 %v2184_v12, %v4167_v16 }
 0x1cf   : > { %v4592_v55 = vpop.permute.xlu0 %1483  ;;  %v1370_v13 = vadd.f32 %v4427_v27, %v1349_v52  ;;  %v1231_v22 = vadd.f32 %v4317_v37, %v1210_v2  ;;  %v2207_v27 = vsel %vm852_vm15, %v2205_v9, %v2206_v34  ;;  %v4665_v37 = vmul.f32 %v4640_v46, %v4167_v16 }
 0x1d0   : > { %v4598_v8 = vpop.permute.xlu1 %1422  ;;  %v4727_v2 = vstv %s4675_s29  ;;  %s5166_s29 = sld [smem:[#allocation3 + $0x45]] }
 0x1d1   : > { %2175 = vrot.lane.b32.xlu0 %v2172_v32, %s3018_s24  ;;  %v1384_v11 = vadd.f32 %v4456_v53, %v1370_v13  ;;  %v1245_v30 = vadd.f32 %v4344_v24, %v1231_v22  ;;  %v2173_v53 = vrot.slane %v2166_v47, 6  ;;  %v2228_v24 = vsel %vm870_vm13, %v2226_v62, %v2227_v20 }
 0x1d2   : > { %2114 = vrot.lane.b32.xlu1 %v2111_v5, %s3018_s24  ;;  %v4684_v32 = vstv %s4633_s28  ;;  %v2248_v63 = vrot.slane %v4665_v37, 3  ;;  %v2304_v62 = vmul.f32 %v4727_v2, %v4165_v40  ;;  %s5160_s28 = sld [smem:[#allocation3 + $0x37]] }
 0x1d3   : > { %v4622_v17 = vpop.permute.xlu0 %1504  ;;  %v1405_v31 = vadd.f32 %v4483_v39, %v1384_v11  ;;  %v1266_v35 = vadd.f32 %v4377_v58, %v1245_v30  ;;  %v2262_v39 = vmul.f32 %v4673_v36, %v4165_v40  ;;  %v4694_v58 = vmul.f32 %v4673_v36, %v4167_v16 }
 0x1d4   : > { %v4636_v33 = vpop.permute.xlu1 %1443  ;;  %v2174_v10 = vsel %vm942_vm6, %v2171_v15, %v2173_v53  ;;  %v4713_v56 = vmul.f32 %v4684_v32, %v4167_v16  ;;  %v2222_v15 = vmul.f32 %v4608_v4, %v4274_v29  ;;  %v2249_v12 = vsel %vm888_vm14, %v2247_v43, %v2248_v63 }
 0x1d5   : > { %2189 = vrot.lane.b32.xlu0 %v2185_v23, %s3019_s16  ;;  %v1426_v59 = vadd.f32 %v4511_v48, %v1405_v31  ;;  %v1287_v5 = vadd.f32 %v4399_v26, %v1266_v35  ;;  %v2201_v48 = vmul.f32 %v4578_v28, %v4274_v29  ;;  %v2283_v23 = vmul.f32 %v4684_v32, %v4165_v40 }
 0x1d6   : > { %2135 = vrot.lane.b32.xlu1 %v2132_v0, %s3018_s24  ;;  %v2269_v25 = vrot.slane %v4694_v58, 4  ;;  %v2290_v47 = vrot.slane %v4713_v56, 5  ;;  %v2243_v11 = vmul.f32 %v4640_v46, %v4274_v29  ;;  %v2264_v35 = vmul.f32 %v4673_v36, %v4274_v29 }
 0x1d7   : > { %v4652_v60 = vpop.permute.xlu0 %1518  ;;  %v1447_v61 = vadd.f32 %v4540_v38, %v1426_v59  ;;  %v1308_v19 = vadd.f32 %v4437_v14, %v1287_v5  ;;  %v2268_v14 = vrot.slane %v2262_v39, 4  ;;  %v2208_v9 = vrot.slane %v2201_v48, 1 }
 0x1d8   : > { %v4658_v1 = vpop.permute.xlu1 %1464  ;;  %v2289_v41 = vrot.slane %v2283_v23, 5  ;;  %v2250_v31 = vrot.slane %v2243_v11, 3  ;;  %v2324_v59 = vstv %s4733_s30  ;;  %v4850_v11 = vstv %s4801_s7  ;;  %s5232_s30 = sld [smem:[#allocation3 + $0x53]] }
 0x1d9   : > { %2210 = vrot.lane.b32.xlu0 %v2207_v27, %s3019_s16  ;;  %v1468_v38 = vadd.f32 %v4568_v57, %v1447_v61  ;;  %v1329_v52 = vadd.f32 %v4464_v7, %v1308_v19  ;;  %v2229_v7 = vrot.slane %v2222_v15, 2  ;;  %v2271_v61 = vrot.slane %v2264_v35, 4 }
 0x1da   : > { %2156 = vrot.lane.b32.xlu1 %v2153_v21, %s3018_s24  ;;  %v2251_v48 = vsel %vm888_vm14, %v2248_v63, %v2250_v31  ;;  %v2325_v37 = vmul.f32 %v2324_v59, %v4165_v40  ;;  %v4815_v15 = vstv %s4764_s4  ;;  %s5276_s4 = sld [smem:[#allocation3 + $0x61]] }
 0x1db   : > { %v1540_v45 = vpop.permute.xlu0 %1539  ;;  %v1489_v57 = vadd.f32 %v4592_v55, %v1468_v38  ;;  %v1350_v4 = vadd.f32 %v4490_v42, %v1329_v52  ;;  %v2270_v55 = vsel %vm906_vm2, %v2268_v14, %v2269_v25  ;;  %v4749_v42 = vmul.f32 %v4727_v2, %v4167_v16 }
 0x1dc   : > { %v4687_v6 = vpop.permute.xlu1 %1485  ;;  %v2230_v46 = vsel %vm870_vm13, %v2227_v20, %v2229_v7  ;;  %v4781_v20 = vstv %s4737_s3  ;;  %v2272_v52 = vsel %vm906_vm2, %v2269_v25, %v2271_v61  ;;  %v4836_v25 = vmul.f32 %v4815_v15, %v4167_v16  ;;  %s5260_s3 = sld [smem:[#allocation3 + $0x5a]] }
 0x1dd   : > { %2231 = vrot.lane.b32.xlu0 %v2228_v24, %s3019_s16  ;;  %v1510_v13 = vadd.f32 %v4622_v17, %v1489_v57  ;;  %v1371_v49 = vadd.f32 %v4523_v54, %v1350_v4  ;;  %v2209_v17 = vsel %vm852_vm15, %v2206_v34, %v2208_v9  ;;  %v2291_v54 = vsel %vm924_vm0, %v2289_v41, %v2290_v47 }
 0x1de   : > { %2177 = vrot.lane.b32.xlu1 %v2174_v10, %s3018_s24  ;;  %s4729_s24 = sld [smem:[#allocation3 + $0x3c]]  ;;  %v2311_v53 = vrot.slane %v4749_v42, 6  ;;  %v4812_v63 = vmul.f32 %v4781_v20, %v4167_v16  ;;  %v2306_v57 = vmul.f32 %v4727_v2, %v4274_v29  ;;  %v2381_v41 = vmul.f32 %v4815_v15, %v4165_v40 }
 0x1df   : > { %v1561_v26 = vpop.permute.xlu0 %1560  ;;  %v1524_v27 = vadd.f32 %v4652_v60, %v1510_v13  ;;  %v1385_v30 = vadd.f32 %v4546_v44, %v1371_v49  ;;  %v2310_v60 = vrot.slane %v2304_v62, 6  ;;  %v4839_v2 = vstv %s4783_s5  ;;  %s2947_s5 = sshll.u32 %s5395_s10, 4 }
 0x1e0   : > { %v4718_v28 = vpop.permute.xlu1 %1506  ;;  %v2367_v58 = vrot.slane %v4812_v63, 2  ;;  %v2362_v31 = vmul.f32 %v4781_v20, %v4274_v29 }
 0x1e1   : > { %2252 = vrot.lane.b32.xlu0 %v2249_v12, %s3019_s16  ;;  %v1545_v18 = vadd.f32 %v1540_v45, %v1524_v27  ;;  %v1406_v44 = vadd.f32 %v4574_v51, %v1385_v30  ;;  %v2312_v36 = vsel %vm942_vm6, %v2310_v60, %v2311_v53  ;;  %v2402_v27 = vmul.f32 %v4839_v2, %v4165_v40 }
 0x1e2   : > { %2191 = vrot.lane.b32.xlu1 %v2186_v50, %s3019_s16  ;;  %v2285_v50 = vmul.f32 %v4684_v32, %v4274_v29 }
 0x1e3   : > { %v1582_v0 = vpop.permute.xlu0 %1581  ;;  %v1566_v43 = vadd.f32 %v1561_v26, %v1545_v18  ;;  %v1427_v45 = vadd.f32 %v4598_v8, %v1406_v44  ;;  %v2360_v26 = vmul.f32 %v4781_v20, %v4165_v40  ;;  %v2388_v18 = vrot.slane %v4836_v25, 3 }
 0x1e4   : > { %v4740_v22 = vpop.permute.xlu1 %1520  ;;  %v2338_v24 = vstv %s4729_s24  ;;  %v2292_v9 = vrot.slane %v2285_v50, 5  ;;  %v2423_v44 = vmul.f32 %v4850_v11, %v4165_v40  ;;  %v2369_v50 = vrot.slane %v2362_v31, 2  ;;  %s5208_s24 = sld [smem:[#allocation3 + $0x4c]] }
 0x1e5   : > { %2273 = vrot.lane.b32.xlu0 %v2270_v55, %s3019_s16  ;;  %v1587_v39 = vadd.f32 %v1582_v0, %v1566_v43  ;;  %v2339_v5 = vmul.f32 %v2338_v24, %v4165_v40  ;;  %v4792_v10 = vmul.f32 %v2338_v24, %v4167_v16  ;;  %v1448_v8 = vadd.f32 %v4636_v33, %v1427_v45 }
 0x1e6   : > { %2212 = vrot.lane.b32.xlu1 %v2209_v17, %s3019_s16  ;;  %v2366_v0 = vrot.slane %v2360_v26, 2  ;;  %v2313_v17 = vrot.slane %v2306_v57, 6  ;;  %v2341_v30 = vmul.f32 %v2338_v24, %v4274_v29  ;;  %v2326_v43 = vmul.f32 %v2324_v59, %v4167_v16 }
 0x1e7   : > { %v1603_v21 = vpop.permute.xlu0 %1602  ;;  %v1469_v33 = vadd.f32 %v4658_v1, %v1448_v8  ;;  %v2345_v12 = vrot.slane %v2339_v5, 1  ;;  %v2346_v14 = vrot.slane %v4792_v10, 1  ;;  %v4888_v45 = vmul.f32 %v4850_v11, %v4167_v16 }
 0x1e8   : > { %v4766_v34 = vpop.permute.xlu1 %1541  ;;  %v1608_v19 = vadd.f32 %v1603_v21, %v1587_v39  ;;  %v2368_v21 = vsel %vm870_vm13, %v2366_v0, %v2367_v58  ;;  %v2314_v24 = vsel %vm942_vm6, %v2311_v53, %v2313_v17  ;;  %v2348_v39 = vrot.slane %v2341_v30, 1 }
 0x1e9   : > { %2294 = vrot.lane.b32.xlu0 %v2291_v54, %s3019_s16  ;;  %v1490_v1 = vadd.f32 %v4687_v6, %v1469_v33  ;;  %v2347_v62 = vsel %vm852_vm15, %v2345_v12, %v2346_v14  ;;  %v2387_v54 = vrot.slane %v2381_v41, 3  ;;  %v2429_v61 = vrot.slane %v2423_v44, 5 }
 0x1ea   : > { %2233 = vrot.lane.b32.xlu1 %v2230_v46, %s3019_s16  ;;  %v2430_v33 = vrot.slane %v4888_v45, 5  ;;  %v4932_v57 = vstv %s4867_s13  ;;  %v4963_v17 = vstv %s4895_s15  ;;  %v2404_v25 = vmul.f32 %v4839_v2, %v4274_v29 }
 0x1eb   : > { %v1624_v3 = vpop.permute.xlu0 %1623  ;;  %v1511_v6 = vadd.f32 %v4718_v28, %v1490_v1  ;;  %v2293_v28 = vsel %vm924_vm0, %v2290_v47, %v2292_v9  ;;  %v2389_v59 = vsel %vm888_vm14, %v2387_v54, %v2388_v18  ;;  %v4992_v31 = vstv %s4917_s17 }
 0x1ec   : > { %v4785_v51 = vpop.permute.xlu1 %1562  ;;  %v1629_v32 = vadd.f32 %v1624_v3, %v1608_v19  ;;  %v2408_v3 = vrot.slane %v2402_v27, 4  ;;  %v2383_v19 = vmul.f32 %v4815_v15, %v4274_v29 }
 0x1ed   : > { %2315 = vrot.lane.b32.xlu0 %v2312_v36, %s3019_s16  ;;  %v1525_v49 = vadd.f32 %v4740_v22, %v1511_v6  ;;  %v4859_v22 = vmul.f32 %v4839_v2, %v4167_v16 }
 0x1ee   : > { %2254 = vrot.lane.b32.xlu1 %v2251_v48, %s3019_s16  ;;  %v2390_v0 = vrot.slane %v2383_v19, 3 }
 0x1ef   : > { %v1645_v23 = vpop.permute.xlu0 %1644  ;;  %v1546_v56 = vadd.f32 %v4766_v34, %v1525_v49  ;;  %v4874_v34 = vstv %s4818_s8  ;;  %v2409_v20 = vrot.slane %v4859_v22, 4 }
 0x1f0   : > { %v1584_v38 = vpop.permute.xlu1 %1583  ;;  %v1650_v4 = vadd.f32 %v1645_v23, %v1629_v32  ;;  %v2444_v36 = vmul.f32 %v4874_v34, %v4165_v40  ;;  %v4904_v5 = vmul.f32 %v4874_v34, %v4167_v16  ;;  %v2349_v32 = vsel %vm852_vm15, %v2346_v14, %v2348_v39  ;;  %v5007_v39 = vld [vmem:[#allocation2 + $0x18] sm:$0xff] }
 0x1f1   : > { %2329 = vrot.lane.b32.xlu0 %v2325_v37, %s3020_s26  ;;  %v1567_v35 = vadd.f32 %v4785_v51, %v1546_v56  ;;  %v4893_v51 = vstv %s4830_s11  ;;  %v4915_v37 = vstv %s4852_s12  ;;  %v2410_v15 = vsel %vm906_vm2, %v2408_v3, %v2409_v20  ;;  %s157_s11 = scalar_lea.vmem %s5355_s2, %s2947_s5 }
 0x1f2   : > { %2275 = vrot.lane.b32.xlu1 %v2272_v52, %s3019_s16  ;;  %v1803_v23 = vmul.f32 %v4893_v51, %v4165_v40  ;;  %v2450_v52 = vrot.slane %v2444_v36, 6  ;;  %v2451_v9 = vrot.slane %v4904_v5, 6  ;;  %v1796_v14 = vstv %s4876_s14 }
 0x1f3   : > { %v1659_v7 = vpop.permute.xlu0 %1658  ;;  %v1588_v42 = vadd.f32 %v1584_v38, %v1567_v35  ;;  %v4928_v38 = vmul.f32 %v4893_v51, %v4167_v16  ;;  %v4941_v41 = vmul.f32 %v4915_v37, %v4165_v40  ;;  %v4956_v49 = vmul.f32 %v4915_v37, %v4167_v16 }
 0x1f4   : > { %v1664_v13 = vadd.f32 %v1659_v7, %v1650_v4  ;;  %v1605_v55 = vpop.permute.xlu1 %1604  ;;  %v2431_v7 = vsel %vm924_vm0, %v2429_v61, %v2430_v33  ;;  %v1797_v30 = vmul.f32 %v1796_v14, %v4165_v40  ;;  %v4973_v56 = vmul.f32 %v4932_v57, %v4167_v16 }
 0x1f5   : > { %2350 = vrot.lane.b32.xlu0 %v2347_v62, %s3020_s26  ;;  %v1609_v26 = vadd.f32 %v1605_v55, %v1588_v42  ;;  %v1809_v55 = vrot.slane %v1803_v23, 1  ;;  %v1810_v62 = vrot.slane %v4928_v38, 1  ;;  %v2391_v54 = vsel %vm888_vm14, %v2388_v18, %v2390_v0 }
 0x1f6   : > { %2296 = vrot.lane.b32.xlu1 %v2293_v28, %s3019_s16  ;;  %v4960_v28 = vmul.f32 %v4932_v57, %v4165_v40  ;;  %v4987_v16 = vmul.f32 %v4963_v17, %v4165_v40  ;;  %v1827_v35 = vrot.slane %v4956_v49, 2  ;;  %v1844_v3 = vrot.slane %v4973_v56, 3 }
 0x1f7   : > { %v1680_v47 = vpop.permute.xlu0 %1679  ;;  %v1811_v18 = vsel %vm852_vm15, %v1809_v55, %v1810_v62  ;;  %v2411_v23 = vrot.slane %v2404_v25, 4 }
 0x1f8   : > { %v1685_v46 = vadd.f32 %v1680_v47, %v1664_v13  ;;  %v1626_v60 = vpop.permute.xlu1 %1625  ;;  %v2370_v13 = vsel %vm870_vm13, %v2367_v58, %v2369_v50  ;;  %v2452_v58 = vsel %vm942_vm6, %v2450_v52, %v2451_v9  ;;  %v5022_v50 = vstv %s4943_s23 }
 0x1f9   : > { %2371 = vrot.lane.b32.xlu0 %v2368_v21, %s3020_s26  ;;  %v1630_v12 = vadd.f32 %v1626_v60, %v1609_v26  ;;  %v1860_v26 = vrot.slane %v4987_v16, 4  ;;  %v2500_v0 = vmul.f32 %v5007_v39, %v5022_v50 }
 0x1fa   : > { %2317 = vrot.lane.b32.xlu1 %v2314_v24, %s3019_s16  ;;  %s4908_s16 = sld [smem:[#allocation3 + $0x54]]  ;;  %v1843_v24 = vrot.slane %v4960_v28, 3  ;;  %v5055_v28 = vstv %s4982_s20 }
 0x1fb   : > { %v1701_v53 = vpop.permute.xlu0 %1700 }
 0x1fc   : > { %v1706_v8 = vadd.f32 %v1701_v53, %v1685_v46  ;;  %v1647_v48 = vpop.permute.xlu1 %1646  ;;  %v1826_v46 = vrot.slane %v4941_v41, 2  ;;  %v5012_v53 = vstv %s4934_s18 }
 0x1fd   : > { %2392 = vrot.lane.b32.xlu0 %v2389_v59, %s3020_s26  ;;  %v1651_v6 = vadd.f32 %v1647_v48, %v1630_v12  ;;  %v2464_v59 = vstv %s4936_s19  ;;  %v2479_v48 = vmul.f32 %v5007_v39, %v4992_v31 }
 0x1fe   : > { %2331 = vrot.lane.b32.xlu1 %v2326_v43, %s3020_s26  ;;  %v5000_v43 = vld [vmem:[#allocation2 + $0x20] sm:$0xff]  ;;  %v1828_v25 = vsel %vm870_vm13, %v1826_v46, %v1827_v35 }
 0x1ff   : > { %v1722_v1 = vpop.permute.xlu0 %1721  ;;  %v5004_v40 = vmul.f32 %v5000_v43, %v4963_v17  ;;  %v5019_v61 = vmul.f32 %v5000_v43, %v4992_v31  ;;  %v5040_v52 = vmul.f32 %v5000_v43, %v5012_v53  ;;  %v5049_v41 = vmul.f32 %v5000_v43, %v5022_v50 }
 0x200   : > { %v1727_v4 = vadd.f32 %v1722_v1, %v1706_v8  ;;  %v1661_v10 = vpop.permute.xlu1 %1660  ;;  %v4980_v60 = vstv %s4908_s16  ;;  %v1888_v1 = vmul.f32 %v5007_v39, %v5012_v53  ;;  %v5082_v46 = vmul.f32 %v5000_v43, %v5055_v28 }
 0x201   : > { %2413 = vrot.lane.b32.xlu0 %v2410_v15, %s3020_s26  ;;  %v1665_v63 = vadd.f32 %v1661_v10, %v1651_v6  ;;  %v1871_v42 = vmul.f32 %v5007_v39, %v4980_v60  ;;  %v2425_v15 = vmul.f32 %v4850_v11, %v4274_v29  ;;  %v5034_v12 = vmul.f32 %v5000_v43, %v4980_v60 }
 0x202   : > { %2352 = vrot.lane.b32.xlu1 %v2349_v32, %s3020_s26  ;;  %v1861_v32 = vrot.slane %v5004_v40, 4  ;;  %v2465_v10 = vmul.f32 %v5007_v39, %v2464_v59  ;;  %v2486_v55 = vrot.slane %v5019_v61, 1 }
 0x203   : > { %v1743_v27 = vpop.permute.xlu0 %1742 }
 0x204   : > { %v1748_v47 = vadd.f32 %v1743_v27, %v1727_v4  ;;  %v1682_v21 = vpop.permute.xlu1 %1681  ;;  %v1877_v4 = vrot.slane %v1871_v42, 5  ;;  %v2412_v27 = vsel %vm906_vm2, %v2409_v20, %v2411_v23  ;;  %v2506_v20 = vrot.slane %v2500_v0, 2 }
 0x205   : > { %v1686_v44 = vadd.f32 %v1682_v21, %v1665_v63  ;;  %2434 = vrot.lane.b32.xlu0 %v2431_v7, %s3020_s26  ;;  %v1878_v21 = vrot.slane %v5034_v12, 5 }
 0x206   : > { %2373 = vrot.lane.b32.xlu1 %v2370_v13, %s3020_s26  ;;  %v2485_v13 = vrot.slane %v2479_v48, 1 }
 0x207   : > { %v1764_v2 = vpop.permute.xlu0 %1763  ;;  %v1879_v23 = vsel %vm924_vm0, %v1877_v4, %v1878_v21  ;;  %v5111_v4 = vstv %s5051_s22 }
 0x208   : > { %v1769_v36 = vadd.f32 %v1764_v2, %v1748_v47  ;;  %v1703_v8 = vpop.permute.xlu1 %1702  ;;  %v2446_v47 = vmul.f32 %v4874_v34, %v4274_v29  ;;  %v2507_v2 = vrot.slane %v5049_v41, 2  ;;  %v2521_v29 = vmul.f32 %v5007_v39, %v5055_v28 }
 0x209   : > { %v1707_v19 = vadd.f32 %v1703_v8, %v1686_v44  ;;  %2455 = vrot.lane.b32.xlu0 %v2452_v58, %s3020_s26  ;;  %v2432_v58 = vrot.slane %v2425_v15, 5  ;;  %v1895_v44 = vrot.slane %v5040_v52, 6  ;;  %v1845_v34 = vsel %vm888_vm14, %v1843_v24, %v1844_v3 }
 0x20a   : > { %2394 = vrot.lane.b32.xlu1 %v2391_v54, %s3020_s26  ;;  %v1894_v54 = vrot.slane %v1888_v1, 6  ;;  %v5089_v24 = vstv %s5028_s21  ;;  %v2508_v1 = vsel %vm870_vm13, %v2506_v20, %v2507_v2 }
 0x20b   : > { %v1785_v11 = vpop.permute.xlu0 %1784  ;;  %v2433_v48 = vsel %vm924_vm0, %v2430_v33, %v2432_v58  ;;  %v1798_v58 = vmul.f32 %v5000_v43, %v1796_v14  ;;  %v2466_v14 = vmul.f32 %v5000_v43, %v2464_v59 }
 0x20c   : > { %v1790_v6 = vadd.f32 %v1785_v11, %v1769_v36  ;;  %v1724_v7 = vpop.permute.xlu1 %1723  ;;  %v2487_v36 = vsel %vm852_vm15, %v2485_v13, %v2486_v55  ;;  %v1896_v15 = vsel %vm942_vm6, %v1894_v54, %v1895_v44  ;;  %v5106_v11 = vld [vmem:[#allocation2 + $0x28] sm:$0x3f]  ;;  %v2542_v13 = vmul.f32 %v5007_v39, %v5089_v24 }
 0x20d   : > { %v1728_v63 = vadd.f32 %v1724_v7, %v1707_v19  ;;  %2469 = vrot.lane.b32.xlu0 %v2465_v10, %s3021_s6  ;;  %v2453_v19 = vrot.slane %v2446_v47, 6  ;;  %v2527_v10 = vrot.slane %v2521_v29, 3  ;;  %v2528_v7 = vrot.slane %v5082_v46, 3 }
 0x20e   : > { %v1799_v16 = vadd.f32 %v1797_v30, %v1790_v6  ;;  %2415 = vrot.lane.b32.xlu1 %v2412_v27, %s3020_s26  ;;  %v2481_v47 = vmul.f32 %v5106_v11, %v4992_v31  ;;  %v1856_v5 = vmul.f32 %v5106_v11, %v4963_v17  ;;  %v2563_v31 = vmul.f32 %v5007_v39, %v5111_v4 }
 0x20f   : > { %v5069_v22 = vpop.permute.xlu0 %1909  ;;  %v5143_v29 = vmul.f32 %v5000_v43, %v5111_v4  ;;  %v2548_v17 = vrot.slane %v2542_v13, 4 }
 0x210   : > { %v1816_v30 = vadd.f32 %v1811_v18, %v1799_v16  ;;  %v1745_v42 = vpop.permute.xlu1 %1744  ;;  %v1862_v18 = vsel %vm906_vm2, %v1860_v26, %v1861_v32  ;;  %v1805_v26 = vmul.f32 %v5106_v11, %v4893_v51  ;;  %v2454_v51 = vsel %vm942_vm6, %v2451_v9, %v2453_v19 }
 0x211   : > { %v1749_v8 = vadd.f32 %v1745_v42, %v1728_v63  ;;  %2490 = vrot.lane.b32.xlu0 %v2487_v36, %s3021_s6  ;;  %v5118_v63 = vmul.f32 %v5000_v43, %v5089_v24  ;;  %v1822_v16 = vmul.f32 %v5106_v11, %v4915_v37  ;;  %v2488_v59 = vrot.slane %v2481_v47, 1 }
 0x212   : > { %v1833_v45 = vadd.f32 %v1828_v25, %v1816_v30  ;;  %2436 = vrot.lane.b32.xlu1 %v2433_v48, %s3020_s26  ;;  %v1839_v25 = vmul.f32 %v5106_v11, %v4932_v57  ;;  %v1812_v20 = vrot.slane %v1805_v26, 1  ;;  %v2529_v57 = vsel %vm888_vm14, %v2527_v10, %v2528_v7 }
 0x213   : > { %v1931_v33 = vpop.permute.xlu0 %1930  ;;  %v2549_v30 = vrot.slane %v5118_v63, 4  ;;  %v2502_v36 = vmul.f32 %v5106_v11, %v5022_v50  ;;  %v1829_v19 = vrot.slane %v1822_v16, 2  ;;  %v2569_v10 = vrot.slane %v2563_v31, 5 }
 0x214   : > { %v1850_v0 = vadd.f32 %v1845_v34, %v1833_v45  ;;  %v1766_v6 = vpop.permute.xlu1 %1765  ;;  %v2570_v50 = vrot.slane %v5143_v29, 5  ;;  %v1863_v47 = vrot.slane %v1856_v5, 4 }
 0x215   : > { %v1770_v27 = vadd.f32 %v1766_v6, %v1749_v8  ;;  %2511 = vrot.lane.b32.xlu0 %v2508_v1, %s3021_s6  ;;  %v5155_v8 = vstv %s5091_s27  ;;  %v1813_v1 = vsel %vm852_vm15, %v1810_v62, %v1812_v20  ;;  %v2509_v13 = vrot.slane %v2502_v36, 2 }
 0x216   : > { %v1867_v54 = vadd.f32 %v1862_v18, %v1850_v0  ;;  %2457 = vrot.lane.b32.xlu1 %v2454_v51, %s3020_s26  ;;  %s5149_s26 = sld [smem:[#allocation3 + $0x3e]]  ;;  %v1846_v18 = vrot.slane %v1839_v25, 3  ;;  %v2584_v6 = vmul.f32 %v5007_v39, %v5155_v8  ;;  %v5178_v38 = vmul.f32 %v5000_v43, %v5155_v8 }
 0x217   : > { %v1952_v9 = vpop.permute.xlu0 %1951  ;;  %v2510_v56 = vsel %vm870_vm13, %v2507_v2, %v2509_v13  ;;  %v2565_v36 = vmul.f32 %v5106_v11, %v5111_v4 }
 0x218   : > { %v1884_v37 = vadd.f32 %v1879_v23, %v1867_v54  ;;  %v1787_v34 = vpop.permute.xlu1 %1786  ;;  %v1873_v23 = vmul.f32 %v5106_v11, %v4980_v60  ;;  %v2550_v60 = vsel %vm906_vm2, %v2548_v17, %v2549_v30  ;;  %v1890_v54 = vmul.f32 %v5106_v11, %v5012_v53 }
 0x219   : > { %v1791_v42 = vadd.f32 %v1787_v34, %v1770_v27  ;;  %2532 = vrot.lane.b32.xlu0 %v2529_v57, %s3021_s6  ;;  %v2523_v27 = vmul.f32 %v5106_v11, %v5055_v28  ;;  %v1847_v61 = vsel %vm888_vm14, %v1844_v3, %v1846_v18  ;;  %v2571_v28 = vsel %vm924_vm0, %v2569_v10, %v2570_v50 }
 0x21a   : > { %v1901_v48 = vadd.f32 %v1896_v15, %v1884_v37  ;;  %2471 = vrot.lane.b32.xlu1 %v2466_v14, %s3021_s6  ;;  %v2591_v5 = vrot.slane %v5178_v38, 6  ;;  %v2544_v14 = vmul.f32 %v5106_v11, %v5089_v24  ;;  %v1897_v31 = vrot.slane %v1890_v54, 6 }
 0x21b   : > { %v1800_v45 = vadd.f32 %v1798_v58, %v1791_v42  ;;  %v1973_v26 = vpop.permute.xlu0 %1972  ;;  %v1830_v58 = vsel %vm870_vm13, %v1827_v35, %v1829_v19  ;;  %v2530_v3 = vrot.slane %v2523_v27, 3  ;;  %v2604_v34 = vstv %s5160_s28 }
 0x21c   : > { %v1915_v15 = vadd.f32 %v5069_v22, %v1901_v48  ;;  %v5169_v0 = vpop.permute.xlu1 %1911  ;;  %v2489_v22 = vsel %vm852_vm15, %v2486_v55, %v2488_v59  ;;  %v1880_v55 = vrot.slane %v1873_v23, 5  ;;  %v5200_v53 = vstv %s5149_s26 }
 0x21d   : > { %v1817_v62 = vadd.f32 %v1813_v1, %v1800_v45  ;;  %2553 = vrot.lane.b32.xlu0 %v2550_v60, %s3021_s6  ;;  %v2619_v41 = vmul.f32 %v5007_v39, %v5200_v53  ;;  %v5219_v2 = vmul.f32 %v5000_v43, %v5200_v53  ;;  %v5222_v24 = vstv %s5166_s29 }
 0x21e   : > { %v1936_v51 = vadd.f32 %v1931_v33, %v1915_v15  ;;  %2492 = vrot.lane.b32.xlu1 %v2489_v22, %s3021_s6  ;;  %v2590_v33 = vrot.slane %v2584_v6, 6  ;;  %v1881_v40 = vsel %vm924_vm0, %v1878_v21, %v1880_v55  ;;  %v2531_v12 = vsel %vm888_vm14, %v2528_v7, %v2530_v3 }
 0x21f   : > { %v1834_v16 = vadd.f32 %v1830_v58, %v1817_v62  ;;  %v1994_v25 = vpop.permute.xlu0 %1993  ;;  %v2551_v19 = vrot.slane %v2544_v14, 4  ;;  %v1898_v21 = vsel %vm942_vm6, %v1895_v44, %v1897_v31  ;;  %v2605_v4 = vmul.f32 %v5007_v39, %v2604_v34 }
 0x220   : > { %v1957_v49 = vadd.f32 %v1952_v9, %v1936_v51  ;;  %v1933_v35 = vpop.permute.xlu1 %1932  ;;  %v1864_v9 = vsel %vm906_vm2, %v1861_v32, %v1863_v47  ;;  %v2592_v59 = vsel %vm942_vm6, %v2590_v33, %v2591_v5  ;;  %v2640_v23 = vmul.f32 %v5007_v39, %v5222_v24 }
 0x221   : > { %v1851_v20 = vadd.f32 %v1847_v61, %v1834_v16  ;;  %2574 = vrot.lane.b32.xlu0 %v2571_v28, %s3021_s6  ;;  %v2625_v46 = vrot.slane %v2619_v41, 1  ;;  %v2626_v7 = vrot.slane %v5219_v2, 1  ;;  %v5250_v52 = vmul.f32 %v5000_v43, %v5222_v24 }
 0x222   : > { %v1978_v37 = vadd.f32 %v1973_v26, %v1957_v49  ;;  %2513 = vrot.lane.b32.xlu1 %v2510_v56, %s3021_s6  ;;  %v2572_v10 = vrot.slane %v2565_v36, 5  ;;  %v2552_v60 = vsel %vm906_vm2, %v2549_v30, %v2551_v19  ;;  %v2586_v6 = vmul.f32 %v5106_v11, %v5155_v8 }
 0x223   : > { %v1868_v57 = vadd.f32 %v1864_v9, %v1851_v20  ;;  %v2015_v17 = vpop.permute.xlu0 %2014  ;;  %v2660_v62 = vstv %s5208_s24  ;;  %v2646_v27 = vrot.slane %v2640_v23, 2  ;;  %v2647_v51 = vrot.slane %v5250_v52, 2 }
 0x224   : > { %v1999_v32 = vadd.f32 %v1994_v25, %v1978_v37  ;;  %v1954_v42 = vpop.permute.xlu1 %1953  ;;  %v2661_v30 = vmul.f32 %v5007_v39, %v2660_v62  ;;  %v5269_v8 = vmul.f32 %v5000_v43, %v2660_v62  ;;  %v2681_v47 = vstv %s5232_s30 }
 0x225   : > { %v1885_v48 = vadd.f32 %v1881_v40, %v1868_v57  ;;  %2595 = vrot.lane.b32.xlu0 %v2592_v59, %s3021_s6  ;;  %v2573_v16 = vsel %vm924_vm0, %v2570_v50, %v2572_v10  ;;  %v2593_v61 = vrot.slane %v2586_v6, 6  ;;  %v2682_v28 = vmul.f32 %v5007_v39, %v2681_v47 }
 0x226   : > { %v2020_v18 = vadd.f32 %v2015_v17, %v1999_v32  ;;  %2534 = vrot.lane.b32.xlu1 %v2531_v12, %s3021_s6  ;;  %v5281_v49 = vmul.f32 %v5000_v43, %v2681_v47  ;;  %v2648_v29 = vsel %vm870_vm13, %v2646_v27, %v2647_v51  ;;  %v2667_v50 = vrot.slane %v2661_v30, 3 }
 0x227   : > { %v1902_v45 = vadd.f32 %v1898_v21, %v1885_v48  ;;  %v2036_v1 = vpop.permute.xlu0 %2035  ;;  %v2668_v20 = vrot.slane %v5269_v8, 3  ;;  %v2594_v3 = vsel %vm942_vm6, %v2591_v5, %v2593_v61  ;;  %v2621_v14 = vmul.f32 %v5106_v11, %v5200_v53 }
 0x228   : > { %v2041_v44 = vadd.f32 %v2036_v1, %v2020_v18  ;;  %v1975_v26 = vpop.permute.xlu1 %1974  ;;  %v2702_v9 = vstv %s5260_s3  ;;  %v2606_v57 = vmul.f32 %v5000_v43, %v2604_v34  ;;  %v2688_v17 = vrot.slane %v2682_v28, 4 }
 0x229   : > { %v1916_v15 = vadd.f32 %v5169_v0, %v1902_v45  ;;  %2609 = vrot.lane.b32.xlu0 %v2605_v4, %s3022_s25  ;;  %v2627_v0 = vsel %vm852_vm15, %v2625_v46, %v2626_v7  ;;  %v2689_v41 = vrot.slane %v5281_v49, 4  ;;  %v2669_v5 = vsel %vm888_vm14, %v2667_v50, %v2668_v20 }
 0x22a   : > { %2555 = vrot.lane.b32.xlu1 %v2552_v60, %s3021_s6  ;;  %v2703_v32 = vmul.f32 %v5007_v39, %v2702_v9  ;;  %v2704_v53 = vmul.f32 %v5000_v43, %v2702_v9  ;;  %v2628_v59 = vrot.slane %v2621_v14, 1  ;;  %v2642_v36 = vmul.f32 %v5106_v11, %v5222_v24 }
 0x22b   : > { %v1937_v22 = vadd.f32 %v1933_v35, %v1916_v15  ;;  %v2050_v13 = vpop.permute.xlu0 %2049  ;;  %v2723_v34 = vstv %s5276_s4  ;;  %v2690_v12 = vsel %vm906_vm2, %v2688_v17, %v2689_v41  ;;  %v2663_v46 = vmul.f32 %v5106_v11, %v2660_v62 }
 0x22c   : > { %v2055_v63 = vadd.f32 %v2050_v13, %v2041_v44  ;;  %v1996_v58 = vpop.permute.xlu1 %1995  ;;  %v2709_v21 = vrot.slane %v2703_v32, 5  ;;  %v2710_v18 = vrot.slane %v2704_v53, 5  ;;  %v2724_v4 = vmul.f32 %v5007_v39, %v2723_v34 }
 0x22d   : > { %v1958_v54 = vadd.f32 %v1954_v42, %v1937_v22  ;;  %2630 = vrot.lane.b32.xlu0 %v2627_v0, %s3022_s25  ;;  %v2725_v23 = vmul.f32 %v5000_v43, %v2723_v34  ;;  %v2629_v24 = vsel %vm852_vm15, %v2626_v7, %v2628_v59  ;;  %v2649_v1 = vrot.slane %v2642_v36, 2 }
 0x22e   : > { %2576 = vrot.lane.b32.xlu1 %v2573_v16, %s3021_s6  ;;  %v2711_v10 = vsel %vm924_vm0, %v2709_v21, %v2710_v18  ;;  %v2730_v15 = vrot.slane %v2724_v4, 6  ;;  %v2670_v2 = vrot.slane %v2663_v46, 3  ;;  %v2684_v7 = vmul.f32 %v5106_v11, %v2681_v47 }
 0x22f   : > { %v1979_v55 = vadd.f32 %v1975_v26, %v1958_v54  ;;  %v2071_v25 = vpop.permute.xlu0 %2070  ;;  %v2731_v39 = vrot.slane %v2725_v23, 6  ;;  %v2650_v43 = vsel %vm870_vm13, %v2647_v51, %v2649_v1  ;;  %v2726_v8 = vmul.f32 %v5106_v11, %v2723_v34 }
 0x230   : > { %v2076_v35 = vadd.f32 %v2071_v25, %v2055_v63  ;;  %v2017_v33 = vpop.permute.xlu1 %2016  ;;  %v2671_v0 = vsel %vm888_vm14, %v2668_v20, %v2670_v2  ;;  %v2691_v27 = vrot.slane %v2684_v7, 4  ;;  %v2705_v63 = vmul.f32 %v5106_v11, %v2702_v9 }
 0x231   : > { %v2000_v56 = vadd.f32 %v1996_v58, %v1979_v55  ;;  %2651 = vrot.lane.b32.xlu0 %v2648_v29, %s3022_s25  ;;  %v2732_v22 = vsel %vm942_vm6, %v2730_v15, %v2731_v39  ;;  %v2733_v61 = vrot.slane %v2726_v8, 6 }
 0x232   : > { %2597 = vrot.lane.b32.xlu1 %v2594_v3, %s3021_s6  ;;  %v2692_v58 = vsel %vm906_vm2, %v2689_v41, %v2691_v27  ;;  %v2712_v30 = vrot.slane %v2705_v63, 5  ;;  %s5341_s6 = sld [smem:[#allocation3 + $0x62]] }
 0x233   : > { %v2021_v31 = vadd.f32 %v2017_v33, %v2000_v56  ;;  %v2092_v37 = vpop.permute.xlu0 %2091  ;;  %v2734_v28 = vsel %vm942_vm6, %v2731_v39, %v2733_v61 }
 0x234   : > { %v5299_v40 = vadd.f32 %v2092_v37, %v2076_v35  ;;  %v2038_v38 = vpop.permute.xlu1 %2037  ;;  %v2713_v16 = vsel %vm924_vm0, %v2710_v18, %v2712_v30  ;;  %vm5392_vm0 = vcmask 130048  }
 0x235   : > { %v2042_v42 = vadd.f32 %v2038_v38, %v2021_v31  ;;  %2672 = vrot.lane.b32.xlu0 %v2669_v5, %s3022_s25  ;;  %vm5393_vm1 = vmmov %vm5392_vm0 }
 0x236   : > { %2611 = vrot.lane.b32.xlu1 %v2606_v57, %s3022_s25 }
 0x237   : > { %v5309_v48 = vpop.permute.xlu0 %2112 }
 0x238   : > { %v2052_v19 = vpop.permute.xlu1 %2051 }
 0x239   : > { %v2056_v45 = vadd.f32 %v2052_v19, %v2042_v42  ;;  %2693 = vrot.lane.b32.xlu0 %v2690_v12, %s3022_s25  ;;  %v2118_v42 = vadd.f32 %v5309_v48, %v5299_v40 }
 0x23a   : > { %2632 = vrot.lane.b32.xlu1 %v2629_v24, %s3022_s25 }
 0x23b   : > { %v2134_v44 = vpop.permute.xlu0 %2133 }
 0x23c   : > { %v2073_v26 = vpop.permute.xlu1 %2072  ;;  %v2139_v36 = vadd.f32 %v2134_v44, %v2118_v42 }
 0x23d   : > { %v2077_v60 = vadd.f32 %v2073_v26, %v2056_v45  ;;  %2714 = vrot.lane.b32.xlu0 %v2711_v10, %s3022_s25 }
 0x23e   : > { %2653 = vrot.lane.b32.xlu1 %v2650_v43, %s3022_s25 }
 0x23f   : > { %v2155_v6 = vpop.permute.xlu0 %2154 }
 0x240   : > { %v2094_v62 = vpop.permute.xlu1 %2093  ;;  %v2160_v12 = vadd.f32 %v2155_v6, %v2139_v36 }
 0x241   : > { %v2098_v13 = vadd.f32 %v2094_v62, %v2077_v60  ;;  %2735 = vrot.lane.b32.xlu0 %v2732_v22, %s3022_s25 }
 0x242   : > { %2674 = vrot.lane.b32.xlu1 %v2671_v0, %s3022_s25 }
 0x243   : > { %v2176_v52 = vpop.permute.xlu0 %2175 }
 0x244   : > { %v2115_v51 = vpop.permute.xlu1 %2114  ;;  %v2181_v21 = vadd.f32 %v2176_v52, %v2160_v12 }
 0x245   : > { %v2119_v46 = vadd.f32 %v2115_v51, %v2098_v13 }
 0x246   : > { %2695 = vrot.lane.b32.xlu1 %v2692_v58, %s3022_s25 }
 0x247   : > { %v2190_v47 = vpop.permute.xlu0 %2189 }
 0x248   : > { %v2136_v54 = vpop.permute.xlu1 %2135  ;;  %v2195_v4 = vadd.f32 %v2190_v47, %v2181_v21 }
 0x249   : > { %v2140_v39 = vadd.f32 %v2136_v54, %v2119_v46 }
 0x24a   : > { %2716 = vrot.lane.b32.xlu1 %v2713_v16, %s3022_s25 }
 0x24b   : > { %v2211_v55 = vpop.permute.xlu0 %2210 }
 0x24c   : > { %v2157_v25 = vpop.permute.xlu1 %2156  ;;  %v2216_v45 = vadd.f32 %v2211_v55, %v2195_v4 }
 0x24d   : > { %v2161_v43 = vadd.f32 %v2157_v25, %v2140_v39 }
 0x24e   : > { %2737 = vrot.lane.b32.xlu1 %v2734_v28, %s3022_s25  ;;  %s2941_s25 = sld [smem:[#allocation3 + $0x63]] }
 0x24f   : > { %v2232_v49 = vpop.permute.xlu0 %2231 }
 0x250   : > { %v2178_v35 = vpop.permute.xlu1 %2177  ;;  %v2237_v1 = vadd.f32 %v2232_v49, %v2216_v45 }
 0x251   : > { %v2182_v2 = vadd.f32 %v2178_v35, %v2161_v43 }
 0x253   : > { %v2253_v33 = vpop.permute.xlu0 %2252 }
 0x254   : > { %v2192_v29 = vpop.permute.xlu1 %2191  ;;  %v2258_v10 = vadd.f32 %v2253_v33, %v2237_v1 }
 0x255   : > { %v2196_v6 = vadd.f32 %v2192_v29, %v2182_v2 }
 0x257   : > { %v2274_v11 = vpop.permute.xlu0 %2273 }
 0x258   : > { %v2213_v50 = vpop.permute.xlu1 %2212  ;;  %v2279_v60 = vadd.f32 %v2274_v11, %v2258_v10 }
 0x259   : > { %v2217_v27 = vadd.f32 %v2213_v50, %v2196_v6 }
 0x25b   : > { %v2295_v20 = vpop.permute.xlu0 %2294 }
 0x25c   : > { %v2234_v56 = vpop.permute.xlu1 %2233  ;;  %v2300_v48 = vadd.f32 %v2295_v20, %v2279_v60 }
 0x25d   : > { %v2238_v52 = vadd.f32 %v2234_v56, %v2217_v27 }
 0x25f   : > { %v2316_v3 = vpop.permute.xlu0 %2315 }
 0x260   : > { %v2255_v14 = vpop.permute.xlu1 %2254  ;;  %v2321_v7 = vadd.f32 %v2316_v3, %v2300_v48 }
 0x261   : > { %v2259_v30 = vadd.f32 %v2255_v14, %v2238_v52 }
 0x263   : > { %v2330_v9 = vpop.permute.xlu0 %2329 }
 0x264   : > { %v2276_v31 = vpop.permute.xlu1 %2275  ;;  %v2335_v22 = vadd.f32 %v2330_v9, %v2321_v7 }
 0x265   : > { %v2280_v47 = vadd.f32 %v2276_v31, %v2259_v30 }
 0x267   : > { %v2351_v37 = vpop.permute.xlu0 %2350 }
 0x268   : > { %v2297_v57 = vpop.permute.xlu1 %2296  ;;  %v2356_v63 = vadd.f32 %v2351_v37, %v2335_v22  ;;  %v2748_v22 = vstv %s2941_s25 }
 0x269   : > { %v2301_v55 = vadd.f32 %v2297_v57, %v2280_v47 }
 0x26b   : > { %v2372_v17 = vpop.permute.xlu0 %2371 }
 0x26c   : > { %v2318_v41 = vpop.permute.xlu1 %2317  ;;  %v2377_v13 = vadd.f32 %v2372_v17, %v2356_v63 }
 0x26d   : > { %v2322_v28 = vadd.f32 %v2318_v41, %v2301_v55 }
 0x26f   : > { %v2393_v38 = vpop.permute.xlu0 %2392 }
 0x270   : > { %v2332_v5 = vpop.permute.xlu1 %2331  ;;  %v2398_v8 = vadd.f32 %v2393_v38, %v2377_v13 }
 0x271   : > { %v2336_v29 = vadd.f32 %v2332_v5, %v2322_v28 }
 0x273   : > { %v2414_v32 = vpop.permute.xlu0 %2413 }
 0x274   : > { %v2353_v53 = vpop.permute.xlu1 %2352  ;;  %v2419_v16 = vadd.f32 %v2414_v32, %v2398_v8 }
 0x275   : > { %v2357_v50 = vadd.f32 %v2353_v53, %v2336_v29 }
 0x277   : > { %v2435_v59 = vpop.permute.xlu0 %2434 }
 0x278   : > { %v2374_v34 = vpop.permute.xlu1 %2373  ;;  %v2440_v25 = vadd.f32 %v2435_v59, %v2419_v16 }
 0x279   : > { %v2378_v9 = vadd.f32 %v2374_v34, %v2357_v50 }
 0x27b   : > { %v2456_v19 = vpop.permute.xlu0 %2455 }
 0x27c   : > { %v2395_v18 = vpop.permute.xlu1 %2394  ;;  %v2461_v35 = vadd.f32 %v2456_v19, %v2440_v25 }
 0x27d   : > { %v2399_v14 = vadd.f32 %v2395_v18, %v2378_v9 }
 0x27f   : > { %v2470_v23 = vpop.permute.xlu0 %2469 }
 0x280   : > { %v2416_v24 = vpop.permute.xlu1 %2415  ;;  %v2475_v11 = vadd.f32 %v2470_v23, %v2461_v35 }
 0x281   : > { %v2420_v32 = vadd.f32 %v2416_v24, %v2399_v14 }
 0x283   : > { %v2491_v26 = vpop.permute.xlu0 %2490 }
 0x284   : > { %v2437_v15 = vpop.permute.xlu1 %2436  ;;  %v2496_v56 = vadd.f32 %v2491_v26, %v2475_v11 }
 0x285   : > { %v2441_v57 = vadd.f32 %v2437_v15, %v2420_v32 }
 0x287   : > { %v2512_v40 = vpop.permute.xlu0 %2511 }
 0x288   : > { %v2458_v44 = vpop.permute.xlu1 %2457  ;;  %v2517_v37 = vadd.f32 %v2512_v40, %v2496_v56 }
 0x289   : > { %v2462_v12 = vadd.f32 %v2458_v44, %v2441_v57  ;;  %v2744_v44 = vstv %s5341_s6 }
 0x28b   : > { %v2533_v62 = vpop.permute.xlu0 %2532 }
 0x28c   : > { %v2472_v0 = vpop.permute.xlu1 %2471  ;;  %v2538_v31 = vadd.f32 %v2533_v62, %v2517_v37 }
 0x28d   : > { %v2476_v5 = vadd.f32 %v2472_v0, %v2462_v12 }
 0x28f   : > { %v2554_v58 = vpop.permute.xlu0 %2553 }
 0x290   : > { %v2493_v51 = vpop.permute.xlu1 %2492  ;;  %v2559_v42 = vadd.f32 %v2554_v58, %v2538_v31 }
 0x291   : > { %v2497_v23 = vadd.f32 %v2493_v51, %v2476_v5 }
 0x293   : > { %v2575_v54 = vpop.permute.xlu0 %2574 }
 0x294   : > { %v2514_v61 = vpop.permute.xlu1 %2513  ;;  %v2580_v41 = vadd.f32 %v2575_v54, %v2559_v42 }
 0x295   : > { %v2518_v34 = vadd.f32 %v2514_v61, %v2497_v23 }
 0x297   : > { %v2596_v49 = vpop.permute.xlu0 %2595 }
 0x298   : > { %v2535_v33 = vpop.permute.xlu1 %2534  ;;  %v2601_v19 = vadd.f32 %v2596_v49, %v2580_v41 }
 0x299   : > { %v2539_v46 = vadd.f32 %v2535_v33, %v2518_v34 }
 0x29b   : > { %v2610_v20 = vpop.permute.xlu0 %2609 }
 0x29c   : > { %v2556_v3 = vpop.permute.xlu1 %2555  ;;  %v2615_v53 = vadd.f32 %v2610_v20, %v2601_v19 }
 0x29d   : > { %v2560_v10 = vadd.f32 %v2556_v3, %v2539_v46 }
 0x29f   : > { %v2631_v17 = vpop.permute.xlu0 %2630 }
 0x2a0   : > { %v2577_v38 = vpop.permute.xlu1 %2576  ;;  %v2636_v45 = vadd.f32 %v2631_v17, %v2615_v53 }
 0x2a1   : > { %v2581_v43 = vadd.f32 %v2577_v38, %v2560_v10 }
 0x2a3   : > { %v2652_v59 = vpop.permute.xlu0 %2651 }
 0x2a4   : > { %v2598_v36 = vpop.permute.xlu1 %2597  ;;  %v2657_v18 = vadd.f32 %v2652_v59, %v2636_v45 }
 0x2a5   : > { %v2602_v48 = vadd.f32 %v2598_v36, %v2581_v43 }
 0x2a7   : > { %v2673_v21 = vpop.permute.xlu0 %2672 }
 0x2a8   : > { %v2612_v4 = vpop.permute.xlu1 %2611  ;;  %v2678_v26 = vadd.f32 %v2673_v21, %v2657_v18 }
 0x2a9   : > { %v2616_v62 = vadd.f32 %v2612_v4, %v2602_v48 }
 0x2ab   : > { %v2694_v1 = vpop.permute.xlu0 %2693 }
 0x2ac   : > { %v2633_v24 = vpop.permute.xlu1 %2632  ;;  %v2699_v39 = vadd.f32 %v2694_v1, %v2678_v26 }
 0x2ad   : > { %v2637_v27 = vadd.f32 %v2633_v24, %v2616_v62 }
 0x2af   : > { %v2715_v15 = vpop.permute.xlu0 %2714 }
 0x2b0   : > { %v2654_v60 = vpop.permute.xlu1 %2653  ;;  %v2720_v40 = vadd.f32 %v2715_v15, %v2699_v39 }
 0x2b1   : > { %v2658_v58 = vadd.f32 %v2654_v60, %v2637_v27 }
 0x2b3   : > { %v2736_v2 = vpop.permute.xlu0 %2735 }
 0x2b4   : > { %v2741_v7 = vadd.f32 %v2736_v2, %v2720_v40  ;;  %v2675_v6 = vpop.permute.xlu1 %2674 }
 0x2b5   : > { %v2679_v51 = vadd.f32 %v2675_v6, %v2658_v58 }
 0x2b6   : > { %v2745_v0 = vmul.f32 %v2744_v44, %v2741_v7 }
 0x2b8   : > { %v2749_v63 = vadd.f32 %v2748_v22, %v2745_v0  ;;  %v2696_v52 = vpop.permute.xlu1 %2695 }
 0x2b9   : > { %v2700_v8 = vadd.f32 %v2696_v52, %v2679_v51 }
 0x2ba   : > { %v2942_v13 = vmul.f32 -1.442695, %v2749_v63 }
 0x2bc   : > { %2974 = vpow2.f32 %v2942_v13  ;;  %v2717_v30 = vpop.permute.xlu1 %2716 }
 0x2bd   : > { %v2721_v47 = vadd.f32 %v2717_v30, %v2700_v8 }
 0x2c0   : > { %v2738_v54 = vpop.permute.xlu1 %2737 }
 0x2c1   : > { %v2742_v16 = vadd.f32 %v2738_v54, %v2721_v47 }
 0x2c3   : > { %v2746_v61 = vmul.f32 %v2744_v44, %v2742_v16 }
 0x2c5   : > { %v2750_v55 = vadd.f32 %v2748_v22, %v2746_v61 }
 0x2c6   : > { %v2975_v25 = vpop.eup %2974 }
 0x2c7   : > { %v2757_v28 = vadd.f32 1.0, %v2975_v25  ;;  %v2943_v49 = vmul.f32 -1.442695, %v2750_v55 }
 0x2c9   : > { %2976 = vrcp.f32 %v2757_v28 }
 0x2ca   : > { %2978 = vpow2.f32 %v2943_v49 }
 0x2d3   : > { %v2977_v35 = vpop.eup %2976 }
 0x2d4   : > { %v2979_v33 = vpop.eup %2978  ;;  %2763 = vst.msk [vmem:[%s157_s11] sm:$0xff] %vm5392_vm0, %v2977_v35 }
 0x2d5   : > { %v2758_v29 = vadd.f32 1.0, %v2979_v33 }
 0x2d7   : > { %2980 = vrcp.f32 %v2758_v29 }
 0x2e1   : > { %v2981_v11 = vpop.eup %2980 }
 0x2e2   : > { %2764 = vst.msk [vmem:[%s157_s11 + $0x8] sm:$0xff] %vm5393_vm1, %v2981_v11 }
 0x2e3 PF: > { %s13_s9 = sadd.s32 1, %s3013_s9  }
 0x2e4   : > { %p10_p1 = scmp.ge.s32.totalorder %s13_s9, 4  }
 0x2e6   :  { %12 = sbr.rel (!%p10_p1) target bundleno = 1 (0x1), region = 64 }
 0x2ed   :  { %2786 = vsyncpa [#allocation4], 1 }
 0x2ee   :  { %2788 = vsyncpa [#allocation4 + $0x1], 1 }

</bundles_post_ra>
